<compile_context>
chip_gen: v7x
topology: tpu7x:2x2x1
jax: 0.10.0
libtpu: 0.0.40
codegen_flags: <defaults>
</compile_context>

<pallas_src>
import functools

import jax
import jax.numpy as jnp
from jax.experimental import pallas as pl
from jax.experimental.pallas import tpu as pltpu

EPS = 1e-5
EXPANSION = 4
LANE = 128

# Above the default scoped limit on v5e/v6e/v7x, below physical VMEM everywhere.
_VMEM_LIMIT = 48 * 1024 * 1024

_PARALLEL = pltpu.CompilerParams(
    dimension_semantics=("parallel",),
    vmem_limit_bytes=_VMEM_LIMIT,
)


# ---------------------------------------------------------------------------
# small host-side helpers
# ---------------------------------------------------------------------------
def _ceil_to(v, m):
    return ((v + m - 1) // m) * m


def _pad_axis(a, axis, target):
    if a.shape[axis] == target:
        return a
    pad = [(0, 0)] * a.ndim
    pad[axis] = (0, target - a.shape[axis])
    return jnp.pad(a, pad)


def _pad_last(a, target):
    return _pad_axis(a, a.ndim - 1, target)


def _pick_row_tile(rows, target):
    """Largest multiple of 16 (preferred, bf16 sublane packing) or 8 that divides
    `rows` and is <= target; otherwise all rows."""
    for step in (16, 8):
        t = min(target, rows)
        t -= t % step
        while t >= step:
            if rows % t == 0:
                return t
            t -= step
    # TODO(synk): fallback is one giant tile; fine for typical ResNet row counts
    #             (always a multiple of a large power of two).
    return rows


def _bn_scale_shift(sum_t, ssq_t, n, gamma, beta):
    """Combine per-tile partial sums -> per-channel affine (scale, shift)."""
    s = sum_t[:, 0, :].sum(axis=0)
    q = ssq_t[:, 0, :].sum(axis=0)
    mean = s / n
    var = jnp.maximum(q / n - mean * mean, 0.0)     # biased var, train-mode BN
    scale = gamma.reshape(-1) * jax.lax.rsqrt(var + EPS)
    shift = beta.reshape(-1) - mean * scale
    return scale.reshape(1, -1), shift.reshape(1, -1)


# ---------------------------------------------------------------------------
# kernel-side helpers
# ---------------------------------------------------------------------------
def _stats_rows(y):
    """Per-channel sum / sum-of-squares of an (M, C) f32 tile, broadcast to (8, C)."""
    c = y.shape[1]
    s = jnp.sum(y, axis=0, keepdims=True)
    q = jnp.sum(y * y, axis=0, keepdims=True)
    return jnp.broadcast_to(s, (8, c)), jnp.broadcast_to(q, (8, c))


def _head_main(h2_ref, sc2_ref, sh2_ref, w3_ref):
    """bn2(affine) + relu fused into the conv3 (1x1) matmul (h2 stored bf16)."""
    a = jnp.maximum(h2_ref[...] * sc2_ref[0] + sh2_ref[0], 0.0).astype(jnp.bfloat16)
    return jnp.dot(a, w3_ref[...], preferred_element_type=jnp.float32)


# ---------------------------------------------------------------------------
# stage 1: conv1 (1x1) + bn1 partial stats (bf16 in/out, f32 stats)
# ---------------------------------------------------------------------------
def _conv1x1_stats_kernel(x_ref, w_ref, y_ref, sum_ref, ssq_ref):
    y = jnp.dot(x_ref[...], w_ref[...], preferred_element_type=jnp.float32)
    y_ref[...] = y.astype(y_ref.dtype)
    s8, q8 = _stats_rows(y)
    sum_ref[0] = s8
    ssq_ref[0] = q8


# ---------------------------------------------------------------------------
# stage 2: bn1+relu fused into conv2 (3x3, stride, pad=1) + bn2 partial stats
#   - halo built by value-side concatenation (no scratch zero-fill)
#   - kw-folded taps: 3 dots with K=3*C, no accumulator RMW loop
# ---------------------------------------------------------------------------
def _conv3x3_stats_kernel(h1_ref, sc1_ref, sh1_ref, w2_ref,
                          h2_ref, sum_ref, ssq_ref, *, stride):
    H, W, C = h1_ref.shape[1], h1_ref.shape[2], h1_ref.shape[3]
    Ho, Wo, Co = h2_ref.shape[1], h2_ref.shape[2], h2_ref.shape[3]
    bf16 = jnp.bfloat16

    # bn1 affine + relu on the bf16-stored activation.
    a = jnp.maximum(h1_ref[0] * sc1_ref[0] + sh1_ref[0], 0.0).astype(bf16)

    # Build the 1-pixel-padded image as a value (zeros only on the border).
    z_col = jnp.zeros((H, 1, C), bf16)
    z_row = jnp.zeros((1, W + 2, C), bf16)
    xp = jnp.concatenate(
        [z_row, jnp.concatenate([z_col, a, z_col], axis=1), z_row], axis=0)

    hspan = (Ho - 1) * stride + 1
    wspan = (Wo - 1) * stride + 1
    acc = None
    for kh in range(3):
        rows = xp[kh:kh + hspan:stride]                       # (Ho, W+2, C)
        # TODO(synk): the kw offsets could be sublane shifts via pltpu.roll instead
        #             of value slices to keep relayout off the vld/vst slots.
        patch = jnp.concatenate(
            [rows[:, kw:kw + wspan:stride, :] for kw in range(3)],
            axis=-1).reshape(Ho * Wo, 3 * C)                   # (Ho*Wo, 3C) bf16
        d = jnp.dot(patch, w2_ref[kh], preferred_element_type=jnp.float32)
        acc = d if acc is None else acc + d

    h2_ref[0] = acc.reshape(Ho, Wo, Co).astype(h2_ref.dtype)
    s8, q8 = _stats_rows(acc)
    sum_ref[0] = s8
    ssq_ref[0] = q8


# ---------------------------------------------------------------------------
# stage 3/4: bn2+relu + conv3 (+ shortcut conv) -> stats, then final fused apply
# ---------------------------------------------------------------------------
def _head_stats_proj_kernel(h2_ref, sc2_ref, sh2_ref, w3_ref, xs_ref, ws_ref,
                            msum_ref, mssq_ref, ssum_ref, sssq_ref):
    m = _head_main(h2_ref, sc2_ref, sh2_ref, w3_ref)
    s8, q8 = _stats_rows(m)
    msum_ref[0] = s8
    mssq_ref[0] = q8
    sc = jnp.dot(xs_ref[...], ws_ref[...], preferred_element_type=jnp.float32)
    s8, q8 = _stats_rows(sc)
    ssum_ref[0] = s8
    sssq_ref[0] = q8


def _head_stats_id_kernel(h2_ref, sc2_ref, sh2_ref, w3_ref, msum_ref, mssq_ref):
    m = _head_main(h2_ref, sc2_ref, sh2_ref, w3_ref)
    s8, q8 = _stats_rows(m)
    msum_ref[0] = s8
    mssq_ref[0] = q8


def _head_final_proj_kernel(h2_ref, sc2_ref, sh2_ref, w3_ref, xs_ref, ws_ref,
                            sc3_ref, sh3_ref, scs_ref, shs_ref, out_ref):
    m = _head_main(h2_ref, sc2_ref, sh2_ref, w3_ref)
    sc = jnp.dot(xs_ref[...], ws_ref[...], preferred_element_type=jnp.float32)
    out_ref[...] = jnp.maximum(m * sc3_ref[0] + sh3_ref[0]
                               + sc * scs_ref[0] + shs_ref[0], 0.0)


def _head_final_id_kernel(h2_ref, sc2_ref, sh2_ref, w3_ref, xs_ref,
                          sc3_ref, sh3_ref, out_ref):
    m = _head_main(h2_ref, sc2_ref, sh2_ref, w3_ref)
    out_ref[...] = jnp.maximum(m * sc3_ref[0] + sh3_ref[0] + xs_ref[...], 0.0)


# ---------------------------------------------------------------------------
# forward
# ---------------------------------------------------------------------------
def bottleneck_forward(x_nchw, params, stride=1, row_tile=512):
    """Bottleneck forward. Input/output NCHW (to match the PyTorch module)."""
    x = jnp.transpose(x_nchw, (0, 2, 3, 1)).astype(jnp.float32)   # NHWC
    B, H, W, Cin = x.shape
    planes = params["w1"].shape[1]
    cout = EXPANSION * planes
    Ho = (H - 1) // stride + 1
    Wo = (W - 1) // stride + 1
    has_proj = (stride != 1) or (Cin != cout)

    cin_p = _ceil_to(Cin, LANE)
    pl_p = _ceil_to(planes, LANE)
    co_p = _ceil_to(cout, LANE)

    f32, bf16 = jnp.float32, jnp.bfloat16

    # lane-pad weights / affine params once (tiny); weights in bf16 for the MXU
    w1 = _pad_axis(_pad_axis(params["w1"], 0, cin_p), 1, pl_p).astype(bf16)
    w2 = _pad_axis(_pad_axis(params["w2"], 2, pl_p), 3, pl_p).astype(bf16)
    w2r = w2.reshape(3, 3 * pl_p, pl_p)                       # kw-folded: (3, 3C, C)
    w3 = _pad_axis(_pad_axis(params["w3"], 0, pl_p), 1, co_p).astype(bf16)
    g1, b1 = _pad_last(params["g1"], pl_p), _pad_last(params["b1"], pl_p)
    g2, b2 = _pad_last(params["g2"], pl_p), _pad_last(params["b2"], pl_p)
    g3, b3 = _pad_last(params["g3"], co_p), _pad_last(params["b3"], co_p)
    if has_proj:
        ws = _pad_axis(_pad_axis(params["ws"], 0, cin_p), 1, co_p).astype(bf16)
        gs, bs = _pad_last(params["gs"], co_p), _pad_last(params["bs"], co_p)

    # bf16 activations everywhere between kernels (halves HBM traffic)
    xp = _pad_last(x, cin_p).astype(bf16)                     # (B,H,W,cin_p) bf16
    rows1 = B * H * W
    rows2 = B * Ho * Wo
    tm1 = _pick_row_tile(rows1, row_tile)
    tm2 = _pick_row_tile(rows2, row_tile)
    t1 = rows1 // tm1
    t2 = rows2 // tm2

    # ---- stage 1: conv1 (1x1) + bn1 partial stats --------------------------
    x2d = xp.reshape(rows1, cin_p)
    h1_2d, s1, q1 = pl.pallas_call(
        _conv1x1_stats_kernel,
        grid=(t1,),
        in_specs=[pl.BlockSpec((tm1, cin_p), lambda i: (i, 0)),
                  pl.BlockSpec((cin_p, pl_p), lambda i: (0, 0))],
        out_specs=[pl.BlockSpec((tm1, pl_p), lambda i: (i, 0)),
                   pl.BlockSpec((1, 8, pl_p), lambda i: (i, 0, 0)),
                   pl.BlockSpec((1, 8, pl_p), lambda i: (i, 0, 0))],
        out_shape=[jax.ShapeDtypeStruct((rows1, pl_p), bf16),
                   jax.ShapeDtypeStruct((t1, 8, pl_p), f32),
                   jax.ShapeDtypeStruct((t1, 8, pl_p), f32)],
        compiler_params=_PARALLEL,
    )(x2d, w1)
    sc1, sh1 = _bn_scale_shift(s1, q1, rows1, g1, b1)

    # ---- stage 2: bn1+relu fused into 3x3 conv + bn2 partial stats ---------
    h1_4d = h1_2d.reshape(B, H, W, pl_p)
    h2_4d, s2, q2 = pl.pallas_call(
        functools.partial(_conv3x3_stats_kernel, stride=stride),
        grid=(B,),
        in_specs=[pl.BlockSpec((1, H, W, pl_p), lambda b: (b, 0, 0, 0)),
                  pl.BlockSpec((1, pl_p), lambda b: (0, 0)),
                  pl.BlockSpec((1, pl_p), lambda b: (0, 0)),
                  pl.BlockSpec((3, 3 * pl_p, pl_p), lambda b: (0, 0, 0))],
        out_specs=[pl.BlockSpec((1, Ho, Wo, pl_p), lambda b: (b, 0, 0, 0)),
                   pl.BlockSpec((1, 8, pl_p), lambda b: (b, 0, 0)),
                   pl.BlockSpec((1, 8, pl_p), lambda b: (b, 0, 0))],
        out_shape=[jax.ShapeDtypeStruct((B, Ho, Wo, pl_p), bf16),
                   jax.ShapeDtypeStruct((B, 8, pl_p), f32),
                   jax.ShapeDtypeStruct((B, 8, pl_p), f32)],
        compiler_params=_PARALLEL,
    )(h1_4d, sc1, sh1, w2r)
    sc2, sh2 = _bn_scale_shift(s2, q2, rows2, g2, b2)

    # ---- stage 3/4: conv3 + shortcut, two-pass bn3/bn_s, fused add+relu -----
    h2_2d = h2_4d.reshape(rows2, pl_p)
    xs2d = (xp if stride == 1 else xp[:, ::stride, ::stride, :]).reshape(rows2, cin_p)

    stat_blk = pl.BlockSpec((1, 8, co_p), lambda i: (i, 0, 0))
    vec_pl = pl.BlockSpec((1, pl_p), lambda i: (0, 0))
    vec_co = pl.BlockSpec((1, co_p), lambda i: (0, 0))
    h2_blk = pl.BlockSpec((tm2, pl_p), lambda i: (i, 0))
    xs_blk = pl.BlockSpec((tm2, cin_p), lambda i: (i, 0))
    w3_blk = pl.BlockSpec((pl_p, co_p), lambda i: (0, 0))

    if has_proj:
        ws_blk = pl.BlockSpec((cin_p, co_p), lambda i: (0, 0))
        s3, q3, ss, qs = pl.pallas_call(
            _head_stats_proj_kernel,
            grid=(t2,),
            in_specs=[h2_blk, vec_pl, vec_pl, w3_blk, xs_blk, ws_blk],
            out_specs=[stat_blk] * 4,
            out_shape=[jax.ShapeDtypeStruct((t2, 8, co_p), f32)] * 4,
            compiler_params=_PARALLEL,
        )(h2_2d, sc2, sh2, w3, xs2d, ws)
        sc3, sh3 = _bn_scale_shift(s3, q3, rows2, g3, b3)
        scs, shs = _bn_scale_shift(ss, qs, rows2, gs, bs)
        out2d = pl.pallas_call(
            _head_final_proj_kernel,
            grid=(t2,),
            in_specs=[h2_blk, vec_pl, vec_pl, w3_blk, xs_blk, ws_blk,
                      vec_co, vec_co, vec_co, vec_co],
            out_specs=pl.BlockSpec((tm2, co_p), lambda i: (i, 0)),
            out_shape=jax.ShapeDtypeStruct((rows2, co_p), f32),
            compiler_params=_PARALLEL,
        )(h2_2d, sc2, sh2, w3, xs2d, ws, sc3, sh3, scs, shs)
    else:
        s3, q3 = pl.pallas_call(
            _head_stats_id_kernel,
            grid=(t2,),
            in_specs=[h2_blk, vec_pl, vec_pl, w3_blk],
            out_specs=[stat_blk] * 2,
            out_shape=[jax.ShapeDtypeStruct((t2, 8, co_p), f32)] * 2,
            compiler_params=_PARALLEL,
        )(h2_2d, sc2, sh2, w3)
        sc3, sh3 = _bn_scale_shift(s3, q3, rows2, g3, b3)
        out2d = pl.pallas_call(
            _head_final_id_kernel,
            grid=(t2,),
            in_specs=[h2_blk, vec_pl, vec_pl, w3_blk, xs_blk, vec_co, vec_co],
            out_specs=pl.BlockSpec((tm2, co_p), lambda i: (i, 0)),
            out_shape=jax.ShapeDtypeStruct((rows2, co_p), f32),
            compiler_params=_PARALLEL,
        )(h2_2d, sc2, sh2, w3, xs2d, sc3, sh3)

    out = out2d.reshape(B, Ho, Wo, co_p)[..., :cout]
    return jnp.transpose(out, (0, 3, 1, 2))                       # -> NCHW


# ---------------------------------------------------------------------------
# params
# ---------------------------------------------------------------------------
def init_params(key, in_planes, planes):
    cout = EXPANSION * planes
    k1, k2, k3, k4 = jax.random.split(key, 4)

    def winit(k, shape, fan_in):
        return jax.random.normal(k, shape, jnp.float32) / jnp.sqrt(float(fan_in))

    return {
        "w1": winit(k1, (in_planes, planes), in_planes),          # conv1 (Cin, planes)
        "g1": jnp.ones((1, planes), jnp.float32),
        "b1": jnp.zeros((1, planes), jnp.float32),
        "w2": winit(k2, (3, 3, planes, planes), 9 * planes),      # conv2 HWIO
        "g2": jnp.ones((1, planes), jnp.float32),
        "b2": jnp.zeros((1, planes), jnp.float32),
        "w3": winit(k3, (planes, cout), planes),                  # conv3
        "g3": jnp.ones((1, cout), jnp.float32),
        "b3": jnp.zeros((1, cout), jnp.float32),
        "ws": winit(k4, (in_planes, cout), in_planes),            # projection shortcut
        "gs": jnp.ones((1, cout), jnp.float32),
        "bs": jnp.zeros((1, cout), jnp.float32),
    }


# ---------------------------------------------------------------------------
# pure-JAX reference (mirrors the kernel's bf16-storage / bf16-MXU / train-BN numerics)
# ---------------------------------------------------------------------------
def reference(x_nchw, params, stride=1):
    x = jnp.transpose(x_nchw, (0, 2, 3, 1)).astype(jnp.float32)
    f32, bf16 = jnp.float32, jnp.bfloat16

    def bn_affine(y, g, b):
        flat = y.reshape(-1, y.shape[-1])
        m = flat.mean(0)
        v = jnp.maximum((flat * flat).mean(0) - m * m, 0.0)
        s = g.reshape(-1) * jax.lax.rsqrt(v + EPS)
        t = b.reshape(-1) - m * s
        return s, t

    xb = x.astype(bf16)
    h1 = jnp.einsum("bhwc,cd->bhwd", xb, params["w1"].astype(bf16),
                    preferred_element_type=f32)
    s1, t1 = bn_affine(h1, params["g1"], params["b1"])
    a1 = jnp.maximum(h1.astype(bf16).astype(f32) * s1 + t1, 0.0).astype(bf16)
    h2 = jax.lax.conv_general_dilated(
        a1, params["w2"].astype(bf16), (stride, stride),
        padding=[(1, 1), (1, 1)], dimension_numbers=("NHWC", "HWIO", "NHWC"),
        preferred_element_type=f32)
    s2, t2 = bn_affine(h2, params["g2"], params["b2"])
    a2 = jnp.maximum(h2.astype(bf16).astype(f32) * s2 + t2, 0.0).astype(bf16)
    m3 = jnp.einsum("bhwc,cd->bhwd", a2, params["w3"].astype(bf16),
                    preferred_element_type=f32)
    s3, t3 = bn_affine(m3, params["g3"], params["b3"])
    main = m3 * s3 + t3
    xs = xb[:, ::stride, ::stride, :]
    cout = params["w3"].shape[1]
    if (stride != 1) or (x.shape[-1] != cout):
        ps = jnp.einsum("bhwc,cd->bhwd", xs, params["ws"].astype(bf16),
                        preferred_element_type=f32)
        ss, ts = bn_affine(ps, params["gs"], params["bs"])
        short = ps * ss + ts
    else:
        short = xs.astype(f32)
    out = jnp.maximum(main + short, 0.0)
    return jnp.transpose(out, (0, 3, 1, 2))


if __name__ == "__main__":
    B, Cin, H, W = 2, 4, 16, 16
    planes, stride = 4, 1

    key = jax.random.PRNGKey(0)
    kx, kp = jax.random.split(key)
    x = jax.random.normal(kx, (B, Cin, H, W), jnp.float32)
    params = init_params(kp, Cin, planes)

    fwd = jax.jit(functools.partial(bottleneck_forward, stride=stride, row_tile=256))
    out = jax.block_until_ready(fwd(x, params))
    assert out.shape == (B, EXPANSION * planes, H // stride, W // stride), out.shape

    ref = reference(x, params, stride=stride)
    err = float(jnp.max(jnp.abs(out - ref)))
    assert err < 1e-2, f"max abs err {err}"

    print("KERNEL_OK")
</pallas_src>

<mosaic_0001>
module attributes {stable_mosaic.version = 11 : i64} {
  func.func @_conv1x1_stats_kernel(%arg0: i32, %arg1: memref<256x128xbf16, #tpu.memory_space<vmem>>, %arg2: memref<128x128xbf16, #tpu.memory_space<vmem>>, %arg3: memref<256x128xbf16, #tpu.memory_space<vmem>>, %arg4: memref<1x8x128xf32, #tpu.memory_space<vmem>>, %arg5: memref<1x8x128xf32, #tpu.memory_space<vmem>>) attributes {dimension_semantics = [#tpu.dimension_semantics<parallel>], iteration_bounds = array<i64: 2>, scalar_prefetch = 0 : i64, scratch_operands = 0 : i64, tpu.core_type = #tpu.core_type<tc>, window_params = [{transform_indices = @transform_0, window_bounds = array<i64: 256, 128>}, {pipeline_mode = #tpu.pipeline_mode<synchronous>, transform_indices = @transform_1, window_bounds = array<i64: 128, 128>}, {transform_indices = @transform_2, window_bounds = array<i64: 256, 128>}, {transform_indices = @transform_3, window_bounds = array<i64: 1, 8, 128>}, {transform_indices = @transform_4, window_bounds = array<i64: 1, 8, 128>}]} {
    %c0 = arith.constant 0 : index
    %c0_0 = arith.constant 0 : index
    %0 = vector.load %arg1[%c0, %c0_0] : memref<256x128xbf16, #tpu.memory_space<vmem>>, vector<256x128xbf16>
    %c0_1 = arith.constant 0 : index
    %c0_2 = arith.constant 0 : index
    %1 = vector.load %arg2[%c0_1, %c0_2] : memref<128x128xbf16, #tpu.memory_space<vmem>>, vector<128x128xbf16>
    %cst = arith.constant dense<0.000000e+00> : vector<256x128xf32>
    %2 = tpu.matmul %0, %1, %cst {dimension_numbers = #tpu.dot_dimension_numbers<[1], [0], [0], [1], [0, 0, 1, 1], [], []>} : vector<256x128xbf16>, vector<128x128xbf16>, vector<256x128xf32> -> vector<256x128xf32>
    %3 = arith.truncf %2 : vector<256x128xf32> to vector<256x128xbf16>
    %c0_3 = arith.constant 0 : index
    %c0_4 = arith.constant 0 : index
    %4 = vector.load %arg3[%c0_3, %c0_4] : memref<256x128xbf16, #tpu.memory_space<vmem>>, vector<256x128xbf16>
    tpu.vector_store %arg3[%c0_3, %c0_4], %3 {strides = array<i32>} : memref<256x128xbf16, #tpu.memory_space<vmem>>, vector<256x128xbf16>,
    %cst_5 = arith.constant dense<0.000000e+00> : vector<128xf32>
    %5 = vector.multi_reduction <add>, %2, %cst_5 [0] : vector<256x128xf32> to vector<128xf32>
    %6 = vector.shape_cast %5 : vector<128xf32> to vector<1x128xf32>
    %7 = arith.mulf %2, %2 : vector<256x128xf32>
    %cst_6 = arith.constant dense<0.000000e+00> : vector<128xf32>
    %8 = vector.multi_reduction <add>, %7, %cst_6 [0] : vector<256x128xf32> to vector<128xf32>
    %9 = vector.shape_cast %8 : vector<128xf32> to vector<1x128xf32>
    %10 = vector.shape_cast %6 : vector<1x128xf32> to vector<1x128xf32>
    %11 = vector.broadcast %10 : vector<1x128xf32> to vector<8x128xf32>
    %12 = vector.shape_cast %9 : vector<1x128xf32> to vector<1x128xf32>
    %13 = vector.broadcast %12 : vector<1x128xf32> to vector<8x128xf32>
    %c0_7 = arith.constant 0 : index
    %c0_8 = arith.constant 0 : index
    %c0_9 = arith.constant 0 : index
    %14 = vector.load %arg4[%c0_7, %c0_8, %c0_9] : memref<1x8x128xf32, #tpu.memory_space<vmem>>, vector<1x8x128xf32>
    %15 = vector.shape_cast %14 : vector<1x8x128xf32> to vector<8x128xf32>
    %16 = vector.shape_cast %11 : vector<8x128xf32> to vector<1x8x128xf32>
    tpu.vector_store %arg4[%c0_7, %c0_8, %c0_9], %16 {strides = array<i32>} : memref<1x8x128xf32, #tpu.memory_space<vmem>>, vector<1x8x128xf32>,
    %c0_10 = arith.constant 0 : index
    %c0_11 = arith.constant 0 : index
    %c0_12 = arith.constant 0 : index
    %17 = vector.load %arg5[%c0_10, %c0_11, %c0_12] : memref<1x8x128xf32, #tpu.memory_space<vmem>>, vector<1x8x128xf32>
    %18 = vector.shape_cast %17 : vector<1x8x128xf32> to vector<8x128xf32>
    %19 = vector.shape_cast %13 : vector<8x128xf32> to vector<1x8x128xf32>
    tpu.vector_store %arg5[%c0_10, %c0_11, %c0_12], %19 {strides = array<i32>} : memref<1x8x128xf32, #tpu.memory_space<vmem>>, vector<1x8x128xf32>,
    return
  }
  func.func @transform_0(%arg0: i32) -> (i32, i32) {
    %c0_i32 = arith.constant 0 : i32
    %c0_i32_0 = arith.constant 0 : i32
    return %arg0, %c0_i32 : i32, i32
  }
  func.func @transform_1(%arg0: i32) -> (i32, i32) {
    %c0_i32 = arith.constant 0 : i32
    %c0_i32_0 = arith.constant 0 : i32
    %c0_i32_1 = arith.constant 0 : i32
    return %c0_i32, %c0_i32_0 : i32, i32
  }
  func.func @transform_2(%arg0: i32) -> (i32, i32) {
    %c0_i32 = arith.constant 0 : i32
    %c0_i32_0 = arith.constant 0 : i32
    return %arg0, %c0_i32 : i32, i32
  }
  func.func @transform_3(%arg0: i32) -> (i32, i32, i32) {
    %c0_i32 = arith.constant 0 : i32
    %c0_i32_0 = arith.constant 0 : i32
    %c0_i32_1 = arith.constant 0 : i32
    return %arg0, %c0_i32, %c0_i32_0 : i32, i32, i32
  }
  func.func @transform_4(%arg0: i32) -> (i32, i32, i32) {
    %c0_i32 = arith.constant 0 : i32
    %c0_i32_0 = arith.constant 0 : i32
    %c0_i32_1 = arith.constant 0 : i32
    return %arg0, %c0_i32, %c0_i32_0 : i32, i32, i32
  }
}

module attributes {stable_mosaic.version = 11 : i64} {
  func.func @_head_stats_proj_kernel(%arg0: i32, %arg1: memref<256x128xbf16, #tpu.memory_space<vmem>>, %arg2: memref<1x128xf32, #tpu.memory_space<vmem>>, %arg3: memref<1x128xf32, #tpu.memory_space<vmem>>, %arg4: memref<128x128xbf16, #tpu.memory_space<vmem>>, %arg5: memref<256x128xbf16, #tpu.memory_space<vmem>>, %arg6: memref<128x128xbf16, #tpu.memory_space<vmem>>, %arg7: memref<1x8x128xf32, #tpu.memory_space<vmem>>, %arg8: memref<1x8x128xf32, #tpu.memory_space<vmem>>, %arg9: memref<1x8x128xf32, #tpu.memory_space<vmem>>, %arg10: memref<1x8x128xf32, #tpu.memory_space<vmem>>) attributes {dimension_semantics = [#tpu.dimension_semantics<parallel>], iteration_bounds = array<i64: 2>, scalar_prefetch = 0 : i64, scratch_operands = 0 : i64, tpu.core_type = #tpu.core_type<tc>, window_params = [{transform_indices = @transform_0, window_bounds = array<i64: 256, 128>}, {pipeline_mode = #tpu.pipeline_mode<synchronous>, transform_indices = @transform_1, window_bounds = array<i64: 1, 128>}, {pipeline_mode = #tpu.pipeline_mode<synchronous>, transform_indices = @transform_2, window_bounds = array<i64: 1, 128>}, {pipeline_mode = #tpu.pipeline_mode<synchronous>, transform_indices = @transform_3, window_bounds = array<i64: 128, 128>}, {transform_indices = @transform_4, window_bounds = array<i64: 256, 128>}, {pipeline_mode = #tpu.pipeline_mode<synchronous>, transform_indices = @transform_5, window_bounds = array<i64: 128, 128>}, {transform_indices = @transform_6, window_bounds = array<i64: 1, 8, 128>}, {transform_indices = @transform_7, window_bounds = array<i64: 1, 8, 128>}, {transform_indices = @transform_8, window_bounds = array<i64: 1, 8, 128>}, {transform_indices = @transform_9, window_bounds = array<i64: 1, 8, 128>}]} {
    %c0 = arith.constant 0 : index
    %c0_0 = arith.constant 0 : index
    %0 = vector.load %arg1[%c0, %c0_0] : memref<256x128xbf16, #tpu.memory_space<vmem>>, vector<256x128xbf16>
    %c0_1 = arith.constant 0 : index
    %c0_2 = arith.constant 0 : index
    %1 = vector.load %arg2[%c0_1, %c0_2] : memref<1x128xf32, #tpu.memory_space<vmem>>, vector<1x128xf32>
    %2 = vector.shape_cast %1 : vector<1x128xf32> to vector<128xf32>
    %3 = arith.extf %0 : vector<256x128xbf16> to vector<256x128xf32>
    %4 = vector.shape_cast %2 : vector<128xf32> to vector<1x128xf32>
    %5 = vector.broadcast %4 : vector<1x128xf32> to vector<256x128xf32>
    %6 = arith.mulf %3, %5 : vector<256x128xf32>
    %c0_3 = arith.constant 0 : index
    %c0_4 = arith.constant 0 : index
    %7 = vector.load %arg3[%c0_3, %c0_4] : memref<1x128xf32, #tpu.memory_space<vmem>>, vector<1x128xf32>
    %8 = vector.shape_cast %7 : vector<1x128xf32> to vector<128xf32>
    %9 = vector.shape_cast %8 : vector<128xf32> to vector<1x128xf32>
    %10 = vector.broadcast %9 : vector<1x128xf32> to vector<256x128xf32>
    %11 = arith.addf %6, %10 : vector<256x128xf32>
    %cst = arith.constant 0.000000e+00 : f32
    %12 = vector.broadcast %cst : f32 to vector<256x128xf32>
    %13 = arith.maximumf %11, %12 : vector<256x128xf32>
    %14 = arith.truncf %13 : vector<256x128xf32> to vector<256x128xbf16>
    %c0_5 = arith.constant 0 : index
    %c0_6 = arith.constant 0 : index
    %15 = vector.load %arg4[%c0_5, %c0_6] : memref<128x128xbf16, #tpu.memory_space<vmem>>, vector<128x128xbf16>
    %cst_7 = arith.constant dense<0.000000e+00> : vector<256x128xf32>
    %16 = tpu.matmul %14, %15, %cst_7 {dimension_numbers = #tpu.dot_dimension_numbers<[1], [0], [0], [1], [0, 0, 1, 1], [], []>} : vector<256x128xbf16>, vector<128x128xbf16>, vector<256x128xf32> -> vector<256x128xf32>
    %cst_8 = arith.constant dense<0.000000e+00> : vector<128xf32>
    %17 = vector.multi_reduction <add>, %16, %cst_8 [0] : vector<256x128xf32> to vector<128xf32>
    %18 = vector.shape_cast %17 : vector<128xf32> to vector<1x128xf32>
    %19 = arith.mulf %16, %16 : vector<256x128xf32>
    %cst_9 = arith.constant dense<0.000000e+00> : vector<128xf32>
    %20 = vector.multi_reduction <add>, %19, %cst_9 [0] : vector<256x128xf32> to vector<128xf32>
    %21 = vector.shape_cast %20 : vector<128xf32> to vector<1x128xf32>
    %22 = vector.shape_cast %18 : vector<1x128xf32> to vector<1x128xf32>
    %23 = vector.broadcast %22 : vector<1x128xf32> to vector<8x128xf32>
    %24 = vector.shape_cast %21 : vector<1x128xf32> to vector<1x128xf32>
    %25 = vector.broadcast %24 : vector<1x128xf32> to vector<8x128xf32>
    %c0_10 = arith.constant 0 : index
    %c0_11 = arith.constant 0 : index
    %c0_12 = arith.constant 0 : index
    %26 = vector.load %arg7[%c0_10, %c0_11, %c0_12] : memref<1x8x128xf32, #tpu.memory_space<vmem>>, vector<1x8x128xf32>
    %27 = vector.shape_cast %26 : vector<1x8x128xf32> to vector<8x128xf32>
    %28 = vector.shape_cast %23 : vector<8x128xf32> to vector<1x8x128xf32>
    tpu.vector_store %arg7[%c0_10, %c0_11, %c0_12], %28 {strides = array<i32>} : memref<1x8x128xf32, #tpu.memory_space<vmem>>, vector<1x8x128xf32>,
    %c0_13 = arith.constant 0 : index
    %c0_14 = arith.constant 0 : index
    %c0_15 = arith.constant 0 : index
    %29 = vector.load %arg8[%c0_13, %c0_14, %c0_15] : memref<1x8x128xf32, #tpu.memory_space<vmem>>, vector<1x8x128xf32>
    %30 = vector.shape_cast %29 : vector<1x8x128xf32> to vector<8x128xf32>
    %31 = vector.shape_cast %25 : vector<8x128xf32> to vector<1x8x128xf32>
    tpu.vector_store %arg8[%c0_13, %c0_14, %c0_15], %31 {strides = array<i32>} : memref<1x8x128xf32, #tpu.memory_space<vmem>>, vector<1x8x128xf32>,
    %c0_16 = arith.constant 0 : index
    %c0_17 = arith.constant 0 : index
    %32 = vector.load %arg5[%c0_16, %c0_17] : memref<256x128xbf16, #tpu.memory_space<vmem>>, vector<256x128xbf16>
    %c0_18 = arith.constant 0 : index
    %c0_19 = arith.constant 0 : index
    %33 = vector.load %arg6[%c0_18, %c0_19] : memref<128x128xbf16, #tpu.memory_space<vmem>>, vector<128x128xbf16>
    %cst_20 = arith.constant dense<0.000000e+00> : vector<256x128xf32>
    %34 = tpu.matmul %32, %33, %cst_20 {dimension_numbers = #tpu.dot_dimension_numbers<[1], [0], [0], [1], [0, 0, 1, 1], [], []>} : vector<256x128xbf16>, vector<128x128xbf16>, vector<256x128xf32> -> vector<256x128xf32>
    %cst_21 = arith.constant dense<0.000000e+00> : vector<128xf32>
    %35 = vector.multi_reduction <add>, %34, %cst_21 [0] : vector<256x128xf32> to vector<128xf32>
    %36 = vector.shape_cast %35 : vector<128xf32> to vector<1x128xf32>
    %37 = arith.mulf %34, %34 : vector<256x128xf32>
    %cst_22 = arith.constant dense<0.000000e+00> : vector<128xf32>
    %38 = vector.multi_reduction <add>, %37, %cst_22 [0] : vector<256x128xf32> to vector<128xf32>
    %39 = vector.shape_cast %38 : vector<128xf32> to vector<1x128xf32>
    %40 = vector.shape_cast %36 : vector<1x128xf32> to vector<1x128xf32>
    %41 = vector.broadcast %40 : vector<1x128xf32> to vector<8x128xf32>
    %42 = vector.shape_cast %39 : vector<1x128xf32> to vector<1x128xf32>
    %43 = vector.broadcast %42 : vector<1x128xf32> to vector<8x128xf32>
    %c0_23 = arith.constant 0 : index
    %c0_24 = arith.constant 0 : index
    %c0_25 = arith.constant 0 : index
    %44 = vector.load %arg9[%c0_23, %c0_24, %c0_25] : memref<1x8x128xf32, #tpu.memory_space<vmem>>, vector<1x8x128xf32>
    %45 = vector.shape_cast %44 : vector<1x8x128xf32> to vector<8x128xf32>
    %46 = vector.shape_cast %41 : vector<8x128xf32> to vector<1x8x128xf32>
    tpu.vector_store %arg9[%c0_23, %c0_24, %c0_25], %46 {strides = array<i32>} : memref<1x8x128xf32, #tpu.memory_space<vmem>>, vector<1x8x128xf32>,
    %c0_26 = arith.constant 0 : index
    %c0_27 = arith.constant 0 : index
    %c0_28 = arith.constant 0 : index
    %47 = vector.load %arg10[%c0_26, %c0_27, %c0_28] : memref<1x8x128xf32, #tpu.memory_space<vmem>>, vector<1x8x128xf32>
    %48 = vector.shape_cast %47 : vector<1x8x128xf32> to vector<8x128xf32>
    %49 = vector.shape_cast %43 : vector<8x128xf32> to vector<1x8x128xf32>
    tpu.vector_store %arg10[%c0_26, %c0_27, %c0_28], %49 {strides = array<i32>} : memref<1x8x128xf32, #tpu.memory_space<vmem>>, vector<1x8x128xf32>,
    return
  }
  func.func @transform_0(%arg0: i32) -> (i32, i32) {
    %c0_i32 = arith.constant 0 : i32
    %c0_i32_0 = arith.constant 0 : i32
    return %arg0, %c0_i32 : i32, i32
  }
  func.func @transform_1(%arg0: i32) -> (i32, i32) {
    %c0_i32 = arith.constant 0 : i32
    %c0_i32_0 = arith.constant 0 : i32
    %c0_i32_1 = arith.constant 0 : i32
    return %c0_i32, %c0_i32_0 : i32, i32
  }
  func.func @transform_2(%arg0: i32) -> (i32, i32) {
    %c0_i32 = arith.constant 0 : i32
    %c0_i32_0 = arith.constant 0 : i32
    %c0_i32_1 = arith.constant 0 : i32
    return %c0_i32, %c0_i32_0 : i32, i32
  }
  func.func @transform_3(%arg0: i32) -> (i32, i32) {
    %c0_i32 = arith.constant 0 : i32
    %c0_i32_0 = arith.constant 0 : i32
    %c0_i32_1 = arith.constant 0 : i32
    return %c0_i32, %c0_i32_0 : i32, i32
  }
  func.func @transform_4(%arg0: i32) -> (i32, i32) {
    %c0_i32 = arith.constant 0 : i32
    %c0_i32_0 = arith.constant 0 : i32
    return %arg0, %c0_i32 : i32, i32
  }
  func.func @transform_5(%arg0: i32) -> (i32, i32) {
    %c0_i32 = arith.constant 0 : i32
    %c0_i32_0 = arith.constant 0 : i32
    %c0_i32_1 = arith.constant 0 : i32
    return %c0_i32, %c0_i32_0 : i32, i32
  }
  func.func @transform_6(%arg0: i32) -> (i32, i32, i32) {
    %c0_i32 = arith.constant 0 : i32
    %c0_i32_0 = arith.constant 0 : i32
    %c0_i32_1 = arith.constant 0 : i32
    return %arg0, %c0_i32, %c0_i32_0 : i32, i32, i32
  }
  func.func @transform_7(%arg0: i32) -> (i32, i32, i32) {
    %c0_i32 = arith.constant 0 : i32
    %c0_i32_0 = arith.constant 0 : i32
    %c0_i32_1 = arith.constant 0 : i32
    return %arg0, %c0_i32, %c0_i32_0 : i32, i32, i32
  }
  func.func @transform_8(%arg0: i32) -> (i32, i32, i32) {
    %c0_i32 = arith.constant 0 : i32
    %c0_i32_0 = arith.constant 0 : i32
    %c0_i32_1 = arith.constant 0 : i32
    return %arg0, %c0_i32, %c0_i32_0 : i32, i32, i32
  }
  func.func @transform_9(%arg0: i32) -> (i32, i32, i32) {
    %c0_i32 = arith.constant 0 : i32
    %c0_i32_0 = arith.constant 0 : i32
    %c0_i32_1 = arith.constant 0 : i32
    return %arg0, %c0_i32, %c0_i32_0 : i32, i32, i32
  }
}

module attributes {stable_mosaic.version = 11 : i64} {
  func.func @_conv3x3_stats_kernel(%arg0: i32, %arg1: memref<1x16x16x128xbf16, #tpu.memory_space<vmem>>, %arg2: memref<1x128xf32, #tpu.memory_space<vmem>>, %arg3: memref<1x128xf32, #tpu.memory_space<vmem>>, %arg4: memref<3x384x128xbf16, #tpu.memory_space<vmem>>, %arg5: memref<1x16x16x128xbf16, #tpu.memory_space<vmem>>, %arg6: memref<1x8x128xf32, #tpu.memory_space<vmem>>, %arg7: memref<1x8x128xf32, #tpu.memory_space<vmem>>) attributes {dimension_semantics = [#tpu.dimension_semantics<parallel>], iteration_bounds = array<i64: 2>, scalar_prefetch = 0 : i64, scratch_operands = 0 : i64, tpu.core_type = #tpu.core_type<tc>, window_params = [{transform_indices = @transform_0, window_bounds = array<i64: 1, 16, 16, 128>}, {pipeline_mode = #tpu.pipeline_mode<synchronous>, transform_indices = @transform_1, window_bounds = array<i64: 1, 128>}, {pipeline_mode = #tpu.pipeline_mode<synchronous>, transform_indices = @transform_2, window_bounds = array<i64: 1, 128>}, {pipeline_mode = #tpu.pipeline_mode<synchronous>, transform_indices = @transform_3, window_bounds = array<i64: 3, 384, 128>}, {transform_indices = @transform_4, window_bounds = array<i64: 1, 16, 16, 128>}, {transform_indices = @transform_5, window_bounds = array<i64: 1, 8, 128>}, {transform_indices = @transform_6, window_bounds = array<i64: 1, 8, 128>}]} {
    %c0 = arith.constant 0 : index
    %c0_0 = arith.constant 0 : index
    %c0_1 = arith.constant 0 : index
    %c0_2 = arith.constant 0 : index
    %0 = vector.load %arg1[%c0, %c0_0, %c0_1, %c0_2] : memref<1x16x16x128xbf16, #tpu.memory_space<vmem>>, vector<1x16x16x128xbf16>
    %1 = vector.shape_cast %0 : vector<1x16x16x128xbf16> to vector<16x16x128xbf16>
    %c0_3 = arith.constant 0 : index
    %c0_4 = arith.constant 0 : index
    %2 = vector.load %arg2[%c0_3, %c0_4] : memref<1x128xf32, #tpu.memory_space<vmem>>, vector<1x128xf32>
    %3 = vector.shape_cast %2 : vector<1x128xf32> to vector<128xf32>
    %4 = arith.extf %1 : vector<16x16x128xbf16> to vector<16x16x128xf32>
    %5 = vector.shape_cast %3 : vector<128xf32> to vector<1x1x128xf32>
    %6 = vector.broadcast %5 : vector<1x1x128xf32> to vector<16x16x128xf32>
    %7 = arith.mulf %4, %6 : vector<16x16x128xf32>
    %c0_5 = arith.constant 0 : index
    %c0_6 = arith.constant 0 : index
    %8 = vector.load %arg3[%c0_5, %c0_6] : memref<1x128xf32, #tpu.memory_space<vmem>>, vector<1x128xf32>
    %9 = vector.shape_cast %8 : vector<1x128xf32> to vector<128xf32>
    %10 = vector.shape_cast %9 : vector<128xf32> to vector<1x1x128xf32>
    %11 = vector.broadcast %10 : vector<1x1x128xf32> to vector<16x16x128xf32>
    %12 = arith.addf %7, %11 : vector<16x16x128xf32>
    %cst = arith.constant 0.000000e+00 : f32
    %13 = vector.broadcast %cst : f32 to vector<16x16x128xf32>
    %14 = arith.maximumf %12, %13 : vector<16x16x128xf32>
    %15 = arith.truncf %14 : vector<16x16x128xf32> to vector<16x16x128xbf16>
    %cst_7 = arith.constant 0.000000e+00 : bf16
    %16 = vector.broadcast %cst_7 : bf16 to vector<16x1x128xbf16>
    %cst_8 = arith.constant 0.000000e+00 : bf16
    %17 = vector.broadcast %cst_8 : bf16 to vector<1x18x128xbf16>
    %18 = tpu.concatenate %16, %15, %16 in 1 : vector<16x1x128xbf16>, vector<16x16x128xbf16>, vector<16x1x128xbf16> -> vector<16x18x128xbf16>
    %19 = tpu.concatenate %17, %18, %17 in 0 : vector<1x18x128xbf16>, vector<16x18x128xbf16>, vector<1x18x128xbf16> -> vector<18x18x128xbf16>
    %20 = vector.extract_strided_slice %19 {offsets = [0, 0, 0], sizes = [16, 18, 128], strides = [1, 1, 1]} : vector<18x18x128xbf16> to vector<16x18x128xbf16>
    %21 = vector.extract_strided_slice %20 {offsets = [0, 0, 0], sizes = [16, 16, 128], strides = [1, 1, 1]} : vector<16x18x128xbf16> to vector<16x16x128xbf16>
    %22 = vector.extract_strided_slice %20 {offsets = [0, 1, 0], sizes = [16, 16, 128], strides = [1, 1, 1]} : vector<16x18x128xbf16> to vector<16x16x128xbf16>
    %23 = vector.extract_strided_slice %20 {offsets = [0, 2, 0], sizes = [16, 16, 128], strides = [1, 1, 1]} : vector<16x18x128xbf16> to vector<16x16x128xbf16>
    %24 = tpu.concatenate %21, %22, %23 in 2 : vector<16x16x128xbf16>, vector<16x16x128xbf16>, vector<16x16x128xbf16> -> vector<16x16x384xbf16>
    %25 = vector.shape_cast %24 : vector<16x16x384xbf16> to vector<256x384xbf16>
    %c0_9 = arith.constant 0 : index
    %c0_10 = arith.constant 0 : index
    %c0_11 = arith.constant 0 : index
    %26 = vector.load %arg4[%c0_9, %c0_10, %c0_11] : memref<3x384x128xbf16, #tpu.memory_space<vmem>>, vector<1x384x128xbf16>
    %27 = vector.shape_cast %26 : vector<1x384x128xbf16> to vector<384x128xbf16>
    %cst_12 = arith.constant dense<0.000000e+00> : vector<256x128xf32>
    %28 = tpu.matmul %25, %27, %cst_12 {dimension_numbers = #tpu.dot_dimension_numbers<[1], [0], [0], [1], [0, 0, 1, 1], [], []>} : vector<256x384xbf16>, vector<384x128xbf16>, vector<256x128xf32> -> vector<256x128xf32>
    %29 = vector.extract_strided_slice %19 {offsets = [1, 0, 0], sizes = [16, 18, 128], strides = [1, 1, 1]} : vector<18x18x128xbf16> to vector<16x18x128xbf16>
    %30 = vector.extract_strided_slice %29 {offsets = [0, 0, 0], sizes = [16, 16, 128], strides = [1, 1, 1]} : vector<16x18x128xbf16> to vector<16x16x128xbf16>
    %31 = vector.extract_strided_slice %29 {offsets = [0, 1, 0], sizes = [16, 16, 128], strides = [1, 1, 1]} : vector<16x18x128xbf16> to vector<16x16x128xbf16>
    %32 = vector.extract_strided_slice %29 {offsets = [0, 2, 0], sizes = [16, 16, 128], strides = [1, 1, 1]} : vector<16x18x128xbf16> to vector<16x16x128xbf16>
    %33 = tpu.concatenate %30, %31, %32 in 2 : vector<16x16x128xbf16>, vector<16x16x128xbf16>, vector<16x16x128xbf16> -> vector<16x16x384xbf16>
    %34 = vector.shape_cast %33 : vector<16x16x384xbf16> to vector<256x384xbf16>
    %c1 = arith.constant 1 : index
    %c0_13 = arith.constant 0 : index
    %c0_14 = arith.constant 0 : index
    %35 = vector.load %arg4[%c1, %c0_13, %c0_14] : memref<3x384x128xbf16, #tpu.memory_space<vmem>>, vector<1x384x128xbf16>
    %36 = vector.shape_cast %35 : vector<1x384x128xbf16> to vector<384x128xbf16>
    %cst_15 = arith.constant dense<0.000000e+00> : vector<256x128xf32>
    %37 = tpu.matmul %34, %36, %cst_15 {dimension_numbers = #tpu.dot_dimension_numbers<[1], [0], [0], [1], [0, 0, 1, 1], [], []>} : vector<256x384xbf16>, vector<384x128xbf16>, vector<256x128xf32> -> vector<256x128xf32>
    %38 = arith.addf %28, %37 : vector<256x128xf32>
    %39 = vector.extract_strided_slice %19 {offsets = [2, 0, 0], sizes = [16, 18, 128], strides = [1, 1, 1]} : vector<18x18x128xbf16> to vector<16x18x128xbf16>
    %40 = vector.extract_strided_slice %39 {offsets = [0, 0, 0], sizes = [16, 16, 128], strides = [1, 1, 1]} : vector<16x18x128xbf16> to vector<16x16x128xbf16>
    %41 = vector.extract_strided_slice %39 {offsets = [0, 1, 0], sizes = [16, 16, 128], strides = [1, 1, 1]} : vector<16x18x128xbf16> to vector<16x16x128xbf16>
    %42 = vector.extract_strided_slice %39 {offsets = [0, 2, 0], sizes = [16, 16, 128], strides = [1, 1, 1]} : vector<16x18x128xbf16> to vector<16x16x128xbf16>
    %43 = tpu.concatenate %40, %41, %42 in 2 : vector<16x16x128xbf16>, vector<16x16x128xbf16>, vector<16x16x128xbf16> -> vector<16x16x384xbf16>
    %44 = vector.shape_cast %43 : vector<16x16x384xbf16> to vector<256x384xbf16>
    %c2 = arith.constant 2 : index
    %c0_16 = arith.constant 0 : index
    %c0_17 = arith.constant 0 : index
    %45 = vector.load %arg4[%c2, %c0_16, %c0_17] : memref<3x384x128xbf16, #tpu.memory_space<vmem>>, vector<1x384x128xbf16>
    %46 = vector.shape_cast %45 : vector<1x384x128xbf16> to vector<384x128xbf16>
    %cst_18 = arith.constant dense<0.000000e+00> : vector<256x128xf32>
    %47 = tpu.matmul %44, %46, %cst_18 {dimension_numbers = #tpu.dot_dimension_numbers<[1], [0], [0], [1], [0, 0, 1, 1], [], []>} : vector<256x384xbf16>, vector<384x128xbf16>, vector<256x128xf32> -> vector<256x128xf32>
    %48 = arith.addf %38, %47 : vector<256x128xf32>
    %49 = vector.shape_cast %48 : vector<256x128xf32> to vector<16x16x128xf32>
    %50 = arith.truncf %49 : vector<16x16x128xf32> to vector<16x16x128xbf16>
    %c0_19 = arith.constant 0 : index
    %c0_20 = arith.constant 0 : index
    %c0_21 = arith.constant 0 : index
    %c0_22 = arith.constant 0 : index
    %51 = vector.load %arg5[%c0_19, %c0_20, %c0_21, %c0_22] : memref<1x16x16x128xbf16, #tpu.memory_space<vmem>>, vector<1x16x16x128xbf16>
    %52 = vector.shape_cast %51 : vector<1x16x16x128xbf16> to vector<16x16x128xbf16>
    %53 = vector.shape_cast %50 : vector<16x16x128xbf16> to vector<1x16x16x128xbf16>
    tpu.vector_store %arg5[%c0_19, %c0_20, %c0_21, %c0_22], %53 {strides = array<i32>} : memref<1x16x16x128xbf16, #tpu.memory_space<vmem>>, vector<1x16x16x128xbf16>,
    %cst_23 = arith.constant dense<0.000000e+00> : vector<128xf32>
    %54 = vector.multi_reduction <add>, %48, %cst_23 [0] : vector<256x128xf32> to vector<128xf32>
    %55 = vector.shape_cast %54 : vector<128xf32> to vector<1x128xf32>
    %56 = arith.mulf %48, %48 : vector<256x128xf32>
    %cst_24 = arith.constant dense<0.000000e+00> : vector<128xf32>
    %57 = vector.multi_reduction <add>, %56, %cst_24 [0] : vector<256x128xf32> to vector<128xf32>
    %58 = vector.shape_cast %57 : vector<128xf32> to vector<1x128xf32>
    %59 = vector.shape_cast %55 : vector<1x128xf32> to vector<1x128xf32>
    %60 = vector.broadcast %59 : vector<1x128xf32> to vector<8x128xf32>
    %61 = vector.shape_cast %58 : vector<1x128xf32> to vector<1x128xf32>
    %62 = vector.broadcast %61 : vector<1x128xf32> to vector<8x128xf32>
    %c0_25 = arith.constant 0 : index
    %c0_26 = arith.constant 0 : index
    %c0_27 = arith.constant 0 : index
    %63 = vector.load %arg6[%c0_25, %c0_26, %c0_27] : memref<1x8x128xf32, #tpu.memory_space<vmem>>, vector<1x8x128xf32>
    %64 = vector.shape_cast %63 : vector<1x8x128xf32> to vector<8x128xf32>
    %65 = vector.shape_cast %60 : vector<8x128xf32> to vector<1x8x128xf32>
    tpu.vector_store %arg6[%c0_25, %c0_26, %c0_27], %65 {strides = array<i32>} : memref<1x8x128xf32, #tpu.memory_space<vmem>>, vector<1x8x128xf32>,
    %c0_28 = arith.constant 0 : index
    %c0_29 = arith.constant 0 : index
    %c0_30 = arith.constant 0 : index
    %66 = vector.load %arg7[%c0_28, %c0_29, %c0_30] : memref<1x8x128xf32, #tpu.memory_space<vmem>>, vector<1x8x128xf32>
    %67 = vector.shape_cast %66 : vector<1x8x128xf32> to vector<8x128xf32>
    %68 = vector.shape_cast %62 : vector<8x128xf32> to vector<1x8x128xf32>
    tpu.vector_store %arg7[%c0_28, %c0_29, %c0_30], %68 {strides = array<i32>} : memref<1x8x128xf32, #tpu.memory_space<vmem>>, vector<1x8x128xf32>,
    return
  }
  func.func @transform_0(%arg0: i32) -> (i32, i32, i32, i32) {
    %c0_i32 = arith.constant 0 : i32
    %c0_i32_0 = arith.constant 0 : i32
    %c0_i32_1 = arith.constant 0 : i32
    %c0_i32_2 = arith.constant 0 : i32
    return %arg0, %c0_i32, %c0_i32_0, %c0_i32_1 : i32, i32, i32, i32
  }
  func.func @transform_1(%arg0: i32) -> (i32, i32) {
    %c0_i32 = arith.constant 0 : i32
    %c0_i32_0 = arith.constant 0 : i32
    %c0_i32_1 = arith.constant 0 : i32
    return %c0_i32, %c0_i32_0 : i32, i32
  }
  func.func @transform_2(%arg0: i32) -> (i32, i32) {
    %c0_i32 = arith.constant 0 : i32
    %c0_i32_0 = arith.constant 0 : i32
    %c0_i32_1 = arith.constant 0 : i32
    return %c0_i32, %c0_i32_0 : i32, i32
  }
  func.func @transform_3(%arg0: i32) -> (i32, i32, i32) {
    %c0_i32 = arith.constant 0 : i32
    %c0_i32_0 = arith.constant 0 : i32
    %c0_i32_1 = arith.constant 0 : i32
    %c0_i32_2 = arith.constant 0 : i32
    return %c0_i32, %c0_i32_0, %c0_i32_1 : i32, i32, i32
  }
  func.func @transform_4(%arg0: i32) -> (i32, i32, i32, i32) {
    %c0_i32 = arith.constant 0 : i32
    %c0_i32_0 = arith.constant 0 : i32
    %c0_i32_1 = arith.constant 0 : i32
    %c0_i32_2 = arith.constant 0 : i32
    return %arg0, %c0_i32, %c0_i32_0, %c0_i32_1 : i32, i32, i32, i32
  }
  func.func @transform_5(%arg0: i32) -> (i32, i32, i32) {
    %c0_i32 = arith.constant 0 : i32
    %c0_i32_0 = arith.constant 0 : i32
    %c0_i32_1 = arith.constant 0 : i32
    return %arg0, %c0_i32, %c0_i32_0 : i32, i32, i32
  }
  func.func @transform_6(%arg0: i32) -> (i32, i32, i32) {
    %c0_i32 = arith.constant 0 : i32
    %c0_i32_0 = arith.constant 0 : i32
    %c0_i32_1 = arith.constant 0 : i32
    return %arg0, %c0_i32, %c0_i32_0 : i32, i32, i32
  }
}

module attributes {stable_mosaic.version = 11 : i64} {
  func.func @_head_final_proj_kernel(%arg0: i32, %arg1: memref<256x128xbf16, #tpu.memory_space<vmem>>, %arg2: memref<1x128xf32, #tpu.memory_space<vmem>>, %arg3: memref<1x128xf32, #tpu.memory_space<vmem>>, %arg4: memref<128x128xbf16, #tpu.memory_space<vmem>>, %arg5: memref<256x128xbf16, #tpu.memory_space<vmem>>, %arg6: memref<128x128xbf16, #tpu.memory_space<vmem>>, %arg7: memref<1x128xf32, #tpu.memory_space<vmem>>, %arg8: memref<1x128xf32, #tpu.memory_space<vmem>>, %arg9: memref<1x128xf32, #tpu.memory_space<vmem>>, %arg10: memref<1x128xf32, #tpu.memory_space<vmem>>, %arg11: memref<256x128xf32, #tpu.memory_space<vmem>>) attributes {dimension_semantics = [#tpu.dimension_semantics<parallel>], iteration_bounds = array<i64: 2>, scalar_prefetch = 0 : i64, scratch_operands = 0 : i64, tpu.core_type = #tpu.core_type<tc>, window_params = [{transform_indices = @transform_0, window_bounds = array<i64: 256, 128>}, {pipeline_mode = #tpu.pipeline_mode<synchronous>, transform_indices = @transform_1, window_bounds = array<i64: 1, 128>}, {pipeline_mode = #tpu.pipeline_mode<synchronous>, transform_indices = @transform_2, window_bounds = array<i64: 1, 128>}, {pipeline_mode = #tpu.pipeline_mode<synchronous>, transform_indices = @transform_3, window_bounds = array<i64: 128, 128>}, {transform_indices = @transform_4, window_bounds = array<i64: 256, 128>}, {pipeline_mode = #tpu.pipeline_mode<synchronous>, transform_indices = @transform_5, window_bounds = array<i64: 128, 128>}, {pipeline_mode = #tpu.pipeline_mode<synchronous>, transform_indices = @transform_6, window_bounds = array<i64: 1, 128>}, {pipeline_mode = #tpu.pipeline_mode<synchronous>, transform_indices = @transform_7, window_bounds = array<i64: 1, 128>}, {pipeline_mode = #tpu.pipeline_mode<synchronous>, transform_indices = @transform_8, window_bounds = array<i64: 1, 128>}, {pipeline_mode = #tpu.pipeline_mode<synchronous>, transform_indices = @transform_9, window_bounds = array<i64: 1, 128>}, {transform_indices = @transform_10, window_bounds = array<i64: 256, 128>}]} {
    %c0 = arith.constant 0 : index
    %c0_0 = arith.constant 0 : index
    %0 = vector.load %arg1[%c0, %c0_0] : memref<256x128xbf16, #tpu.memory_space<vmem>>, vector<256x128xbf16>
    %c0_1 = arith.constant 0 : index
    %c0_2 = arith.constant 0 : index
    %1 = vector.load %arg2[%c0_1, %c0_2] : memref<1x128xf32, #tpu.memory_space<vmem>>, vector<1x128xf32>
    %2 = vector.shape_cast %1 : vector<1x128xf32> to vector<128xf32>
    %3 = arith.extf %0 : vector<256x128xbf16> to vector<256x128xf32>
    %4 = vector.shape_cast %2 : vector<128xf32> to vector<1x128xf32>
    %5 = vector.broadcast %4 : vector<1x128xf32> to vector<256x128xf32>
    %6 = arith.mulf %3, %5 : vector<256x128xf32>
    %c0_3 = arith.constant 0 : index
    %c0_4 = arith.constant 0 : index
    %7 = vector.load %arg3[%c0_3, %c0_4] : memref<1x128xf32, #tpu.memory_space<vmem>>, vector<1x128xf32>
    %8 = vector.shape_cast %7 : vector<1x128xf32> to vector<128xf32>
    %9 = vector.shape_cast %8 : vector<128xf32> to vector<1x128xf32>
    %10 = vector.broadcast %9 : vector<1x128xf32> to vector<256x128xf32>
    %11 = arith.addf %6, %10 : vector<256x128xf32>
    %cst = arith.constant 0.000000e+00 : f32
    %12 = vector.broadcast %cst : f32 to vector<256x128xf32>
    %13 = arith.maximumf %11, %12 : vector<256x128xf32>
    %14 = arith.truncf %13 : vector<256x128xf32> to vector<256x128xbf16>
    %c0_5 = arith.constant 0 : index
    %c0_6 = arith.constant 0 : index
    %15 = vector.load %arg4[%c0_5, %c0_6] : memref<128x128xbf16, #tpu.memory_space<vmem>>, vector<128x128xbf16>
    %cst_7 = arith.constant dense<0.000000e+00> : vector<256x128xf32>
    %16 = tpu.matmul %14, %15, %cst_7 {dimension_numbers = #tpu.dot_dimension_numbers<[1], [0], [0], [1], [0, 0, 1, 1], [], []>} : vector<256x128xbf16>, vector<128x128xbf16>, vector<256x128xf32> -> vector<256x128xf32>
    %c0_8 = arith.constant 0 : index
    %c0_9 = arith.constant 0 : index
    %17 = vector.load %arg5[%c0_8, %c0_9] : memref<256x128xbf16, #tpu.memory_space<vmem>>, vector<256x128xbf16>
    %c0_10 = arith.constant 0 : index
    %c0_11 = arith.constant 0 : index
    %18 = vector.load %arg6[%c0_10, %c0_11] : memref<128x128xbf16, #tpu.memory_space<vmem>>, vector<128x128xbf16>
    %cst_12 = arith.constant dense<0.000000e+00> : vector<256x128xf32>
    %19 = tpu.matmul %17, %18, %cst_12 {dimension_numbers = #tpu.dot_dimension_numbers<[1], [0], [0], [1], [0, 0, 1, 1], [], []>} : vector<256x128xbf16>, vector<128x128xbf16>, vector<256x128xf32> -> vector<256x128xf32>
    %c0_13 = arith.constant 0 : index
    %c0_14 = arith.constant 0 : index
    %20 = vector.load %arg7[%c0_13, %c0_14] : memref<1x128xf32, #tpu.memory_space<vmem>>, vector<1x128xf32>
    %21 = vector.shape_cast %20 : vector<1x128xf32> to vector<128xf32>
    %22 = vector.shape_cast %21 : vector<128xf32> to vector<1x128xf32>
    %23 = vector.broadcast %22 : vector<1x128xf32> to vector<256x128xf32>
    %24 = arith.mulf %16, %23 : vector<256x128xf32>
    %c0_15 = arith.constant 0 : index
    %c0_16 = arith.constant 0 : index
    %25 = vector.load %arg8[%c0_15, %c0_16] : memref<1x128xf32, #tpu.memory_space<vmem>>, vector<1x128xf32>
    %26 = vector.shape_cast %25 : vector<1x128xf32> to vector<128xf32>
    %27 = vector.shape_cast %26 : vector<128xf32> to vector<1x128xf32>
    %28 = vector.broadcast %27 : vector<1x128xf32> to vector<256x128xf32>
    %29 = arith.addf %24, %28 : vector<256x128xf32>
    %c0_17 = arith.constant 0 : index
    %c0_18 = arith.constant 0 : index
    %30 = vector.load %arg9[%c0_17, %c0_18] : memref<1x128xf32, #tpu.memory_space<vmem>>, vector<1x128xf32>
    %31 = vector.shape_cast %30 : vector<1x128xf32> to vector<128xf32>
    %32 = vector.shape_cast %31 : vector<128xf32> to vector<1x128xf32>
    %33 = vector.broadcast %32 : vector<1x128xf32> to vector<256x128xf32>
    %34 = arith.mulf %19, %33 : vector<256x128xf32>
    %35 = arith.addf %29, %34 : vector<256x128xf32>
    %c0_19 = arith.constant 0 : index
    %c0_20 = arith.constant 0 : index
    %36 = vector.load %arg10[%c0_19, %c0_20] : memref<1x128xf32, #tpu.memory_space<vmem>>, vector<1x128xf32>
    %37 = vector.shape_cast %36 : vector<1x128xf32> to vector<128xf32>
    %38 = vector.shape_cast %37 : vector<128xf32> to vector<1x128xf32>
    %39 = vector.broadcast %38 : vector<1x128xf32> to vector<256x128xf32>
    %40 = arith.addf %35, %39 : vector<256x128xf32>
    %cst_21 = arith.constant 0.000000e+00 : f32
    %41 = vector.broadcast %cst_21 : f32 to vector<256x128xf32>
    %42 = arith.maximumf %40, %41 : vector<256x128xf32>
    %c0_22 = arith.constant 0 : index
    %c0_23 = arith.constant 0 : index
    %43 = vector.load %arg11[%c0_22, %c0_23] : memref<256x128xf32, #tpu.memory_space<vmem>>, vector<256x128xf32>
    tpu.vector_store %arg11[%c0_22, %c0_23], %42 {strides = array<i32>} : memref<256x128xf32, #tpu.memory_space<vmem>>, vector<256x128xf32>,
    return
  }
  func.func @transform_0(%arg0: i32) -> (i32, i32) {
    %c0_i32 = arith.constant 0 : i32
    %c0_i32_0 = arith.constant 0 : i32
    return %arg0, %c0_i32 : i32, i32
  }
  func.func @transform_1(%arg0: i32) -> (i32, i32) {
    %c0_i32 = arith.constant 0 : i32
    %c0_i32_0 = arith.constant 0 : i32
    %c0_i32_1 = arith.constant 0 : i32
    return %c0_i32, %c0_i32_0 : i32, i32
  }
  func.func @transform_2(%arg0: i32) -> (i32, i32) {
    %c0_i32 = arith.constant 0 : i32
    %c0_i32_0 = arith.constant 0 : i32
    %c0_i32_1 = arith.constant 0 : i32
    return %c0_i32, %c0_i32_0 : i32, i32
  }
  func.func @transform_3(%arg0: i32) -> (i32, i32) {
    %c0_i32 = arith.constant 0 : i32
    %c0_i32_0 = arith.constant 0 : i32
    %c0_i32_1 = arith.constant 0 : i32
    return %c0_i32, %c0_i32_0 : i32, i32
  }
  func.func @transform_4(%arg0: i32) -> (i32, i32) {
    %c0_i32 = arith.constant 0 : i32
    %c0_i32_0 = arith.constant 0 : i32
    return %arg0, %c0_i32 : i32, i32
  }
  func.func @transform_5(%arg0: i32) -> (i32, i32) {
    %c0_i32 = arith.constant 0 : i32
    %c0_i32_0 = arith.constant 0 : i32
    %c0_i32_1 = arith.constant 0 : i32
    return %c0_i32, %c0_i32_0 : i32, i32
  }
  func.func @transform_6(%arg0: i32) -> (i32, i32) {
    %c0_i32 = arith.constant 0 : i32
    %c0_i32_0 = arith.constant 0 : i32
    %c0_i32_1 = arith.constant 0 : i32
    return %c0_i32, %c0_i32_0 : i32, i32
  }
  func.func @transform_7(%arg0: i32) -> (i32, i32) {
    %c0_i32 = arith.constant 0 : i32
    %c0_i32_0 = arith.constant 0 : i32
    %c0_i32_1 = arith.constant 0 : i32
    return %c0_i32, %c0_i32_0 : i32, i32
  }
  func.func @transform_8(%arg0: i32) -> (i32, i32) {
    %c0_i32 = arith.constant 0 : i32
    %c0_i32_0 = arith.constant 0 : i32
    %c0_i32_1 = arith.constant 0 : i32
    return %c0_i32, %c0_i32_0 : i32, i32
  }
  func.func @transform_9(%arg0: i32) -> (i32, i32) {
    %c0_i32 = arith.constant 0 : i32
    %c0_i32_0 = arith.constant 0 : i32
    %c0_i32_1 = arith.constant 0 : i32
    return %c0_i32, %c0_i32_0 : i32, i32
  }
  func.func @transform_10(%arg0: i32) -> (i32, i32) {
    %c0_i32 = arith.constant 0 : i32
    %c0_i32_0 = arith.constant 0 : i32
    return %arg0, %c0_i32 : i32, i32
  }
}

</mosaic_0001>

<bundles_post_ra>
// kernel: bottleneck_forward.4
= control target key start
LH: loop header
LB: loop body
LE: loop exit
PB: predicated region body
PF: predicated region fallthrough
CT: control target
= control target key end

     0   :  { %s1311_s15 = smov 0   ;;  %s1490_s0 = inlined_call_operand.vmem [shape: bf16[512,128], index: 0, kind: input, shape index: {}]   ;;  %s1491_s1 = inlined_call_operand.vmem [shape: bf16[128,128], index: 1, kind: input, shape index: {}]   ;;  %s1492_s2 = inlined_call_operand.vmem [shape: bf16[512,128], index: 2, kind: output, shape index: {0}]   ;;  %s1493_s3 = inlined_call_operand.vmem [shape: f32[2,8,128], index: 3, kind: output, shape index: {1}]   ;;  %s1494_s4 = inlined_call_operand.vmem [shape: f32[2,8,128], index: 4, kind: output, shape index: {2}]  }
   0x1 LB: > { %s1317_s16 = sadd.s32 4294967295, %s1284_s15   ;;  %p966_p0 = scmp.ge.s32.totalorder %s1284_s15, 1  ;;  %s1284_s15 = sphi %s1311_s15, %s15_s15  }
   0x2   : > { %p168_p1 = scmp.lt.s32.totalorder %s1284_s15, 3 }
   0x4   : > { %p169_p2 = pnand %p966_p0, %p168_p1 }
   0x5   : > { %v1254_v0 = vld [vmem:[%s1491_s1] sm:$0xff] (!%p169_p2)   ;;  %s967_s19 = sshll.u32 (!%p169_p2), %s1317_s16, 5  ;;  %v1255_v1 = vld [vmem:[%s1491_s1 + $0x8] sm:$0xff] (!%p169_p2)   ;;  %v1256_v2 = vld [vmem:[%s1491_s1 + $0x10] sm:$0xff] (!%p169_p2)   ;;  %p214_p4 = scmp.lt.s32.totalorder (!%p169_p2), %s1317_s16, 1 }
   0x6   : > { %172 = sbr.rel (%p169_p2) target bundleno = 330 (0x14a), region = 28  ;;  %p203_p3 = scmp.lt.s32.totalorder (!%p169_p2), %s967_s19, 63  ;;  %1182 = vmatprep.subr.bf16.mxu0 (!%p169_p2), %v1254_v0  ;;  %1230 = vmatprep.subr.bf16.mxu1 (!%p169_p2), %v1254_v0  ;;  %v1257_v3 = vld [vmem:[%s1491_s1 + $0x18] sm:$0xff] (!%p169_p2)   ;;  %v1258_v5 = vld [vmem:[%s1491_s1 + $0x20] sm:$0xff] (!%p169_p2)   ;;  %v1259_v6 = vld [vmem:[%s1491_s1 + $0x28] sm:$0xff] (!%p169_p2)  }
   0x7   : > { %1183 = vmatpush3.bf16.msra.mxu0 (!%p169_p2), %v1254_v0  ;;  %1238 = vmatpush3.bf16.msra.mxu1 (!%p169_p2), %v1254_v0  ;;  %v1260_v8 = vld [vmem:[%s1491_s1 + $0x30] sm:$0xff] (!%p169_p2)   ;;  %v1261_v9 = vld [vmem:[%s1491_s1 + $0x38] sm:$0xff] (!%p169_p2)  }
   0x8   : > { %1184 = vmatprep.subr.bf16.mxu0 (!%p169_p2), %v1255_v1  ;;  %1231 = vmatprep.subr.bf16.mxu1 (!%p169_p2), %v1255_v1 }
   0xb   : > { %1185 = vmatpush3.bf16.msra.mxu0 (!%p169_p2), %v1255_v1  ;;  %1239 = vmatpush3.bf16.msra.mxu1 (!%p169_p2), %v1255_v1 }
   0xc   : > { %1186 = vmatprep.subr.bf16.mxu0 (!%p169_p2), %v1256_v2  ;;  %1232 = vmatprep.subr.bf16.mxu1 (!%p169_p2), %v1256_v2 }
   0xd   : > { %s1496_s19 = smov (!%p203_p3, %s967_s19), 63  ;;  %s1498_s16 = smov (!%p214_p4, %s1317_s16), 1 }
   0xe   : > { %s968_s24 = sshll.u32 %s1496_s19, 2  ;;  %s971_s17 = sshll.u32 %s1498_s16, 3 }
   0xf   : > { %s1339_s27 = scalar_lea.vmem %s1490_s0, %s968_s24  ;;  %1187 = vmatpush3.bf16.msra.mxu0 %v1256_v2  ;;  %1240 = vmatpush3.bf16.msra.mxu1 %v1256_v2  ;;  %s1381_s14 = scalar_lea.vmem %s1492_s2, %s968_s24 }
  0x10   : > { %v1262_v4 = vld [vmem:[%s1339_s27] sm:$0xff]   ;;  %1188 = vmatprep.subr.bf16.mxu0 %v1257_v3  ;;  %1233 = vmatprep.subr.bf16.mxu1 %v1257_v3  ;;  %v1263_v10 = vld [vmem:[%s1339_s27 + $0x8] sm:$0xff]   ;;  %v1264_v12 = vld [vmem:[%s1339_s27 + $0x10] sm:$0xff]   ;;  %s217_s20 = scalar_lea.vmem %s1493_s3, %s971_s17  ;;  %s221_s23 = scalar_lea.vmem %s1494_s4, %s971_s17 }
  0x11   : > { %1198 = vmatprep.mubr.bf16.mxu0 %v1262_v4  ;;  %v1270_v7 = vld [vmem:[%s1339_s27 + $0x40] sm:$0xff]   ;;  %v1271_v11 = vld [vmem:[%s1339_s27 + $0x48] sm:$0xff]   ;;  %v1272_v13 = vld [vmem:[%s1339_s27 + $0x50] sm:$0xff]  }
  0x12   : > { %1214 = vmatprep.mubr.bf16.mxu1 %v1270_v7  ;;  %v1265_v14 = vld [vmem:[%s1339_s27 + $0x18] sm:$0xff]   ;;  %v1266_v16 = vld [vmem:[%s1339_s27 + $0x20] sm:$0xff]   ;;  %v1267_v18 = vld [vmem:[%s1339_s27 + $0x28] sm:$0xff]  }
  0x13   : > { %1189 = vmatpush3.bf16.msra.mxu0 %v1257_v3  ;;  %1241 = vmatpush3.bf16.msra.mxu1 %v1257_v3  ;;  %v1273_v15 = vld [vmem:[%s1339_s27 + $0x58] sm:$0xff]   ;;  %v1274_v17 = vld [vmem:[%s1339_s27 + $0x60] sm:$0xff]   ;;  %v1275_v19 = vld [vmem:[%s1339_s27 + $0x68] sm:$0xff]  }
  0x14   : > { %1190 = vmatprep.subr.bf16.mxu0 %v1258_v5  ;;  %1234 = vmatprep.subr.bf16.mxu1 %v1258_v5  ;;  %v1268_v20 = vld [vmem:[%s1339_s27 + $0x30] sm:$0xff]   ;;  %v1269_v22 = vld [vmem:[%s1339_s27 + $0x38] sm:$0xff]  }
  0x15   : > { %v1276_v21 = vld [vmem:[%s1339_s27 + $0x70] sm:$0xff]   ;;  %v1277_v23 = vld [vmem:[%s1339_s27 + $0x78] sm:$0xff]  }
  0x17   : > { %1191 = vmatpush3.bf16.msra.mxu0 %v1258_v5  ;;  %1242 = vmatpush3.bf16.msra.mxu1 %v1258_v5 }
  0x18   : > { %1192 = vmatprep.subr.bf16.mxu0 %v1259_v6  ;;  %1235 = vmatprep.subr.bf16.mxu1 %v1259_v6 }
  0x1b   : > { %1193 = vmatpush3.bf16.msra.mxu0 %v1259_v6  ;;  %1243 = vmatpush3.bf16.msra.mxu1 %v1259_v6 }
  0x1c   : > { %1194 = vmatprep.subr.bf16.mxu0 %v1260_v8  ;;  %1236 = vmatprep.subr.bf16.mxu1 %v1260_v8 }
  0x1f   : > { %1195 = vmatpush3.bf16.msra.mxu0 %v1260_v8  ;;  %1244 = vmatpush3.bf16.msra.mxu1 %v1260_v8 }
  0x20   : > { %1196 = vmatprep.subr.bf16.mxu0 %v1261_v9  ;;  %1237 = vmatprep.subr.bf16.mxu1 %v1261_v9 }
  0x23   : > { %1197 = vmatpush3.bf16.msra.mxu0 %v1261_v9  ;;  %1245 = vmatpush3.bf16.msra.mxu1 %v1261_v9 }
  0x26   : > { %1199 = vmatmul.mubr.bf16.vlgmr.msra.gmra.mrb[0].mxu0 %v1263_v10  ;;  %1215 = vmatmul.mubr.bf16.vlgmr.msra.gmra.mrb[0].mxu1 %v1271_v11 }
  0x27   : > { %1202 = vmatprep.mubr.bf16.mxu0 %v1264_v12  ;;  %1218 = vmatprep.mubr.bf16.mxu1 %v1272_v13 }
  0x2e   : > { %1203 = vmatmul.mubr.bf16.gmra.mrb[4].mxu0 %v1265_v14  ;;  %1219 = vmatmul.mubr.bf16.gmra.mrb[4].mxu1 %v1273_v15 }
  0x2f   : > { %1206 = vmatprep.mubr.bf16.mxu0 %v1266_v16  ;;  %1222 = vmatprep.mubr.bf16.mxu1 %v1274_v17 }
  0x36   : > { %1207 = vmatmul.mubr.bf16.gmra.mrb[8].mxu0 %v1267_v18  ;;  %1223 = vmatmul.mubr.bf16.gmra.mrb[8].mxu1 %v1275_v19 }
  0x37   : > { %1210 = vmatprep.mubr.bf16.mxu0 %v1268_v20  ;;  %1226 = vmatprep.mubr.bf16.mxu1 %v1276_v21 }
  0x3e   : > { %1211 = vmatmul.mubr.bf16.gmra.mrb[12].mxu0 %v1269_v22  ;;  %1227 = vmatmul.mubr.bf16.gmra.mrb[12].mxu1 %v1277_v23 }
  0xf9   : > { %v1200_v24 = vpop.f32.mrb[0].mxu0  ;;  %v1372_v25 = vpop.f32.mrb[0].mxu1 }
  0xfa   : > { %v449_v26 = vpop.f32.mrb[1].mxu0  ;;  %v1374_v27 = vpop.f32.mrb[1].mxu1  ;;  %v775_v39 = vmul.f32 %v1200_v24, %v1200_v24 }
  0xfb   : > { %v1201_v28 = vpop.f32.mrb[2].mxu0  ;;  %v1383_v29 = vpop.f32.mrb[2].mxu1  ;;  %v773_v30 = vmul.f32 %v449_v26, %v449_v26 }
  0xfc   : > { %v1071_v31 = vpack.c.bf16 %v1201_v28, %v1200_v24  ;;  %v452_v32 = vpop.f32.mrb[3].mxu0  ;;  %v1111_v33 = vpack.c.bf16 %v1383_v29, %v1372_v25  ;;  %v1387_v34 = vpop.f32.mrb[3].mxu1  ;;  %v776_v42 = vmul.f32 %v1201_v28, %v1201_v28 }
  0xfd   : > { %v1066_v35 = vpack.c.bf16 %v452_v32, %v449_v26  ;;  %v736_v36 = vadd.f32 %v452_v32, %v449_v26  ;;  %v774_v37 = vmul.f32 %v452_v32, %v452_v32  ;;  %v1106_v38 = vpack.c.bf16 %v1387_v34, %v1374_v27 }
  0xfe   : > { %1143 = vst [vmem:[%s1381_s14 + $0x8] sm:$0xff] %v1071_v31   ;;  %1151 = vst [vmem:[%s1381_s14 + $0x48] sm:$0xff] %v1111_v33  }
  0xff   : > { %1067 = vst [vmem:[%s1381_s14] sm:$0xff] %v1066_v35   ;;  %v737_v40 = vadd.f32 %v1200_v24, %v736_v36  ;;  %v805_v41 = vadd.f32 %v774_v37, %v773_v30  ;;  %1150 = vst [vmem:[%s1381_s14 + $0x40] sm:$0xff] %v1106_v38  }
 0x101   : > { %v806_v43 = vadd.f32 %v805_v41, %v775_v39  ;;  %v1204_v44 = vpop.f32.mrb[4].mxu0  ;;  %v738_v45 = vadd.f32 %v1201_v28, %v737_v40  ;;  %v1395_v46 = vpop.f32.mrb[4].mxu1 }
 0x102   : > { %v465_v47 = vpop.f32.mrb[5].mxu0  ;;  %v1397_v48 = vpop.f32.mrb[5].mxu1  ;;  %v779_v63 = vmul.f32 %v1204_v44, %v1204_v44 }
 0x103   : > { %v739_v49 = vadd.f32 %v738_v45, %v465_v47  ;;  %v777_v50 = vmul.f32 %v465_v47, %v465_v47  ;;  %v807_v51 = vadd.f32 %v806_v43, %v776_v42  ;;  %v1205_v52 = vpop.f32.mrb[6].mxu0  ;;  %v1399_v53 = vpop.f32.mrb[6].mxu1 }
 0x104   : > { %v1081_v54 = vpack.c.bf16 %v1205_v52, %v1204_v44  ;;  %v468_v55 = vpop.f32.mrb[7].mxu0  ;;  %v1121_v56 = vpack.c.bf16 %v1399_v53, %v1395_v46  ;;  %v1403_v57 = vpop.f32.mrb[7].mxu1  ;;  %v780_v2 = vmul.f32 %v1205_v52, %v1205_v52 }
 0x105   : > { %v808_v58 = vadd.f32 %v807_v51, %v777_v50  ;;  %v1076_v59 = vpack.c.bf16 %v468_v55, %v465_v47  ;;  %v740_v60 = vadd.f32 %v739_v49, %v468_v55  ;;  %v778_v61 = vmul.f32 %v468_v55, %v468_v55 }
 0x106   : > { %1145 = vst [vmem:[%s1381_s14 + $0x18] sm:$0xff] %v1081_v54   ;;  %1153 = vst [vmem:[%s1381_s14 + $0x58] sm:$0xff] %v1121_v56   ;;  %v1116_v62 = vpack.c.bf16 %v1403_v57, %v1397_v48 }
 0x107   : > { %1144 = vst [vmem:[%s1381_s14 + $0x10] sm:$0xff] %v1076_v59   ;;  %v741_v0 = vadd.f32 %v1204_v44, %v740_v60  ;;  %v809_v1 = vadd.f32 %v808_v58, %v778_v61  ;;  %v789_v61 = vmul.f32 %v1374_v27, %v1374_v27 }
 0x108   : > { %1152 = vst [vmem:[%s1381_s14 + $0x50] sm:$0xff] %v1116_v62  }
 0x109   : > { %v810_v3 = vadd.f32 %v809_v1, %v779_v63  ;;  %v1208_v4 = vpop.f32.mrb[8].mxu0  ;;  %v742_v5 = vadd.f32 %v1205_v52, %v741_v0  ;;  %v1411_v6 = vpop.f32.mrb[8].mxu1 }
 0x10a   : > { %v481_v7 = vpop.f32.mrb[9].mxu0  ;;  %v1413_v8 = vpop.f32.mrb[9].mxu1  ;;  %v783_v23 = vmul.f32 %v1208_v4, %v1208_v4 }
 0x10b   : > { %v743_v9 = vadd.f32 %v742_v5, %v481_v7  ;;  %v781_v10 = vmul.f32 %v481_v7, %v481_v7  ;;  %v811_v11 = vadd.f32 %v810_v3, %v780_v2  ;;  %v1209_v12 = vpop.f32.mrb[10].mxu0  ;;  %v1415_v13 = vpop.f32.mrb[10].mxu1  ;;  %v790_v2 = vmul.f32 %v1387_v34, %v1387_v34 }
 0x10c   : > { %v1091_v14 = vpack.c.bf16 %v1209_v12, %v1208_v4  ;;  %v484_v15 = vpop.f32.mrb[11].mxu0  ;;  %v1131_v16 = vpack.c.bf16 %v1415_v13, %v1411_v6  ;;  %v1419_v17 = vpop.f32.mrb[11].mxu1  ;;  %v784_v28 = vmul.f32 %v1209_v12, %v1209_v12  ;;  %v791_v3 = vmul.f32 %v1372_v25, %v1372_v25 }
 0x10d   : > { %v812_v18 = vadd.f32 %v811_v11, %v781_v10  ;;  %v1086_v19 = vpack.c.bf16 %v484_v15, %v481_v7  ;;  %v744_v20 = vadd.f32 %v743_v9, %v484_v15  ;;  %v782_v21 = vmul.f32 %v484_v15, %v484_v15 }
 0x10e   : > { %1147 = vst [vmem:[%s1381_s14 + $0x28] sm:$0xff] %v1091_v14   ;;  %1155 = vst [vmem:[%s1381_s14 + $0x68] sm:$0xff] %v1131_v16   ;;  %v1126_v22 = vpack.c.bf16 %v1419_v17, %v1413_v8  ;;  %v792_v7 = vmul.f32 %v1383_v29, %v1383_v29  ;;  %v794_v15 = vmul.f32 %v1403_v57, %v1403_v57 }
 0x10f   : > { %1146 = vst [vmem:[%s1381_s14 + $0x20] sm:$0xff] %v1086_v19   ;;  %v745_v24 = vadd.f32 %v1208_v4, %v744_v20  ;;  %v813_v26 = vadd.f32 %v812_v18, %v782_v21 }
 0x110   : > { %1154 = vst [vmem:[%s1381_s14 + $0x60] sm:$0xff] %v1126_v22  }
 0x111   : > { %v814_v30 = vadd.f32 %v813_v26, %v783_v23  ;;  %v1212_v31 = vpop.f32.mrb[12].mxu0  ;;  %v746_v32 = vadd.f32 %v1209_v12, %v745_v24  ;;  %v1427_v33 = vpop.f32.mrb[12].mxu1  ;;  %v798_v24 = vmul.f32 %v1419_v17, %v1419_v17 }
 0x112   : > { %v497_v35 = vpop.f32.mrb[13].mxu0  ;;  %v561_v36 = vpop.f32.mrb[13].mxu1  ;;  %v787_v54 = vmul.f32 %v1212_v31, %v1212_v31 }
 0x113   : > { %v747_v37 = vadd.f32 %v746_v32, %v497_v35  ;;  %v785_v38 = vmul.f32 %v497_v35, %v497_v35  ;;  %v815_v39 = vadd.f32 %v814_v30, %v784_v28  ;;  %v1213_v40 = vpop.f32.mrb[14].mxu0  ;;  %v1429_v41 = vpop.f32.mrb[14].mxu1 }
 0x114   : > { %v1101_v42 = vpack.c.bf16 %v1213_v40, %v1212_v31  ;;  %v500_v43 = vpop.f32.mrb[15].mxu0  ;;  %v1141_v44 = vpack.c.bf16 %v1429_v41, %v1427_v33  ;;  %v564_v45 = vpop.f32.mrb[15].mxu1  ;;  %v788_v58 = vmul.f32 %v1213_v40, %v1213_v40 }
 0x115   : > { %v816_v47 = vadd.f32 %v815_v39, %v785_v38  ;;  %v1096_v49 = vpack.c.bf16 %v500_v43, %v497_v35  ;;  %v748_v50 = vadd.f32 %v747_v37, %v500_v43  ;;  %v786_v51 = vmul.f32 %v500_v43, %v500_v43 }
 0x116   : > { %1149 = vst [vmem:[%s1381_s14 + $0x38] sm:$0xff] %v1101_v42   ;;  %1157 = vst [vmem:[%s1381_s14 + $0x78] sm:$0xff] %v1141_v44   ;;  %v1136_v52 = vpack.c.bf16 %v564_v45, %v561_v36  ;;  %v803_v39 = vmul.f32 %v1427_v33, %v1427_v33  ;;  %v804_v42 = vmul.f32 %v1429_v41, %v1429_v41 }
 0x117   : > { %1148 = vst [vmem:[%s1381_s14 + $0x30] sm:$0xff] %v1096_v49   ;;  %v749_v55 = vadd.f32 %v1212_v31, %v748_v50  ;;  %v817_v56 = vadd.f32 %v816_v47, %v786_v51  ;;  %v801_v31 = vmul.f32 %v561_v36, %v561_v36 }
 0x118   : > { %1156 = vst [vmem:[%s1381_s14 + $0x70] sm:$0xff] %v1136_v52  }
 0x119   : > { %v818_v59 = vadd.f32 %v817_v56, %v787_v54  ;;  %v750_v60 = vadd.f32 %v1213_v40, %v749_v55 }
 0x11b   : > { %v751_v62 = vadd.f32 %v750_v60, %v1374_v27  ;;  %v819_v63 = vadd.f32 %v818_v59, %v788_v58  ;;  %v793_v27 = vmul.f32 %v1397_v48, %v1397_v48 }
 0x11d   : > { %v820_v0 = vadd.f32 %v819_v63, %v789_v61  ;;  %v752_v1 = vadd.f32 %v751_v62, %v1387_v34 }
 0x11f   : > { %v753_v4 = vadd.f32 %v1372_v25, %v752_v1  ;;  %v821_v5 = vadd.f32 %v820_v0, %v790_v2  ;;  %v795_v25 = vmul.f32 %v1395_v46, %v1395_v46 }
 0x121   : > { %v822_v9 = vadd.f32 %v821_v5, %v791_v3  ;;  %v754_v10 = vadd.f32 %v1383_v29, %v753_v4  ;;  %v796_v29 = vmul.f32 %v1399_v53, %v1399_v53 }
 0x123   : > { %v755_v11 = vadd.f32 %v754_v10, %v1397_v48  ;;  %v823_v12 = vadd.f32 %v822_v9, %v792_v7  ;;  %v797_v48 = vmul.f32 %v1413_v8, %v1413_v8 }
 0x125   : > { %v824_v14 = vadd.f32 %v823_v12, %v793_v27  ;;  %v756_v34 = vadd.f32 %v755_v11, %v1403_v57 }
 0x127   : > { %v757_v16 = vadd.f32 %v1395_v46, %v756_v34  ;;  %v825_v18 = vadd.f32 %v824_v14, %v794_v15  ;;  %v799_v46 = vmul.f32 %v1411_v6, %v1411_v6 }
 0x129   : > { %v826_v19 = vadd.f32 %v825_v18, %v795_v25  ;;  %v758_v20 = vadd.f32 %v1399_v53, %v757_v16  ;;  %v800_v53 = vmul.f32 %v1415_v13, %v1415_v13 }
 0x12b   : > { %v759_v21 = vadd.f32 %v758_v20, %v1413_v8  ;;  %v827_v22 = vadd.f32 %v826_v19, %v796_v29 }
 0x12d   : > { %v828_v23 = vadd.f32 %v827_v22, %v797_v48  ;;  %v760_v57 = vadd.f32 %v759_v21, %v1419_v17  ;;  %v802_v17 = vmul.f32 %v564_v45, %v564_v45 }
 0x12f   : > { %v761_v26 = vadd.f32 %v1411_v6, %v760_v57  ;;  %v829_v28 = vadd.f32 %v828_v23, %v798_v24 }
 0x131   : > { %v830_v30 = vadd.f32 %v829_v28, %v799_v46  ;;  %v762_v8 = vadd.f32 %v1415_v13, %v761_v26 }
 0x133   : > { %v763_v32 = vadd.f32 %v762_v8, %v561_v36  ;;  %v831_v35 = vadd.f32 %v830_v30, %v800_v53 }
 0x135   : > { %v832_v37 = vadd.f32 %v831_v35, %v801_v31  ;;  %v764_v38 = vadd.f32 %v763_v32, %v564_v45 }
 0x137   : > { %v765_v40 = vadd.f32 %v1427_v33, %v764_v38  ;;  %v833_v6 = vadd.f32 %v832_v37, %v802_v17 }
 0x139   : > { %v766_v43 = vadd.f32 %v1429_v41, %v765_v40  ;;  %v834_v13 = vadd.f32 %v833_v6, %v803_v39 }
 0x13b   : > { %v767_v44 = vrot.slane %v766_v43, 4  ;;  %v835_v47 = vadd.f32 %v834_v13, %v804_v42 }
 0x13d   : > { %v768_v36 = vadd.f32 %v767_v44, %v766_v43  ;;  %v836_v49 = vrot.slane %v835_v47, 4 }
 0x13f   : > { %v769_v50 = vrot.slane %v768_v36, 2  ;;  %v837_v45 = vadd.f32 %v836_v49, %v835_v47 }
 0x141   : > { %v770_v51 = vadd.f32 %v769_v50, %v768_v36  ;;  %v838_v52 = vrot.slane %v837_v45, 2 }
 0x143   : > { %v771_v54 = vrot.slane %v770_v51, 1  ;;  %v839_v33 = vadd.f32 %v838_v52, %v837_v45 }
 0x145   : > { %v772_v55 = vadd.f32 %v771_v54, %v770_v51  ;;  %v840_v56 = vrot.slane %v839_v33, 1 }
 0x147   : > { %v841_v41 = vadd.f32 %v840_v56, %v839_v33  ;;  %842 = vst [vmem:[%s217_s20] sm:$0xff] %v772_v55 }
 0x149   : > { %843 = vst [vmem:[%s221_s23] sm:$0xff] %v841_v41 }
 0x14a PF: > { %s15_s15 = sadd.s32 1, %s1284_s15  }
 0x14b   : > { %p12_p5 = scmp.ge.s32.totalorder %s15_s15, 4  }
 0x14d   :  { %14 = sbr.rel (!%p12_p5) target bundleno = 1 (0x1), region = 82 }

// kernel: bottleneck_forward.6
= control target key start
LH: loop header
LB: loop body
LE: loop exit
PB: predicated region body
PF: predicated region fallthrough
CT: control target
= control target key end

     0   :  { %s1899_s30 = smov 0   ;;  %s2091_s0 = inlined_call_operand.vmem [shape: bf16[512,128], index: 0, kind: input, shape index: {}]   ;;  %s2092_s1 = inlined_call_operand.vmem [shape: f32[1,128], index: 1, kind: input, shape index: {}]   ;;  %s2093_s2 = inlined_call_operand.vmem [shape: f32[1,128], index: 2, kind: input, shape index: {}]   ;;  %s2094_s3 = inlined_call_operand.vmem [shape: bf16[128,128], index: 3, kind: input, shape index: {}]   ;;  %s2095_s4 = inlined_call_operand.vmem [shape: bf16[512,128], index: 4, kind: input, shape index: {}]   ;;  %s2096_s5 = inlined_call_operand.vmem [shape: bf16[128,128], index: 5, kind: input, shape index: {}]   ;;  %s2097_s6 = inlined_call_operand.vmem [shape: f32[2,8,128], index: 6, kind: output, shape index: {0}]   ;;  %s2098_s7 = inlined_call_operand.vmem [shape: f32[2,8,128], index: 7, kind: output, shape index: {1}]   ;;  %s2099_s8 = inlined_call_operand.vmem [shape: f32[2,8,128], index: 8, kind: output, shape index: {2}]   ;;  %s2100_s9 = inlined_call_operand.vmem [shape: f32[2,8,128], index: 9, kind: output, shape index: {3}]  }
   0x1 LB: > { %s1905_s10 = sadd.s32 4294967295, %s1847_s30   ;;  %p1533_p0 = scmp.ge.s32.totalorder %s1847_s30, 1  ;;  %s1847_s30 = sphi %s1899_s30, %s20_s30  }
   0x2   : > { %p306_p1 = scmp.lt.s32.totalorder %s1847_s30, 3 }
   0x4   : > { %p307_p2 = pnand %p1533_p0, %p306_p1 }
   0x5   : > { %v1809_v0 = vld [vmem:[%s2094_s3] sm:$0xff] (!%p307_p2)   ;;  %s1534_s13 = sshll.u32 (!%p307_p2), %s1905_s10, 5  ;;  %v1811_v2 = vld [vmem:[%s2094_s3 + $0x8] sm:$0xff] (!%p307_p2)   ;;  %v1813_v4 = vld [vmem:[%s2094_s3 + $0x10] sm:$0xff] (!%p307_p2)   ;;  %p370_p4 = scmp.lt.s32.totalorder (!%p307_p2), %s1905_s10, 1 }
   0x6   : > { %310 = sbr.rel (%p307_p2) target bundleno = 331 (0x14b), region = 44  ;;  %v1810_v1 = vld [vmem:[%s2096_s5] sm:$0xff] (!%p307_p2)   ;;  %1705 = vmatprep.subr.bf16.mxu0 (!%p307_p2), %v1809_v0  ;;  %p359_p3 = scmp.lt.s32.totalorder (!%p307_p2), %s1534_s13, 63  ;;  %v1812_v3 = vld [vmem:[%s2096_s5 + $0x8] sm:$0xff] (!%p307_p2)   ;;  %v1814_v5 = vld [vmem:[%s2096_s5 + $0x10] sm:$0xff] (!%p307_p2)  }
   0x7   : > { %1753 = vmatprep.subr.bf16.mxu1 (!%p307_p2), %v1810_v1  ;;  %1706 = vmatpush3.bf16.msra.mxu0 (!%p307_p2), %v1809_v0  ;;  %v1815_v6 = vld [vmem:[%s2094_s3 + $0x18] sm:$0xff] (!%p307_p2)   ;;  %v1817_v8 = vld [vmem:[%s2094_s3 + $0x20] sm:$0xff] (!%p307_p2)   ;;  %v1819_v10 = vld [vmem:[%s2094_s3 + $0x28] sm:$0xff] (!%p307_p2)  }
   0x8   : > { %1754 = vmatpush3.bf16.msra.mxu1 (!%p307_p2), %v1810_v1  ;;  %1707 = vmatprep.subr.bf16.mxu0 (!%p307_p2), %v1811_v2  ;;  %v1816_v7 = vld [vmem:[%s2096_s5 + $0x18] sm:$0xff] (!%p307_p2)   ;;  %v1818_v9 = vld [vmem:[%s2096_s5 + $0x20] sm:$0xff] (!%p307_p2)   ;;  %v1820_v11 = vld [vmem:[%s2096_s5 + $0x28] sm:$0xff] (!%p307_p2)  }
   0x9   : > { %1755 = vmatprep.subr.bf16.mxu1 (!%p307_p2), %v1812_v3  ;;  %v1960_v13 = vld [vmem:[%s2092_s1] ss:$0 sm:$0xff] (!%p307_p2)  ;;  %v1821_v24 = vld [vmem:[%s2094_s3 + $0x30] sm:$0xff] (!%p307_p2)   ;;  %v1823_v42 = vld [vmem:[%s2094_s3 + $0x38] sm:$0xff] (!%p307_p2)  }
   0xa   : > { %v1965_v14 = vld [vmem:[%s2093_s2] ss:$0 sm:$0xff] (!%p307_p2)  ;;  %v1822_v28 = vld [vmem:[%s2096_s5 + $0x30] sm:$0xff] (!%p307_p2)   ;;  %v1824_v43 = vld [vmem:[%s2096_s5 + $0x38] sm:$0xff] (!%p307_p2)  }
   0xb   : > { %1708 = vmatpush3.bf16.msra.mxu0 (!%p307_p2), %v1811_v2 }
   0xc   : > { %1756 = vmatpush3.bf16.msra.mxu1 (!%p307_p2), %v1812_v3  ;;  %1709 = vmatprep.subr.bf16.mxu0 (!%p307_p2), %v1813_v4 }
   0xd   : > { %s2102_s13 = smov (!%p359_p3, %s1534_s13), 63  ;;  %1757 = vmatprep.subr.bf16.mxu1 %v1814_v5  ;;  %s2104_s10 = smov (!%p370_p4, %s1905_s10), 1 }
   0xe   : > { %s1535_s28 = sshll.u32 %s2102_s13, 2 }
   0xf   : > { %1710 = vmatpush3.bf16.msra.mxu0 %v1813_v4  ;;  %s1943_s17 = scalar_lea.vmem %s2091_s0, %s1535_s28  ;;  %s1951_s21 = scalar_lea.vmem %s2095_s4, %s1535_s28 }
  0x10   : > { %1758 = vmatpush3.bf16.msra.mxu1 %v1814_v5  ;;  %1711 = vmatprep.subr.bf16.mxu0 %v1815_v6  ;;  %v1579_v12 = vld [vmem:[%s1943_s17] sm:$0xff]   ;;  %v1642_v18 = vld [vmem:[%s1943_s17 + $0x8] sm:$0xff]   ;;  %v1643_v23 = vld [vmem:[%s1943_s17 + $0x10] sm:$0xff]  }
  0x11   : > { %1759 = vmatprep.subr.bf16.mxu1 %v1816_v7  ;;  %v1580_v15 = vunpack.c.l.bf16 %v1579_v12  ;;  %v1581_v16 = vunpack.c.h.bf16 %v1579_v12  ;;  %v1825_v17 = vld [vmem:[%s1951_s21] sm:$0xff]   ;;  %v1584_v21 = vunpack.c.l.bf16 %v1642_v18  ;;  %v1585_v22 = vunpack.c.h.bf16 %v1642_v18  ;;  %v1644_v27 = vld [vmem:[%s1943_s17 + $0x18] sm:$0xff]   ;;  %v1646_v55 = vld [vmem:[%s1943_s17 + $0x28] sm:$0xff]  }
  0x12   : > { %1769 = vmatprep.mubr.bf16.mxu1 %v1825_v17  ;;  %v1588_v25 = vunpack.c.l.bf16 %v1643_v23  ;;  %v1589_v26 = vunpack.c.h.bf16 %v1643_v23  ;;  %v1592_v35 = vunpack.c.l.bf16 %v1644_v27  ;;  %v1593_v36 = vunpack.c.h.bf16 %v1644_v27  ;;  %v1645_v37 = vld [vmem:[%s1943_s17 + $0x20] sm:$0xff]   ;;  %v1647_v58 = vld [vmem:[%s1943_s17 + $0x30] sm:$0xff]   ;;  %v1826_v1 = vld [vmem:[%s1951_s21 + $0x8] sm:$0xff]  }
  0x13   : > { %1712 = vmatpush3.bf16.msra.mxu0 %v1815_v6  ;;  %v458_v19 = vmul.f32 %v1580_v15, %v1960_v13  ;;  %v459_v20 = vmul.f32 %v1581_v16, %v1960_v13  ;;  %v460_v31 = vmul.f32 %v1584_v21, %v1960_v13  ;;  %v461_v32 = vmul.f32 %v1585_v22, %v1960_v13  ;;  %v1827_v6 = vld [vmem:[%s1951_s21 + $0x10] sm:$0xff]   ;;  %v1649_v18 = vld [vmem:[%s1943_s17 + $0x40] sm:$0xff]  }
  0x14   : > { %1760 = vmatpush3.bf16.msra.mxu1 %v1816_v7  ;;  %1713 = vmatprep.subr.bf16.mxu0 %v1817_v8  ;;  %v462_v33 = vmul.f32 %v1588_v25, %v1960_v13  ;;  %v463_v34 = vmul.f32 %v1589_v26, %v1960_v13  ;;  %v1596_v46 = vunpack.c.l.bf16 %v1645_v37  ;;  %v464_v50 = vmul.f32 %v1592_v35, %v1960_v13  ;;  %v1828_v25 = vld [vmem:[%s1951_s21 + $0x18] sm:$0xff]  }
  0x15   : > { %1761 = vmatprep.subr.bf16.mxu1 %v1818_v9  ;;  %v497_v29 = vadd.f32 %v1965_v14, %v458_v19  ;;  %v498_v30 = vadd.f32 %v1965_v14, %v459_v20  ;;  %v499_v40 = vadd.f32 %v1965_v14, %v460_v31  ;;  %v500_v41 = vadd.f32 %v1965_v14, %v461_v32 }
  0x16   : > { %v501_v44 = vadd.f32 %v1965_v14, %v462_v33  ;;  %v502_v45 = vadd.f32 %v1965_v14, %v463_v34  ;;  %v465_v53 = vmul.f32 %v1593_v36, %v1960_v13  ;;  %v1597_v54 = vunpack.c.h.bf16 %v1645_v37 }
  0x17   : > { %1714 = vmatpush3.bf16.msra.mxu0 %v1817_v8  ;;  %v529_v38 = vmax.f32 %v497_v29, 0.0  ;;  %v530_v39 = vmax.f32 %v498_v30, 0.0  ;;  %v531_v48 = vmax.f32 %v499_v40, 0.0  ;;  %v532_v49 = vmax.f32 %v500_v41, 0.0  ;;  %v1829_v30 = vld [vmem:[%s1951_s21 + $0x20] sm:$0xff]   ;;  %v1651_v40 = vld [vmem:[%s1943_s17 + $0x50] sm:$0xff]  }
  0x18   : > { %1762 = vmatpush3.bf16.msra.mxu1 %v1818_v9  ;;  %1715 = vmatprep.subr.bf16.mxu0 %v1819_v10  ;;  %v533_v51 = vmax.f32 %v501_v44, 0.0  ;;  %v534_v52 = vmax.f32 %v502_v45, 0.0  ;;  %v466_v56 = vmul.f32 %v1596_v46, %v1960_v13  ;;  %v467_v57 = vmul.f32 %v1597_v54, %v1960_v13 }
  0x19   : > { %1763 = vmatprep.subr.bf16.mxu1 %v1820_v11  ;;  %v561_v47 = vpack.c.bf16 %v530_v39, %v529_v38  ;;  %v1600_v59 = vunpack.c.l.bf16 %v1646_v55  ;;  %v1601_v60 = vunpack.c.h.bf16 %v1646_v55  ;;  %v562_v61 = vpack.c.bf16 %v532_v49, %v531_v48  ;;  %v1650_v39 = vld [vmem:[%s1943_s17 + $0x48] sm:$0xff]  }
  0x1a   : > { %v563_v62 = vpack.c.bf16 %v534_v52, %v533_v51  ;;  %v503_v63 = vadd.f32 %v1965_v14, %v464_v50  ;;  %v504_v0 = vadd.f32 %v1965_v14, %v465_v53  ;;  %v505_v2 = vadd.f32 %v1965_v14, %v466_v56  ;;  %v1831_v52 = vld [vmem:[%s1951_s21 + $0x30] sm:$0xff]  }
  0x1b   : > { %1716 = vmatpush3.bf16.msra.mxu0 %v1819_v10  ;;  %1721 = vmatprep.mubr.bf16.mxu0 %v561_v47  ;;  %v506_v3 = vadd.f32 %v1965_v14, %v467_v57  ;;  %v1604_v4 = vunpack.c.l.bf16 %v1647_v58  ;;  %v1605_v5 = vunpack.c.h.bf16 %v1647_v58  ;;  %v468_v7 = vmul.f32 %v1600_v59, %v1960_v13  ;;  %v1830_v47 = vld [vmem:[%s1951_s21 + $0x28] sm:$0xff]   ;;  %v1652_v57 = vld [vmem:[%s1943_s17 + $0x58] sm:$0xff]  }
  0x1c   : > { %1764 = vmatpush3.bf16.msra.mxu1 %v1820_v11  ;;  %1717 = vmatprep.subr.bf16.mxu0 %v1821_v24  ;;  %v469_v8 = vmul.f32 %v1601_v60, %v1960_v13  ;;  %v535_v9 = vmax.f32 %v503_v63, 0.0  ;;  %v536_v10 = vmax.f32 %v504_v0, 0.0  ;;  %v1648_v11 = vld [vmem:[%s1943_s17 + $0x38] sm:$0xff]   ;;  %v537_v12 = vmax.f32 %v505_v2, 0.0 }
  0x1d   : > { %1765 = vmatprep.subr.bf16.mxu1 %v1822_v28  ;;  %v538_v15 = vmax.f32 %v506_v3, 0.0  ;;  %v470_v16 = vmul.f32 %v1604_v4, %v1960_v13  ;;  %v471_v17 = vmul.f32 %v1605_v5, %v1960_v13  ;;  %v507_v19 = vadd.f32 %v1965_v14, %v468_v7  ;;  %v1832_v5 = vld [vmem:[%s1951_s21 + $0x38] sm:$0xff]  }
  0x1e   : > { %v508_v20 = vadd.f32 %v1965_v14, %v469_v8  ;;  %v1608_v21 = vunpack.c.l.bf16 %v1648_v11  ;;  %v564_v22 = vpack.c.bf16 %v536_v10, %v535_v9  ;;  %v1609_v23 = vunpack.c.h.bf16 %v1648_v11  ;;  %v1833_v10 = vld [vmem:[%s1951_s21 + $0x40] sm:$0xff]  }
  0x1f   : > { %1718 = vmatpush3.bf16.msra.mxu0 %v1821_v24  ;;  %v1612_v24 = vunpack.c.l.bf16 %v1649_v18  ;;  %v565_v26 = vpack.c.bf16 %v538_v15, %v537_v12  ;;  %v509_v27 = vadd.f32 %v1965_v14, %v470_v16  ;;  %v1613_v29 = vunpack.c.h.bf16 %v1649_v18 }
  0x20   : > { %1766 = vmatpush3.bf16.msra.mxu1 %v1822_v28  ;;  %1719 = vmatprep.subr.bf16.mxu0 %v1823_v42  ;;  %v510_v28 = vadd.f32 %v1965_v14, %v471_v17  ;;  %v539_v31 = vmax.f32 %v507_v19, 0.0  ;;  %v540_v32 = vmax.f32 %v508_v20, 0.0  ;;  %v472_v33 = vmul.f32 %v1608_v21, %v1960_v13  ;;  %v1654_v21 = vld [vmem:[%s1943_s17 + $0x68] sm:$0xff]  }
  0x21   : > { %1767 = vmatprep.subr.bf16.mxu1 %v1824_v43  ;;  %v473_v34 = vmul.f32 %v1609_v23, %v1960_v13  ;;  %v474_v35 = vmul.f32 %v1612_v24, %v1960_v13  ;;  %v541_v36 = vmax.f32 %v509_v27, 0.0  ;;  %v475_v38 = vmul.f32 %v1613_v29, %v1960_v13  ;;  %v1834_v29 = vld [vmem:[%s1951_s21 + $0x48] sm:$0xff]  }
  0x22   : > { %v542_v37 = vmax.f32 %v510_v28, 0.0  ;;  %v566_v41 = vpack.c.bf16 %v540_v32, %v539_v31  ;;  %v1616_v45 = vunpack.c.l.bf16 %v1650_v39  ;;  %v1617_v46 = vunpack.c.h.bf16 %v1650_v39 }
  0x23   : > { %1720 = vmatpush3.bf16.msra.mxu0 %v1823_v42  ;;  %v511_v42 = vadd.f32 %v1965_v14, %v472_v33  ;;  %v513_v44 = vadd.f32 %v1965_v14, %v474_v35  ;;  %v514_v49 = vadd.f32 %v1965_v14, %v475_v38  ;;  %v1620_v50 = vunpack.c.l.bf16 %v1651_v40 }
  0x24   : > { %1768 = vmatpush3.bf16.msra.mxu1 %v1824_v43  ;;  %v512_v43 = vadd.f32 %v1965_v14, %v473_v34  ;;  %v567_v48 = vpack.c.bf16 %v542_v37, %v541_v36  ;;  %v1621_v51 = vunpack.c.h.bf16 %v1651_v40  ;;  %v476_v55 = vmul.f32 %v1616_v45, %v1960_v13  ;;  %v1835_v34 = vld [vmem:[%s1951_s21 + $0x50] sm:$0xff]  }
  0x25   : > { %v543_v53 = vmax.f32 %v511_v42, 0.0  ;;  %v477_v56 = vmul.f32 %v1617_v46, %v1960_v13  ;;  %v545_v58 = vmax.f32 %v513_v44, 0.0  ;;  %v546_v59 = vmax.f32 %v514_v49, 0.0  ;;  %v1836_v49 = vld [vmem:[%s1951_s21 + $0x58] sm:$0xff]  }
  0x26   : > { %1722 = vmatmul.mubr.bf16.vlgmr.msra.gmra.mrb[0].mxu0 %v562_v61  ;;  %v544_v54 = vmax.f32 %v512_v43, 0.0  ;;  %v478_v60 = vmul.f32 %v1620_v50, %v1960_v13  ;;  %v479_v61 = vmul.f32 %v1621_v51, %v1960_v13  ;;  %v1624_v63 = vunpack.c.l.bf16 %v1652_v57  ;;  %v1656_v43 = vld [vmem:[%s1943_s17 + $0x78] sm:$0xff]  }
  0x27   : > { %1770 = vmatmul.mubr.bf16.vlgmr.msra.gmra.mrb[0].mxu1 %v1826_v1  ;;  %1725 = vmatprep.mubr.bf16.mxu0 %v563_v62  ;;  %v1653_v62 = vld [vmem:[%s1943_s17 + $0x60] sm:$0xff]   ;;  %v1625_v0 = vunpack.c.h.bf16 %v1652_v57  ;;  %v515_v2 = vadd.f32 %v1965_v14, %v476_v55  ;;  %v516_v3 = vadd.f32 %v1965_v14, %v477_v56  ;;  %v1632_v27 = vunpack.c.l.bf16 %v1654_v21 }
  0x28   : > { %1773 = vmatprep.mubr.bf16.mxu1 %v1827_v6  ;;  %v568_v1 = vpack.c.bf16 %v544_v54, %v543_v53  ;;  %v1628_v4 = vunpack.c.l.bf16 %v1653_v62  ;;  %v569_v6 = vpack.c.bf16 %v546_v59, %v545_v58  ;;  %v517_v7 = vadd.f32 %v1965_v14, %v478_v60  ;;  %v1837_v53 = vld [vmem:[%s1951_s21 + $0x60] sm:$0xff]  }
  0x29   : > { %v518_v8 = vadd.f32 %v1965_v14, %v479_v61  ;;  %v1629_v9 = vunpack.c.h.bf16 %v1653_v62  ;;  %v480_v11 = vmul.f32 %v1624_v63, %v1960_v13  ;;  %v481_v12 = vmul.f32 %v1625_v0, %v1960_v13  ;;  %v1838_v63 = vld [vmem:[%s1951_s21 + $0x68] sm:$0xff]  }
  0x2a   : > { %v547_v15 = vmax.f32 %v515_v2, 0.0  ;;  %v548_v16 = vmax.f32 %v516_v3, 0.0  ;;  %v482_v17 = vmul.f32 %v1628_v4, %v1960_v13  ;;  %v549_v18 = vmax.f32 %v517_v7, 0.0  ;;  %v1840_v4 = vld [vmem:[%s1951_s21 + $0x78] sm:$0xff]  }
  0x2b   : > { %v550_v19 = vmax.f32 %v518_v8, 0.0  ;;  %v483_v20 = vmul.f32 %v1629_v9, %v1960_v13  ;;  %v519_v23 = vadd.f32 %v1965_v14, %v480_v11  ;;  %v520_v24 = vadd.f32 %v1965_v14, %v481_v12 }
  0x2c   : > { %v1633_v28 = vunpack.c.h.bf16 %v1654_v21  ;;  %v484_v37 = vmul.f32 %v1632_v27, %v1960_v13 }
  0x2d   : > { %v522_v31 = vadd.f32 %v1965_v14, %v483_v20  ;;  %v551_v35 = vmax.f32 %v519_v23, 0.0  ;;  %v552_v36 = vmax.f32 %v520_v24, 0.0 }
  0x2e   : > { %1726 = vmatmul.mubr.bf16.gmra.mrb[4].mxu0 %v564_v22  ;;  %v1655_v22 = vld [vmem:[%s1943_s17 + $0x70] sm:$0xff]   ;;  %v485_v38 = vmul.f32 %v1633_v28, %v1960_v13  ;;  %v523_v45 = vadd.f32 %v1965_v14, %v484_v37  ;;  %s1538_s17 = sshll.u32 %s2104_s10, 3 }
  0x2f   : > { %1774 = vmatmul.mubr.bf16.gmra.mrb[4].mxu1 %v1828_v25  ;;  %1729 = vmatprep.mubr.bf16.mxu0 %v565_v26  ;;  %v570_v25 = vpack.c.bf16 %v548_v16, %v547_v15  ;;  %v521_v26 = vadd.f32 %v1965_v14, %v482_v17  ;;  %v1636_v32 = vunpack.c.l.bf16 %v1655_v22  ;;  %v1637_v33 = vunpack.c.h.bf16 %v1655_v22  ;;  %s373_s20 = scalar_lea.vmem %s2097_s6, %s1538_s17  ;;  %s381_s23 = scalar_lea.vmem %s2099_s8, %s1538_s17 }
  0x30   : > { %1777 = vmatprep.mubr.bf16.mxu1 %v1829_v30  ;;  %v571_v30 = vpack.c.bf16 %v550_v19, %v549_v18  ;;  %v554_v40 = vmax.f32 %v522_v31, 0.0  ;;  %v572_v44 = vpack.c.bf16 %v552_v36, %v551_v35  ;;  %v524_v46 = vadd.f32 %v1965_v14, %v485_v38  ;;  %s377_s25 = scalar_lea.vmem %s2098_s7, %s1538_s17  ;;  %s385_s28 = scalar_lea.vmem %s2100_s9, %s1538_s17 }
  0x31   : > { %v553_v39 = vmax.f32 %v521_v26, 0.0  ;;  %v487_v42 = vmul.f32 %v1637_v33, %v1960_v13  ;;  %v555_v54 = vmax.f32 %v523_v45, 0.0 }
  0x32   : > { %v556_v55 = vmax.f32 %v524_v46, 0.0 }
  0x33   : > { %v573_v50 = vpack.c.bf16 %v554_v40, %v553_v39 }
  0x34   : > { %v574_v60 = vpack.c.bf16 %v556_v55, %v555_v54 }
  0x36   : > { %1730 = vmatmul.mubr.bf16.gmra.mrb[8].mxu0 %v566_v41  ;;  %v486_v41 = vmul.f32 %v1636_v32, %v1960_v13 }
  0x37   : > { %1778 = vmatmul.mubr.bf16.gmra.mrb[8].mxu1 %v1830_v47  ;;  %1733 = vmatprep.mubr.bf16.mxu0 %v567_v48  ;;  %v1640_v47 = vunpack.c.l.bf16 %v1656_v43  ;;  %v1641_v48 = vunpack.c.h.bf16 %v1656_v43 }
  0x38   : > { %1781 = vmatprep.mubr.bf16.mxu1 %v1831_v52  ;;  %v525_v51 = vadd.f32 %v1965_v14, %v486_v41  ;;  %v526_v52 = vadd.f32 %v1965_v14, %v487_v42 }
  0x39   : > { %v488_v56 = vmul.f32 %v1640_v47, %v1960_v13  ;;  %v489_v57 = vmul.f32 %v1641_v48, %v1960_v13 }
  0x3a   : > { %v557_v58 = vmax.f32 %v525_v51, 0.0  ;;  %v558_v59 = vmax.f32 %v526_v52, 0.0 }
  0x3b   : > { %v527_v61 = vadd.f32 %v1965_v14, %v488_v56  ;;  %v528_v62 = vadd.f32 %v1965_v14, %v489_v57 }
  0x3c   : > { %v575_v0 = vpack.c.bf16 %v558_v59, %v557_v58 }
  0x3d   : > { %v559_v2 = vmax.f32 %v527_v61, 0.0  ;;  %v560_v3 = vmax.f32 %v528_v62, 0.0 }
  0x3e   : > { %1734 = vmatmul.mubr.bf16.gmra.mrb[12].mxu0 %v568_v1  ;;  %v1839_v1 = vld [vmem:[%s1951_s21 + $0x70] sm:$0xff]  }
  0x3f   : > { %1782 = vmatmul.mubr.bf16.gmra.mrb[12].mxu1 %v1832_v5  ;;  %1737 = vmatprep.mubr.bf16.mxu0 %v569_v6  ;;  %v576_v13 = vpack.c.bf16 %v560_v3, %v559_v2 }
  0x40   : > { %1785 = vmatprep.mubr.bf16.mxu1 %v1833_v10 }
  0x46   : > { %1738 = vmatmul.mubr.bf16.gmra.mrb[16].mxu0 %v570_v25 }
  0x47   : > { %1786 = vmatmul.mubr.bf16.gmra.mrb[16].mxu1 %v1834_v29  ;;  %1741 = vmatprep.mubr.bf16.mxu0 %v571_v30 }
  0x48   : > { %1789 = vmatprep.mubr.bf16.mxu1 %v1835_v34 }
  0x4e   : > { %1742 = vmatmul.mubr.bf16.gmra.mrb[20].mxu0 %v572_v44 }
  0x4f   : > { %1790 = vmatmul.mubr.bf16.gmra.mrb[20].mxu1 %v1836_v49  ;;  %1745 = vmatprep.mubr.bf16.mxu0 %v573_v50 }
  0x50   : > { %1793 = vmatprep.mubr.bf16.mxu1 %v1837_v53 }
  0x56   : > { %1746 = vmatmul.mubr.bf16.gmra.mrb[24].mxu0 %v574_v60 }
  0x57   : > { %1794 = vmatmul.mubr.bf16.gmra.mrb[24].mxu1 %v1838_v63  ;;  %1749 = vmatprep.mubr.bf16.mxu0 %v575_v0 }
  0x58   : > { %1797 = vmatprep.mubr.bf16.mxu1 %v1839_v1 }
  0x5e   : > { %1750 = vmatmul.mubr.bf16.gmra.mrb[28].mxu0 %v576_v13 }
  0x5f   : > { %1798 = vmatmul.mubr.bf16.gmra.mrb[28].mxu1 %v1840_v4 }
  0xf9   : > { %v1723_v5 = vpop.f32.mrb[0].mxu0 }
  0xfa   : > { %v1771_v6 = vpop.f32.mrb[0].mxu1  ;;  %v675_v7 = vpop.f32.mrb[1].mxu0  ;;  %v841_v20 = vmul.f32 %v1723_v5, %v1723_v5 }
  0xfb   : > { %v1136_v8 = vpop.f32.mrb[1].mxu1  ;;  %v1724_v9 = vpop.f32.mrb[2].mxu0  ;;  %v839_v11 = vmul.f32 %v675_v7, %v675_v7  ;;  %v1302_v23 = vmul.f32 %v1771_v6, %v1771_v6 }
  0xfc   : > { %v1772_v10 = vpop.f32.mrb[2].mxu1  ;;  %v678_v14 = vpop.f32.mrb[3].mxu0  ;;  %v1300_v17 = vmul.f32 %v1136_v8, %v1136_v8  ;;  %v842_v26 = vmul.f32 %v1724_v9, %v1724_v9 }
  0xfd   : > { %v802_v12 = vadd.f32 %v678_v14, %v675_v7  ;;  %v840_v15 = vmul.f32 %v678_v14, %v678_v14  ;;  %v1139_v16 = vpop.f32.mrb[3].mxu1  ;;  %v1303_v30 = vmul.f32 %v1772_v10, %v1772_v10 }
  0xfe   : > { %v1263_v18 = vadd.f32 %v1139_v16, %v1136_v8  ;;  %v1301_v19 = vmul.f32 %v1139_v16, %v1139_v16 }
  0xff   : > { %v803_v21 = vadd.f32 %v1723_v5, %v802_v12  ;;  %v871_v22 = vadd.f32 %v840_v15, %v839_v11 }
 0x100   : > { %v1264_v24 = vadd.f32 %v1771_v6, %v1263_v18  ;;  %v1332_v25 = vadd.f32 %v1301_v19, %v1300_v17 }
 0x101   : > { %v872_v27 = vadd.f32 %v871_v22, %v841_v20  ;;  %v1727_v28 = vpop.f32.mrb[4].mxu0  ;;  %v804_v29 = vadd.f32 %v1724_v9, %v803_v21 }
 0x102   : > { %v1333_v31 = vadd.f32 %v1332_v25, %v1302_v23  ;;  %v1775_v32 = vpop.f32.mrb[4].mxu1  ;;  %v691_v33 = vpop.f32.mrb[5].mxu0  ;;  %v1265_v34 = vadd.f32 %v1772_v10, %v1264_v24  ;;  %v845_v52 = vmul.f32 %v1727_v28, %v1727_v28 }
 0x103   : > { %v805_v35 = vadd.f32 %v804_v29, %v691_v33  ;;  %v843_v36 = vmul.f32 %v691_v33, %v691_v33  ;;  %v873_v37 = vadd.f32 %v872_v27, %v842_v26  ;;  %v1152_v38 = vpop.f32.mrb[5].mxu1  ;;  %v1728_v39 = vpop.f32.mrb[6].mxu0  ;;  %v1306_v55 = vmul.f32 %v1775_v32, %v1775_v32 }
 0x104   : > { %v1266_v40 = vadd.f32 %v1265_v34, %v1152_v38  ;;  %v1304_v41 = vmul.f32 %v1152_v38, %v1152_v38  ;;  %v1334_v42 = vadd.f32 %v1333_v31, %v1303_v30  ;;  %v1776_v43 = vpop.f32.mrb[6].mxu1  ;;  %v694_v44 = vpop.f32.mrb[7].mxu0  ;;  %v846_v58 = vmul.f32 %v1728_v39, %v1728_v39 }
 0x105   : > { %v874_v45 = vadd.f32 %v873_v37, %v843_v36  ;;  %v806_v46 = vadd.f32 %v805_v35, %v694_v44  ;;  %v844_v47 = vmul.f32 %v694_v44, %v694_v44  ;;  %v1155_v48 = vpop.f32.mrb[7].mxu1  ;;  %v1307_v62 = vmul.f32 %v1776_v43, %v1776_v43 }
 0x106   : > { %v1335_v49 = vadd.f32 %v1334_v42, %v1304_v41  ;;  %v1267_v50 = vadd.f32 %v1266_v40, %v1155_v48  ;;  %v1305_v51 = vmul.f32 %v1155_v48, %v1155_v48 }
 0x107   : > { %v807_v53 = vadd.f32 %v1727_v28, %v806_v46  ;;  %v875_v54 = vadd.f32 %v874_v45, %v844_v47 }
 0x108   : > { %v1268_v56 = vadd.f32 %v1775_v32, %v1267_v50  ;;  %v1336_v57 = vadd.f32 %v1335_v49, %v1305_v51 }
 0x109   : > { %v876_v59 = vadd.f32 %v875_v54, %v845_v52  ;;  %v1731_v60 = vpop.f32.mrb[8].mxu0  ;;  %v808_v61 = vadd.f32 %v1728_v39, %v807_v53 }
 0x10a   : > { %v1337_v63 = vadd.f32 %v1336_v57, %v1306_v55  ;;  %v1779_v0 = vpop.f32.mrb[8].mxu1  ;;  %v707_v1 = vpop.f32.mrb[9].mxu0  ;;  %v1269_v2 = vadd.f32 %v1776_v43, %v1268_v56  ;;  %v849_v20 = vmul.f32 %v1731_v60, %v1731_v60 }
 0x10b   : > { %v809_v3 = vadd.f32 %v808_v61, %v707_v1  ;;  %v847_v13 = vmul.f32 %v707_v1, %v707_v1  ;;  %v877_v4 = vadd.f32 %v876_v59, %v846_v58  ;;  %v1168_v5 = vpop.f32.mrb[9].mxu1  ;;  %v1732_v6 = vpop.f32.mrb[10].mxu0  ;;  %v1310_v23 = vmul.f32 %v1779_v0, %v1779_v0 }
 0x10c   : > { %v1270_v7 = vadd.f32 %v1269_v2, %v1168_v5  ;;  %v1308_v8 = vmul.f32 %v1168_v5, %v1168_v5  ;;  %v1338_v9 = vadd.f32 %v1337_v63, %v1307_v62  ;;  %v1780_v10 = vpop.f32.mrb[10].mxu1  ;;  %v710_v14 = vpop.f32.mrb[11].mxu0  ;;  %v850_v26 = vmul.f32 %v1732_v6, %v1732_v6 }
 0x10d   : > { %v878_v11 = vadd.f32 %v877_v4, %v847_v13  ;;  %v810_v12 = vadd.f32 %v809_v3, %v710_v14  ;;  %v848_v15 = vmul.f32 %v710_v14, %v710_v14  ;;  %v1171_v16 = vpop.f32.mrb[11].mxu1  ;;  %v1311_v30 = vmul.f32 %v1780_v10, %v1780_v10 }
 0x10e   : > { %v1339_v17 = vadd.f32 %v1338_v9, %v1308_v8  ;;  %v1271_v18 = vadd.f32 %v1270_v7, %v1171_v16  ;;  %v1309_v19 = vmul.f32 %v1171_v16, %v1171_v16 }
 0x10f   : > { %v811_v21 = vadd.f32 %v1731_v60, %v810_v12  ;;  %v879_v22 = vadd.f32 %v878_v11, %v848_v15 }
 0x110   : > { %v1272_v24 = vadd.f32 %v1779_v0, %v1271_v18  ;;  %v1340_v25 = vadd.f32 %v1339_v17, %v1309_v19 }
 0x111   : > { %v880_v27 = vadd.f32 %v879_v22, %v849_v20  ;;  %v1735_v28 = vpop.f32.mrb[12].mxu0  ;;  %v812_v29 = vadd.f32 %v1732_v6, %v811_v21 }
 0x112   : > { %v1341_v31 = vadd.f32 %v1340_v25, %v1310_v23  ;;  %v1783_v32 = vpop.f32.mrb[12].mxu1  ;;  %v723_v33 = vpop.f32.mrb[13].mxu0  ;;  %v1273_v34 = vadd.f32 %v1780_v10, %v1272_v24  ;;  %v853_v52 = vmul.f32 %v1735_v28, %v1735_v28 }
 0x113   : > { %v813_v35 = vadd.f32 %v812_v29, %v723_v33  ;;  %v851_v36 = vmul.f32 %v723_v33, %v723_v33  ;;  %v881_v37 = vadd.f32 %v880_v27, %v850_v26  ;;  %v1184_v38 = vpop.f32.mrb[13].mxu1  ;;  %v1736_v39 = vpop.f32.mrb[14].mxu0  ;;  %v1314_v55 = vmul.f32 %v1783_v32, %v1783_v32 }
 0x114   : > { %v1274_v40 = vadd.f32 %v1273_v34, %v1184_v38  ;;  %v1312_v41 = vmul.f32 %v1184_v38, %v1184_v38  ;;  %v1342_v42 = vadd.f32 %v1341_v31, %v1311_v30  ;;  %v1784_v43 = vpop.f32.mrb[14].mxu1  ;;  %v726_v44 = vpop.f32.mrb[15].mxu0  ;;  %v854_v58 = vmul.f32 %v1736_v39, %v1736_v39 }
 0x115   : > { %v882_v45 = vadd.f32 %v881_v37, %v851_v36  ;;  %v814_v46 = vadd.f32 %v813_v35, %v726_v44  ;;  %v852_v47 = vmul.f32 %v726_v44, %v726_v44  ;;  %v1187_v48 = vpop.f32.mrb[15].mxu1  ;;  %v1315_v62 = vmul.f32 %v1784_v43, %v1784_v43 }
 0x116   : > { %v1343_v49 = vadd.f32 %v1342_v42, %v1312_v41  ;;  %v1275_v50 = vadd.f32 %v1274_v40, %v1187_v48  ;;  %v1313_v51 = vmul.f32 %v1187_v48, %v1187_v48 }
 0x117   : > { %v815_v53 = vadd.f32 %v1735_v28, %v814_v46  ;;  %v883_v54 = vadd.f32 %v882_v45, %v852_v47 }
 0x118   : > { %v1276_v56 = vadd.f32 %v1783_v32, %v1275_v50  ;;  %v1344_v57 = vadd.f32 %v1343_v49, %v1313_v51 }
 0x119   : > { %v884_v59 = vadd.f32 %v883_v54, %v853_v52  ;;  %v1739_v60 = vpop.f32.mrb[16].mxu0  ;;  %v816_v61 = vadd.f32 %v1736_v39, %v815_v53 }
 0x11a   : > { %v1345_v63 = vadd.f32 %v1344_v57, %v1314_v55  ;;  %v1787_v0 = vpop.f32.mrb[16].mxu1  ;;  %v739_v1 = vpop.f32.mrb[17].mxu0  ;;  %v1277_v2 = vadd.f32 %v1784_v43, %v1276_v56  ;;  %v857_v20 = vmul.f32 %v1739_v60, %v1739_v60 }
 0x11b   : > { %v817_v3 = vadd.f32 %v816_v61, %v739_v1  ;;  %v855_v13 = vmul.f32 %v739_v1, %v739_v1  ;;  %v885_v4 = vadd.f32 %v884_v59, %v854_v58  ;;  %v1200_v5 = vpop.f32.mrb[17].mxu1  ;;  %v1740_v6 = vpop.f32.mrb[18].mxu0  ;;  %v1318_v23 = vmul.f32 %v1787_v0, %v1787_v0 }
 0x11c   : > { %v1278_v7 = vadd.f32 %v1277_v2, %v1200_v5  ;;  %v1316_v8 = vmul.f32 %v1200_v5, %v1200_v5  ;;  %v1346_v9 = vadd.f32 %v1345_v63, %v1315_v62  ;;  %v1788_v10 = vpop.f32.mrb[18].mxu1  ;;  %v742_v14 = vpop.f32.mrb[19].mxu0  ;;  %v858_v26 = vmul.f32 %v1740_v6, %v1740_v6 }
 0x11d   : > { %v886_v11 = vadd.f32 %v885_v4, %v855_v13  ;;  %v818_v12 = vadd.f32 %v817_v3, %v742_v14  ;;  %v856_v15 = vmul.f32 %v742_v14, %v742_v14  ;;  %v1203_v16 = vpop.f32.mrb[19].mxu1  ;;  %v1319_v30 = vmul.f32 %v1788_v10, %v1788_v10 }
 0x11e   : > { %v1347_v17 = vadd.f32 %v1346_v9, %v1316_v8  ;;  %v1279_v18 = vadd.f32 %v1278_v7, %v1203_v16  ;;  %v1317_v19 = vmul.f32 %v1203_v16, %v1203_v16 }
 0x11f   : > { %v819_v21 = vadd.f32 %v1739_v60, %v818_v12  ;;  %v887_v22 = vadd.f32 %v886_v11, %v856_v15 }
 0x120   : > { %v1280_v24 = vadd.f32 %v1787_v0, %v1279_v18  ;;  %v1348_v25 = vadd.f32 %v1347_v17, %v1317_v19 }
 0x121   : > { %v888_v27 = vadd.f32 %v887_v22, %v857_v20  ;;  %v1743_v28 = vpop.f32.mrb[20].mxu0  ;;  %v820_v29 = vadd.f32 %v1740_v6, %v819_v21 }
 0x122   : > { %v1349_v31 = vadd.f32 %v1348_v25, %v1318_v23  ;;  %v1791_v32 = vpop.f32.mrb[20].mxu1  ;;  %v755_v33 = vpop.f32.mrb[21].mxu0  ;;  %v1281_v34 = vadd.f32 %v1788_v10, %v1280_v24  ;;  %v861_v52 = vmul.f32 %v1743_v28, %v1743_v28 }
 0x123   : > { %v821_v35 = vadd.f32 %v820_v29, %v755_v33  ;;  %v859_v36 = vmul.f32 %v755_v33, %v755_v33  ;;  %v889_v37 = vadd.f32 %v888_v27, %v858_v26  ;;  %v1216_v38 = vpop.f32.mrb[21].mxu1  ;;  %v1744_v39 = vpop.f32.mrb[22].mxu0  ;;  %v1322_v55 = vmul.f32 %v1791_v32, %v1791_v32 }
 0x124   : > { %v1282_v40 = vadd.f32 %v1281_v34, %v1216_v38  ;;  %v1320_v41 = vmul.f32 %v1216_v38, %v1216_v38  ;;  %v1350_v42 = vadd.f32 %v1349_v31, %v1319_v30  ;;  %v1792_v43 = vpop.f32.mrb[22].mxu1  ;;  %v758_v44 = vpop.f32.mrb[23].mxu0  ;;  %v862_v58 = vmul.f32 %v1744_v39, %v1744_v39 }
 0x125   : > { %v890_v45 = vadd.f32 %v889_v37, %v859_v36  ;;  %v822_v46 = vadd.f32 %v821_v35, %v758_v44  ;;  %v860_v47 = vmul.f32 %v758_v44, %v758_v44  ;;  %v1219_v48 = vpop.f32.mrb[23].mxu1  ;;  %v1323_v62 = vmul.f32 %v1792_v43, %v1792_v43 }
 0x126   : > { %v1351_v49 = vadd.f32 %v1350_v42, %v1320_v41  ;;  %v1283_v50 = vadd.f32 %v1282_v40, %v1219_v48  ;;  %v1321_v51 = vmul.f32 %v1219_v48, %v1219_v48 }
 0x127   : > { %v823_v53 = vadd.f32 %v1743_v28, %v822_v46  ;;  %v891_v54 = vadd.f32 %v890_v45, %v860_v47 }
 0x128   : > { %v1284_v56 = vadd.f32 %v1791_v32, %v1283_v50  ;;  %v1352_v57 = vadd.f32 %v1351_v49, %v1321_v51 }
 0x129   : > { %v892_v59 = vadd.f32 %v891_v54, %v861_v52  ;;  %v1747_v60 = vpop.f32.mrb[24].mxu0  ;;  %v824_v61 = vadd.f32 %v1744_v39, %v823_v53 }
 0x12a   : > { %v1353_v63 = vadd.f32 %v1352_v57, %v1322_v55  ;;  %v1795_v0 = vpop.f32.mrb[24].mxu1  ;;  %v771_v1 = vpop.f32.mrb[25].mxu0  ;;  %v1285_v2 = vadd.f32 %v1792_v43, %v1284_v56  ;;  %v865_v20 = vmul.f32 %v1747_v60, %v1747_v60 }
 0x12b   : > { %v825_v3 = vadd.f32 %v824_v61, %v771_v1  ;;  %v863_v13 = vmul.f32 %v771_v1, %v771_v1  ;;  %v893_v4 = vadd.f32 %v892_v59, %v862_v58  ;;  %v1232_v5 = vpop.f32.mrb[25].mxu1  ;;  %v1748_v6 = vpop.f32.mrb[26].mxu0  ;;  %v1326_v23 = vmul.f32 %v1795_v0, %v1795_v0 }
 0x12c   : > { %v1286_v7 = vadd.f32 %v1285_v2, %v1232_v5  ;;  %v1324_v8 = vmul.f32 %v1232_v5, %v1232_v5  ;;  %v1354_v9 = vadd.f32 %v1353_v63, %v1323_v62  ;;  %v1796_v10 = vpop.f32.mrb[26].mxu1  ;;  %v774_v14 = vpop.f32.mrb[27].mxu0  ;;  %v866_v26 = vmul.f32 %v1748_v6, %v1748_v6 }
 0x12d   : > { %v894_v11 = vadd.f32 %v893_v4, %v863_v13  ;;  %v826_v12 = vadd.f32 %v825_v3, %v774_v14  ;;  %v864_v15 = vmul.f32 %v774_v14, %v774_v14  ;;  %v1235_v16 = vpop.f32.mrb[27].mxu1  ;;  %v1327_v30 = vmul.f32 %v1796_v10, %v1796_v10 }
 0x12e   : > { %v1355_v17 = vadd.f32 %v1354_v9, %v1324_v8  ;;  %v1287_v18 = vadd.f32 %v1286_v7, %v1235_v16  ;;  %v1325_v19 = vmul.f32 %v1235_v16, %v1235_v16 }
 0x12f   : > { %v827_v21 = vadd.f32 %v1747_v60, %v826_v12  ;;  %v895_v22 = vadd.f32 %v894_v11, %v864_v15 }
 0x130   : > { %v1288_v24 = vadd.f32 %v1795_v0, %v1287_v18  ;;  %v1356_v25 = vadd.f32 %v1355_v17, %v1325_v19 }
 0x131   : > { %v896_v27 = vadd.f32 %v895_v22, %v865_v20  ;;  %v1751_v28 = vpop.f32.mrb[28].mxu0  ;;  %v828_v29 = vadd.f32 %v1748_v6, %v827_v21 }
 0x132   : > { %v1357_v31 = vadd.f32 %v1356_v25, %v1326_v23  ;;  %v1799_v32 = vpop.f32.mrb[28].mxu1  ;;  %v787_v33 = vpop.f32.mrb[29].mxu0  ;;  %v1289_v34 = vadd.f32 %v1796_v10, %v1288_v24  ;;  %v869_v52 = vmul.f32 %v1751_v28, %v1751_v28 }
 0x133   : > { %v829_v35 = vadd.f32 %v828_v29, %v787_v33  ;;  %v867_v36 = vmul.f32 %v787_v33, %v787_v33  ;;  %v897_v37 = vadd.f32 %v896_v27, %v866_v26  ;;  %v1248_v38 = vpop.f32.mrb[29].mxu1  ;;  %v1752_v39 = vpop.f32.mrb[30].mxu0  ;;  %v1330_v55 = vmul.f32 %v1799_v32, %v1799_v32 }
 0x134   : > { %v1290_v40 = vadd.f32 %v1289_v34, %v1248_v38  ;;  %v1328_v41 = vmul.f32 %v1248_v38, %v1248_v38  ;;  %v1358_v42 = vadd.f32 %v1357_v31, %v1327_v30  ;;  %v1800_v43 = vpop.f32.mrb[30].mxu1  ;;  %v790_v44 = vpop.f32.mrb[31].mxu0  ;;  %v870_v58 = vmul.f32 %v1752_v39, %v1752_v39 }
 0x135   : > { %v898_v45 = vadd.f32 %v897_v37, %v867_v36  ;;  %v830_v46 = vadd.f32 %v829_v35, %v790_v44  ;;  %v868_v47 = vmul.f32 %v790_v44, %v790_v44  ;;  %v1251_v48 = vpop.f32.mrb[31].mxu1  ;;  %v1331_v61 = vmul.f32 %v1800_v43, %v1800_v43 }
 0x136   : > { %v1359_v49 = vadd.f32 %v1358_v42, %v1328_v41  ;;  %v1291_v50 = vadd.f32 %v1290_v40, %v1251_v48  ;;  %v1329_v51 = vmul.f32 %v1251_v48, %v1251_v48 }
 0x137   : > { %v831_v53 = vadd.f32 %v1751_v28, %v830_v46  ;;  %v899_v54 = vadd.f32 %v898_v45, %v868_v47 }
 0x138   : > { %v1292_v56 = vadd.f32 %v1799_v32, %v1291_v50  ;;  %v1360_v57 = vadd.f32 %v1359_v49, %v1329_v51 }
 0x139   : > { %v832_v59 = vadd.f32 %v1752_v39, %v831_v53  ;;  %v900_v60 = vadd.f32 %v899_v54, %v869_v52 }
 0x13a   : > { %v1293_v62 = vadd.f32 %v1800_v43, %v1292_v56  ;;  %v1361_v63 = vadd.f32 %v1360_v57, %v1330_v55 }
 0x13b   : > { %v833_v0 = vrot.slane %v832_v59, 4  ;;  %v901_v1 = vadd.f32 %v900_v60, %v870_v58 }
 0x13c   : > { %v1294_v2 = vrot.slane %v1293_v62, 4  ;;  %v1362_v3 = vadd.f32 %v1361_v63, %v1331_v61 }
 0x13d   : > { %v834_v13 = vadd.f32 %v833_v0, %v832_v59  ;;  %v902_v4 = vrot.slane %v901_v1, 4 }
 0x13e   : > { %v1295_v5 = vadd.f32 %v1294_v2, %v1293_v62  ;;  %v1363_v6 = vrot.slane %v1362_v3, 4 }
 0x13f   : > { %v835_v7 = vrot.slane %v834_v13, 2  ;;  %v903_v8 = vadd.f32 %v902_v4, %v901_v1 }
 0x140   : > { %v1296_v9 = vrot.slane %v1295_v5, 2  ;;  %v1364_v10 = vadd.f32 %v1363_v6, %v1362_v3 }
 0x141   : > { %v836_v14 = vadd.f32 %v835_v7, %v834_v13  ;;  %v904_v11 = vrot.slane %v903_v8, 2 }
 0x142   : > { %v1297_v12 = vadd.f32 %v1296_v9, %v1295_v5  ;;  %v1365_v15 = vrot.slane %v1364_v10, 2 }
 0x143   : > { %v837_v16 = vrot.slane %v836_v14, 1  ;;  %v905_v17 = vadd.f32 %v904_v11, %v903_v8 }
 0x144   : > { %v1298_v18 = vrot.slane %v1297_v12, 1  ;;  %v1366_v19 = vadd.f32 %v1365_v15, %v1364_v10 }
 0x145   : > { %v838_v20 = vadd.f32 %v837_v16, %v836_v14  ;;  %v906_v21 = vrot.slane %v905_v17, 1 }
 0x146   : > { %v1299_v22 = vadd.f32 %v1298_v18, %v1297_v12  ;;  %v1367_v23 = vrot.slane %v1366_v19, 1 }
 0x147   : > { %v907_v24 = vadd.f32 %v906_v21, %v905_v17  ;;  %908 = vst [vmem:[%s373_s20] sm:$0xff] %v838_v20 }
 0x148   : > { %v1368_v25 = vadd.f32 %v1367_v23, %v1366_v19  ;;  %1369 = vst [vmem:[%s381_s23] sm:$0xff] %v1299_v22 }
 0x149   : > { %909 = vst [vmem:[%s377_s25] sm:$0xff] %v907_v24 }
 0x14a   : > { %1370 = vst [vmem:[%s385_s28] sm:$0xff] %v1368_v25 }
 0x14b PF: > { %s20_s30 = sadd.s32 1, %s1847_s30  }
 0x14c   : > { %p17_p5 = scmp.ge.s32.totalorder %s20_s30, 4  }
 0x14e   :  { %19 = sbr.rel (!%p17_p5) target bundleno = 1 (0x1), region = 113 }

// kernel: bottleneck_forward.7
= control target key start
LH: loop header
LB: loop body
LE: loop exit
PB: predicated region body
PF: predicated region fallthrough
CT: control target
= control target key end

     0   :  { %s1851_s13 = smov 0   ;;  %s2215_s0 = inlined_call_operand.vmem [shape: bf16[512,128], index: 0, kind: input, shape index: {}]   ;;  %s2216_s1 = inlined_call_operand.vmem [shape: f32[1,128], index: 1, kind: input, shape index: {}]   ;;  %s2217_s2 = inlined_call_operand.vmem [shape: f32[1,128], index: 2, kind: input, shape index: {}]   ;;  %s2218_s3 = inlined_call_operand.vmem [shape: bf16[128,128], index: 3, kind: input, shape index: {}]   ;;  %s2219_s4 = inlined_call_operand.vmem [shape: bf16[512,128], index: 4, kind: input, shape index: {}]   ;;  %s2220_s5 = inlined_call_operand.vmem [shape: bf16[128,128], index: 5, kind: input, shape index: {}]   ;;  %s2221_s6 = inlined_call_operand.vmem [shape: f32[1,128], index: 6, kind: input, shape index: {}]   ;;  %s2222_s7 = inlined_call_operand.vmem [shape: f32[1,128], index: 7, kind: input, shape index: {}]   ;;  %s2223_s8 = inlined_call_operand.vmem [shape: f32[1,128], index: 8, kind: input, shape index: {}]   ;;  %s2224_s9 = inlined_call_operand.vmem [shape: f32[1,128], index: 9, kind: input, shape index: {}]   ;;  %s2225_s10 = inlined_call_operand.vmem [shape: f32[512,128], index: 10, kind: output, shape index: {}]  }
   0x1 LB: > { %s1474_s14 = sadd.s32 4294967295, %s1794_s13   ;;  %p1478_p0 = scmp.ge.s32.totalorder %s1794_s13, 1  ;;  %s1794_s13 = sphi %s1851_s13, %s20_s13  }
   0x2   : > { %p324_p1 = scmp.lt.s32.totalorder %s1794_s13, 3 }
   0x4   : > { %p325_p2 = pnand %p1478_p0, %p324_p1 }
   0x5   : > { %v1756_v0 = vld [vmem:[%s2218_s3] sm:$0xff] (!%p325_p2)   ;;  %s1479_s17 = sshll.u32 (!%p325_p2), %s1474_s14, 5  ;;  %v1758_v2 = vld [vmem:[%s2218_s3 + $0x8] sm:$0xff] (!%p325_p2)   ;;  %v1760_v4 = vld [vmem:[%s2218_s3 + $0x10] sm:$0xff] (!%p325_p2)  }
   0x6   : > { %328 = sbr.rel (%p325_p2) target bundleno = 320 (0x140), region = 60  ;;  %v1757_v1 = vld [vmem:[%s2220_s5] sm:$0xff] (!%p325_p2)   ;;  %1652 = vmatprep.subr.bf16.mxu0 (!%p325_p2), %v1756_v0  ;;  %p368_p3 = scmp.lt.s32.totalorder (!%p325_p2), %s1479_s17, 63  ;;  %v1759_v3 = vld [vmem:[%s2220_s5 + $0x8] sm:$0xff] (!%p325_p2)   ;;  %v1761_v5 = vld [vmem:[%s2220_s5 + $0x10] sm:$0xff] (!%p325_p2)  }
   0x7   : > { %1700 = vmatprep.subr.bf16.mxu1 (!%p325_p2), %v1757_v1  ;;  %1653 = vmatpush3.bf16.msra.mxu0 (!%p325_p2), %v1756_v0  ;;  %v1762_v6 = vld [vmem:[%s2218_s3 + $0x18] sm:$0xff] (!%p325_p2)   ;;  %v1764_v8 = vld [vmem:[%s2218_s3 + $0x20] sm:$0xff] (!%p325_p2)   ;;  %v1766_v10 = vld [vmem:[%s2218_s3 + $0x28] sm:$0xff] (!%p325_p2)  }
   0x8   : > { %1701 = vmatpush3.bf16.msra.mxu1 (!%p325_p2), %v1757_v1  ;;  %1654 = vmatprep.subr.bf16.mxu0 (!%p325_p2), %v1758_v2  ;;  %v1763_v7 = vld [vmem:[%s2220_s5 + $0x18] sm:$0xff] (!%p325_p2)   ;;  %v1765_v9 = vld [vmem:[%s2220_s5 + $0x20] sm:$0xff] (!%p325_p2)   ;;  %v1767_v11 = vld [vmem:[%s2220_s5 + $0x28] sm:$0xff] (!%p325_p2)  }
   0x9   : > { %1702 = vmatprep.subr.bf16.mxu1 (!%p325_p2), %v1759_v3  ;;  %v1912_v13 = vld [vmem:[%s2216_s1] ss:$0 sm:$0xff] (!%p325_p2)  ;;  %v1768_v24 = vld [vmem:[%s2218_s3 + $0x30] sm:$0xff] (!%p325_p2)   ;;  %v1770_v42 = vld [vmem:[%s2218_s3 + $0x38] sm:$0xff] (!%p325_p2)  }
   0xa   : > { %v1917_v14 = vld [vmem:[%s2217_s2] ss:$0 sm:$0xff] (!%p325_p2)  ;;  %v1769_v28 = vld [vmem:[%s2220_s5 + $0x30] sm:$0xff] (!%p325_p2)   ;;  %v1771_v43 = vld [vmem:[%s2220_s5 + $0x38] sm:$0xff] (!%p325_p2)  }
   0xb   : > { %1655 = vmatpush3.bf16.msra.mxu0 (!%p325_p2), %v1758_v2 }
   0xc   : > { %1703 = vmatpush3.bf16.msra.mxu1 (!%p325_p2), %v1759_v3  ;;  %1656 = vmatprep.subr.bf16.mxu0 (!%p325_p2), %v1760_v4 }
   0xd   : > { %s2227_s17 = smov (!%p368_p3, %s1479_s17), 63  ;;  %1704 = vmatprep.subr.bf16.mxu1 %v1761_v5 }
   0xe   : > { %s1480_s12 = sshll.u32 %s2227_s17, 2  ;;  %s1484_s11 = sshll.u32 %s2227_s17, 3 }
   0xf   : > { %1657 = vmatpush3.bf16.msra.mxu0 %v1760_v4  ;;  %s1895_s21 = scalar_lea.vmem %s2215_s0, %s1480_s12  ;;  %s1903_s26 = scalar_lea.vmem %s2219_s4, %s1480_s12 }
  0x10   : > { %1705 = vmatpush3.bf16.msra.mxu1 %v1761_v5  ;;  %1658 = vmatprep.subr.bf16.mxu0 %v1762_v6  ;;  %v1526_v12 = vld [vmem:[%s1895_s21] sm:$0xff]   ;;  %v1589_v18 = vld [vmem:[%s1895_s21 + $0x8] sm:$0xff]   ;;  %v1590_v23 = vld [vmem:[%s1895_s21 + $0x10] sm:$0xff]   ;;  %s2063_s15 = scalar_lea.vmem %s2225_s10, %s1484_s11 }
  0x11   : > { %1706 = vmatprep.subr.bf16.mxu1 %v1763_v7  ;;  %v1527_v15 = vunpack.c.l.bf16 %v1526_v12  ;;  %v1528_v16 = vunpack.c.h.bf16 %v1526_v12  ;;  %v1772_v17 = vld [vmem:[%s1903_s26] sm:$0xff]   ;;  %v1531_v21 = vunpack.c.l.bf16 %v1589_v18  ;;  %v1532_v22 = vunpack.c.h.bf16 %v1589_v18  ;;  %v1591_v27 = vld [vmem:[%s1895_s21 + $0x18] sm:$0xff]   ;;  %v1593_v55 = vld [vmem:[%s1895_s21 + $0x28] sm:$0xff]  }
  0x12   : > { %1716 = vmatprep.mubr.bf16.mxu1 %v1772_v17  ;;  %v1535_v25 = vunpack.c.l.bf16 %v1590_v23  ;;  %v1536_v26 = vunpack.c.h.bf16 %v1590_v23  ;;  %v1539_v35 = vunpack.c.l.bf16 %v1591_v27  ;;  %v1540_v36 = vunpack.c.h.bf16 %v1591_v27  ;;  %v1592_v37 = vld [vmem:[%s1895_s21 + $0x20] sm:$0xff]   ;;  %v1594_v58 = vld [vmem:[%s1895_s21 + $0x30] sm:$0xff]   ;;  %v1773_v1 = vld [vmem:[%s1903_s26 + $0x8] sm:$0xff]  }
  0x13   : > { %1659 = vmatpush3.bf16.msra.mxu0 %v1762_v6  ;;  %v457_v19 = vmul.f32 %v1527_v15, %v1912_v13  ;;  %v458_v20 = vmul.f32 %v1528_v16, %v1912_v13  ;;  %v459_v31 = vmul.f32 %v1531_v21, %v1912_v13  ;;  %v460_v32 = vmul.f32 %v1532_v22, %v1912_v13  ;;  %v1774_v6 = vld [vmem:[%s1903_s26 + $0x10] sm:$0xff]   ;;  %v1596_v18 = vld [vmem:[%s1895_s21 + $0x40] sm:$0xff]  }
  0x14   : > { %1707 = vmatpush3.bf16.msra.mxu1 %v1763_v7  ;;  %1660 = vmatprep.subr.bf16.mxu0 %v1764_v8  ;;  %v461_v33 = vmul.f32 %v1535_v25, %v1912_v13  ;;  %v462_v34 = vmul.f32 %v1536_v26, %v1912_v13  ;;  %v1543_v46 = vunpack.c.l.bf16 %v1592_v37  ;;  %v463_v50 = vmul.f32 %v1539_v35, %v1912_v13  ;;  %v1775_v25 = vld [vmem:[%s1903_s26 + $0x18] sm:$0xff]  }
  0x15   : > { %1708 = vmatprep.subr.bf16.mxu1 %v1765_v9  ;;  %v496_v29 = vadd.f32 %v1917_v14, %v457_v19  ;;  %v497_v30 = vadd.f32 %v1917_v14, %v458_v20  ;;  %v498_v40 = vadd.f32 %v1917_v14, %v459_v31  ;;  %v499_v41 = vadd.f32 %v1917_v14, %v460_v32 }
  0x16   : > { %v500_v44 = vadd.f32 %v1917_v14, %v461_v33  ;;  %v501_v45 = vadd.f32 %v1917_v14, %v462_v34  ;;  %v464_v53 = vmul.f32 %v1540_v36, %v1912_v13  ;;  %v1544_v54 = vunpack.c.h.bf16 %v1592_v37 }
  0x17   : > { %1661 = vmatpush3.bf16.msra.mxu0 %v1764_v8  ;;  %v528_v38 = vmax.f32 %v496_v29, 0.0  ;;  %v529_v39 = vmax.f32 %v497_v30, 0.0  ;;  %v530_v48 = vmax.f32 %v498_v40, 0.0  ;;  %v531_v49 = vmax.f32 %v499_v41, 0.0  ;;  %v1776_v30 = vld [vmem:[%s1903_s26 + $0x20] sm:$0xff]   ;;  %v1598_v40 = vld [vmem:[%s1895_s21 + $0x50] sm:$0xff]  }
  0x18   : > { %1709 = vmatpush3.bf16.msra.mxu1 %v1765_v9  ;;  %1662 = vmatprep.subr.bf16.mxu0 %v1766_v10  ;;  %v532_v51 = vmax.f32 %v500_v44, 0.0  ;;  %v533_v52 = vmax.f32 %v501_v45, 0.0  ;;  %v465_v56 = vmul.f32 %v1543_v46, %v1912_v13  ;;  %v466_v57 = vmul.f32 %v1544_v54, %v1912_v13 }
  0x19   : > { %1710 = vmatprep.subr.bf16.mxu1 %v1767_v11  ;;  %v560_v47 = vpack.c.bf16 %v529_v39, %v528_v38  ;;  %v1547_v59 = vunpack.c.l.bf16 %v1593_v55  ;;  %v1548_v60 = vunpack.c.h.bf16 %v1593_v55  ;;  %v561_v61 = vpack.c.bf16 %v531_v49, %v530_v48  ;;  %v1597_v39 = vld [vmem:[%s1895_s21 + $0x48] sm:$0xff]  }
  0x1a   : > { %v562_v62 = vpack.c.bf16 %v533_v52, %v532_v51  ;;  %v502_v63 = vadd.f32 %v1917_v14, %v463_v50  ;;  %v503_v0 = vadd.f32 %v1917_v14, %v464_v53  ;;  %v504_v2 = vadd.f32 %v1917_v14, %v465_v56  ;;  %v1778_v52 = vld [vmem:[%s1903_s26 + $0x30] sm:$0xff]  }
  0x1b   : > { %1663 = vmatpush3.bf16.msra.mxu0 %v1766_v10  ;;  %1668 = vmatprep.mubr.bf16.mxu0 %v560_v47  ;;  %v505_v3 = vadd.f32 %v1917_v14, %v466_v57  ;;  %v1551_v4 = vunpack.c.l.bf16 %v1594_v58  ;;  %v1552_v5 = vunpack.c.h.bf16 %v1594_v58  ;;  %v467_v7 = vmul.f32 %v1547_v59, %v1912_v13  ;;  %v1777_v47 = vld [vmem:[%s1903_s26 + $0x28] sm:$0xff]   ;;  %v1599_v57 = vld [vmem:[%s1895_s21 + $0x58] sm:$0xff]  }
  0x1c   : > { %1711 = vmatpush3.bf16.msra.mxu1 %v1767_v11  ;;  %1664 = vmatprep.subr.bf16.mxu0 %v1768_v24  ;;  %v468_v8 = vmul.f32 %v1548_v60, %v1912_v13  ;;  %v534_v9 = vmax.f32 %v502_v63, 0.0  ;;  %v535_v10 = vmax.f32 %v503_v0, 0.0  ;;  %v1595_v11 = vld [vmem:[%s1895_s21 + $0x38] sm:$0xff]   ;;  %v536_v12 = vmax.f32 %v504_v2, 0.0 }
  0x1d   : > { %1712 = vmatprep.subr.bf16.mxu1 %v1769_v28  ;;  %v537_v15 = vmax.f32 %v505_v3, 0.0  ;;  %v469_v16 = vmul.f32 %v1551_v4, %v1912_v13  ;;  %v470_v17 = vmul.f32 %v1552_v5, %v1912_v13  ;;  %v506_v19 = vadd.f32 %v1917_v14, %v467_v7  ;;  %v1779_v5 = vld [vmem:[%s1903_s26 + $0x38] sm:$0xff]  }
  0x1e   : > { %v507_v20 = vadd.f32 %v1917_v14, %v468_v8  ;;  %v1555_v21 = vunpack.c.l.bf16 %v1595_v11  ;;  %v563_v22 = vpack.c.bf16 %v535_v10, %v534_v9  ;;  %v1556_v23 = vunpack.c.h.bf16 %v1595_v11  ;;  %v1780_v10 = vld [vmem:[%s1903_s26 + $0x40] sm:$0xff]  }
  0x1f   : > { %1665 = vmatpush3.bf16.msra.mxu0 %v1768_v24  ;;  %v1559_v24 = vunpack.c.l.bf16 %v1596_v18  ;;  %v564_v26 = vpack.c.bf16 %v537_v15, %v536_v12  ;;  %v508_v27 = vadd.f32 %v1917_v14, %v469_v16  ;;  %v1560_v29 = vunpack.c.h.bf16 %v1596_v18 }
  0x20   : > { %1713 = vmatpush3.bf16.msra.mxu1 %v1769_v28  ;;  %1666 = vmatprep.subr.bf16.mxu0 %v1770_v42  ;;  %v509_v28 = vadd.f32 %v1917_v14, %v470_v17  ;;  %v538_v31 = vmax.f32 %v506_v19, 0.0  ;;  %v539_v32 = vmax.f32 %v507_v20, 0.0  ;;  %v471_v33 = vmul.f32 %v1555_v21, %v1912_v13  ;;  %v1601_v21 = vld [vmem:[%s1895_s21 + $0x68] sm:$0xff]  }
  0x21   : > { %1714 = vmatprep.subr.bf16.mxu1 %v1771_v43  ;;  %v472_v34 = vmul.f32 %v1556_v23, %v1912_v13  ;;  %v473_v35 = vmul.f32 %v1559_v24, %v1912_v13  ;;  %v540_v36 = vmax.f32 %v508_v27, 0.0  ;;  %v474_v38 = vmul.f32 %v1560_v29, %v1912_v13  ;;  %v1781_v29 = vld [vmem:[%s1903_s26 + $0x48] sm:$0xff]  }
  0x22   : > { %v541_v37 = vmax.f32 %v509_v28, 0.0  ;;  %v565_v41 = vpack.c.bf16 %v539_v32, %v538_v31  ;;  %v1563_v45 = vunpack.c.l.bf16 %v1597_v39  ;;  %v1564_v46 = vunpack.c.h.bf16 %v1597_v39 }
  0x23   : > { %1667 = vmatpush3.bf16.msra.mxu0 %v1770_v42  ;;  %v510_v42 = vadd.f32 %v1917_v14, %v471_v33  ;;  %v512_v44 = vadd.f32 %v1917_v14, %v473_v35  ;;  %v513_v49 = vadd.f32 %v1917_v14, %v474_v38  ;;  %v1567_v50 = vunpack.c.l.bf16 %v1598_v40 }
  0x24   : > { %1715 = vmatpush3.bf16.msra.mxu1 %v1771_v43  ;;  %v511_v43 = vadd.f32 %v1917_v14, %v472_v34  ;;  %v566_v48 = vpack.c.bf16 %v541_v37, %v540_v36  ;;  %v1568_v51 = vunpack.c.h.bf16 %v1598_v40  ;;  %v475_v55 = vmul.f32 %v1563_v45, %v1912_v13  ;;  %v1782_v34 = vld [vmem:[%s1903_s26 + $0x50] sm:$0xff]  }
  0x25   : > { %v542_v53 = vmax.f32 %v510_v42, 0.0  ;;  %v476_v56 = vmul.f32 %v1564_v46, %v1912_v13  ;;  %v544_v58 = vmax.f32 %v512_v44, 0.0  ;;  %v545_v59 = vmax.f32 %v513_v49, 0.0  ;;  %v1783_v49 = vld [vmem:[%s1903_s26 + $0x58] sm:$0xff]  }
  0x26   : > { %1669 = vmatmul.mubr.bf16.vlgmr.msra.gmra.mrb[0].mxu0 %v561_v61  ;;  %v543_v54 = vmax.f32 %v511_v43, 0.0  ;;  %v477_v60 = vmul.f32 %v1567_v50, %v1912_v13  ;;  %v478_v61 = vmul.f32 %v1568_v51, %v1912_v13  ;;  %v1571_v63 = vunpack.c.l.bf16 %v1599_v57  ;;  %v1603_v43 = vld [vmem:[%s1895_s21 + $0x78] sm:$0xff]  }
  0x27   : > { %1717 = vmatmul.mubr.bf16.vlgmr.msra.gmra.mrb[0].mxu1 %v1773_v1  ;;  %1672 = vmatprep.mubr.bf16.mxu0 %v562_v62  ;;  %v1600_v62 = vld [vmem:[%s1895_s21 + $0x60] sm:$0xff]   ;;  %v1572_v0 = vunpack.c.h.bf16 %v1599_v57  ;;  %v514_v2 = vadd.f32 %v1917_v14, %v475_v55  ;;  %v515_v3 = vadd.f32 %v1917_v14, %v476_v56  ;;  %v1579_v27 = vunpack.c.l.bf16 %v1601_v21 }
  0x28   : > { %1720 = vmatprep.mubr.bf16.mxu1 %v1774_v6  ;;  %v567_v1 = vpack.c.bf16 %v543_v54, %v542_v53  ;;  %v1575_v4 = vunpack.c.l.bf16 %v1600_v62  ;;  %v568_v6 = vpack.c.bf16 %v545_v59, %v544_v58  ;;  %v516_v7 = vadd.f32 %v1917_v14, %v477_v60  ;;  %v1784_v53 = vld [vmem:[%s1903_s26 + $0x60] sm:$0xff]  }
  0x29   : > { %v517_v8 = vadd.f32 %v1917_v14, %v478_v61  ;;  %v1576_v9 = vunpack.c.h.bf16 %v1600_v62  ;;  %v479_v11 = vmul.f32 %v1571_v63, %v1912_v13  ;;  %v480_v12 = vmul.f32 %v1572_v0, %v1912_v13  ;;  %v1785_v63 = vld [vmem:[%s1903_s26 + $0x68] sm:$0xff]  }
  0x2a   : > { %v546_v15 = vmax.f32 %v514_v2, 0.0  ;;  %v547_v16 = vmax.f32 %v515_v3, 0.0  ;;  %v481_v17 = vmul.f32 %v1575_v4, %v1912_v13  ;;  %v548_v18 = vmax.f32 %v516_v7, 0.0  ;;  %v1787_v4 = vld [vmem:[%s1903_s26 + $0x78] sm:$0xff]   ;;  %v2039_v7 = vld [vmem:[%s2222_s7] ss:$0 sm:$0xff] }
  0x2b   : > { %v549_v19 = vmax.f32 %v517_v8, 0.0  ;;  %v482_v20 = vmul.f32 %v1576_v9, %v1912_v13  ;;  %v518_v23 = vadd.f32 %v1917_v14, %v479_v11  ;;  %v519_v24 = vadd.f32 %v1917_v14, %v480_v12 }
  0x2c   : > { %v1580_v28 = vunpack.c.h.bf16 %v1601_v21  ;;  %v483_v37 = vmul.f32 %v1579_v27, %v1912_v13 }
  0x2d   : > { %v521_v31 = vadd.f32 %v1917_v14, %v482_v20  ;;  %v550_v35 = vmax.f32 %v518_v23, 0.0  ;;  %v551_v36 = vmax.f32 %v519_v24, 0.0 }
  0x2e   : > { %1673 = vmatmul.mubr.bf16.gmra.mrb[4].mxu0 %v563_v22  ;;  %v1602_v22 = vld [vmem:[%s1895_s21 + $0x70] sm:$0xff]   ;;  %v484_v38 = vmul.f32 %v1580_v28, %v1912_v13  ;;  %v522_v45 = vadd.f32 %v1917_v14, %v483_v37 }
  0x2f   : > { %1721 = vmatmul.mubr.bf16.gmra.mrb[4].mxu1 %v1775_v25  ;;  %1676 = vmatprep.mubr.bf16.mxu0 %v564_v26  ;;  %v569_v25 = vpack.c.bf16 %v547_v16, %v546_v15  ;;  %v520_v26 = vadd.f32 %v1917_v14, %v481_v17  ;;  %v1583_v32 = vunpack.c.l.bf16 %v1602_v22  ;;  %v1584_v33 = vunpack.c.h.bf16 %v1602_v22  ;;  %v2050_v22 = vld [vmem:[%s2224_s9] ss:$0 sm:$0xff] }
  0x30   : > { %1724 = vmatprep.mubr.bf16.mxu1 %v1776_v30  ;;  %v570_v30 = vpack.c.bf16 %v549_v19, %v548_v18  ;;  %v553_v40 = vmax.f32 %v521_v31, 0.0  ;;  %v571_v44 = vpack.c.bf16 %v551_v36, %v550_v35  ;;  %v523_v46 = vadd.f32 %v1917_v14, %v484_v38 }
  0x31   : > { %v552_v39 = vmax.f32 %v520_v26, 0.0  ;;  %v486_v42 = vmul.f32 %v1584_v33, %v1912_v13  ;;  %v554_v54 = vmax.f32 %v522_v45, 0.0 }
  0x32   : > { %v555_v55 = vmax.f32 %v523_v46, 0.0 }
  0x33   : > { %v572_v50 = vpack.c.bf16 %v553_v40, %v552_v39 }
  0x34   : > { %v573_v60 = vpack.c.bf16 %v555_v55, %v554_v54 }
  0x36   : > { %1677 = vmatmul.mubr.bf16.gmra.mrb[8].mxu0 %v565_v41  ;;  %v485_v41 = vmul.f32 %v1583_v32, %v1912_v13 }
  0x37   : > { %1725 = vmatmul.mubr.bf16.gmra.mrb[8].mxu1 %v1777_v47  ;;  %1680 = vmatprep.mubr.bf16.mxu0 %v566_v48  ;;  %v1587_v47 = vunpack.c.l.bf16 %v1603_v43  ;;  %v1588_v48 = vunpack.c.h.bf16 %v1603_v43 }
  0x38   : > { %1728 = vmatprep.mubr.bf16.mxu1 %v1778_v52  ;;  %v524_v51 = vadd.f32 %v1917_v14, %v485_v41  ;;  %v525_v52 = vadd.f32 %v1917_v14, %v486_v42 }
  0x39   : > { %v487_v56 = vmul.f32 %v1587_v47, %v1912_v13  ;;  %v488_v57 = vmul.f32 %v1588_v48, %v1912_v13 }
  0x3a   : > { %v556_v58 = vmax.f32 %v524_v51, 0.0  ;;  %v557_v59 = vmax.f32 %v525_v52, 0.0 }
  0x3b   : > { %v526_v61 = vadd.f32 %v1917_v14, %v487_v56  ;;  %v527_v62 = vadd.f32 %v1917_v14, %v488_v57  ;;  %v2034_v14 = vld [vmem:[%s2223_s8] ss:$0 sm:$0xff] }
  0x3c   : > { %v574_v0 = vpack.c.bf16 %v557_v59, %v556_v58 }
  0x3d   : > { %v558_v2 = vmax.f32 %v526_v61, 0.0  ;;  %v559_v3 = vmax.f32 %v527_v62, 0.0 }
  0x3e   : > { %1681 = vmatmul.mubr.bf16.gmra.mrb[12].mxu0 %v567_v1  ;;  %v1786_v1 = vld [vmem:[%s1903_s26 + $0x70] sm:$0xff]  }
  0x3f   : > { %1729 = vmatmul.mubr.bf16.gmra.mrb[12].mxu1 %v1779_v5  ;;  %1684 = vmatprep.mubr.bf16.mxu0 %v568_v6  ;;  %v575_v13 = vpack.c.bf16 %v559_v3, %v558_v2  ;;  %v2029_v5 = vld [vmem:[%s2221_s6] ss:$0 sm:$0xff] }
  0x40   : > { %1732 = vmatprep.mubr.bf16.mxu1 %v1780_v10 }
  0x46   : > { %1685 = vmatmul.mubr.bf16.gmra.mrb[16].mxu0 %v569_v25 }
  0x47   : > { %1733 = vmatmul.mubr.bf16.gmra.mrb[16].mxu1 %v1781_v29  ;;  %1688 = vmatprep.mubr.bf16.mxu0 %v570_v30 }
  0x48   : > { %1736 = vmatprep.mubr.bf16.mxu1 %v1782_v34 }
  0x4e   : > { %1689 = vmatmul.mubr.bf16.gmra.mrb[20].mxu0 %v571_v44 }
  0x4f   : > { %1737 = vmatmul.mubr.bf16.gmra.mrb[20].mxu1 %v1783_v49  ;;  %1692 = vmatprep.mubr.bf16.mxu0 %v572_v50 }
  0x50   : > { %1740 = vmatprep.mubr.bf16.mxu1 %v1784_v53 }
  0x56   : > { %1693 = vmatmul.mubr.bf16.gmra.mrb[24].mxu0 %v573_v60 }
  0x57   : > { %1741 = vmatmul.mubr.bf16.gmra.mrb[24].mxu1 %v1785_v63  ;;  %1696 = vmatprep.mubr.bf16.mxu0 %v574_v0 }
  0x58   : > { %1744 = vmatprep.mubr.bf16.mxu1 %v1786_v1 }
  0x5e   : > { %1697 = vmatmul.mubr.bf16.gmra.mrb[28].mxu0 %v575_v13 }
  0x5f   : > { %1745 = vmatmul.mubr.bf16.gmra.mrb[28].mxu1 %v1787_v4 }
  0xf9   : > { %v1670_v6 = vpop.f32.mrb[0].mxu0 }
  0xfa   : > { %v1163_v8 = vmul.f32 %v1670_v6, %v2029_v5  ;;  %v1718_v9 = vpop.f32.mrb[0].mxu1  ;;  %v674_v10 = vpop.f32.mrb[1].mxu0 }
  0xfb   : > { %v1241_v11 = vmul.f32 %v1718_v9, %v2034_v14  ;;  %v1161_v12 = vmul.f32 %v2029_v5, %v674_v10  ;;  %v1027_v15 = vpop.f32.mrb[1].mxu1  ;;  %v1671_v16 = vpop.f32.mrb[2].mxu0 }
  0xfc   : > { %v1202_v17 = vadd.f32 %v2039_v7, %v1163_v8  ;;  %v1239_v18 = vmul.f32 %v2034_v14, %v1027_v15  ;;  %v1164_v19 = vmul.f32 %v1671_v16, %v2029_v5  ;;  %v1719_v20 = vpop.f32.mrb[2].mxu1  ;;  %v677_v21 = vpop.f32.mrb[3].mxu0 }
  0xfd   : > { %v1200_v23 = vadd.f32 %v2039_v7, %v1161_v12  ;;  %v1162_v24 = vmul.f32 %v2029_v5, %v677_v21  ;;  %v1030_v25 = vpop.f32.mrb[3].mxu1  ;;  %v1242_v28 = vmul.f32 %v1719_v20, %v2034_v14 }
  0xfe   : > { %v1273_v26 = vadd.f32 %v1241_v11, %v1202_v17  ;;  %v1203_v27 = vadd.f32 %v2039_v7, %v1164_v19  ;;  %v1240_v31 = vmul.f32 %v2034_v14, %v1030_v25 }
  0xff   : > { %v1271_v29 = vadd.f32 %v1239_v18, %v1200_v23  ;;  %v1201_v30 = vadd.f32 %v2039_v7, %v1162_v24 }
 0x100   : > { %v1312_v32 = vadd.f32 %v2050_v22, %v1273_v26  ;;  %v1274_v33 = vadd.f32 %v1242_v28, %v1203_v27 }
 0x101   : > { %v1310_v34 = vadd.f32 %v2050_v22, %v1271_v29  ;;  %v1272_v35 = vadd.f32 %v1240_v31, %v1201_v30  ;;  %v1674_v36 = vpop.f32.mrb[4].mxu0 }
 0x102   : > { %v1344_v37 = vmax.f32 %v1312_v32, 0.0  ;;  %v1313_v38 = vadd.f32 %v2050_v22, %v1274_v33  ;;  %v1167_v39 = vmul.f32 %v1674_v36, %v2029_v5  ;;  %v1722_v40 = vpop.f32.mrb[4].mxu1  ;;  %v690_v41 = vpop.f32.mrb[5].mxu0 }
 0x103   : > { %v1342_v42 = vmax.f32 %v1310_v34, 0.0  ;;  %v1311_v43 = vadd.f32 %v2050_v22, %v1272_v35  ;;  %v1245_v44 = vmul.f32 %v1722_v40, %v2034_v14  ;;  %v1165_v45 = vmul.f32 %v2029_v5, %v690_v41  ;;  %v1043_v46 = vpop.f32.mrb[5].mxu1  ;;  %v1675_v47 = vpop.f32.mrb[6].mxu0 }
 0x104   : > { %1376 = vst [vmem:[%s2063_s15 + $0x10] sm:$0xff] %v1344_v37  ;;  %v1345_v48 = vmax.f32 %v1313_v38, 0.0  ;;  %v1206_v49 = vadd.f32 %v2039_v7, %v1167_v39  ;;  %v1243_v50 = vmul.f32 %v2034_v14, %v1043_v46  ;;  %v1168_v51 = vmul.f32 %v1675_v47, %v2029_v5  ;;  %v1723_v52 = vpop.f32.mrb[6].mxu1  ;;  %v693_v53 = vpop.f32.mrb[7].mxu0 }
 0x105   : > { %1374 = vst [vmem:[%s2063_s15] sm:$0xff] %v1342_v42  ;;  %v1343_v54 = vmax.f32 %v1311_v43, 0.0  ;;  %v1204_v55 = vadd.f32 %v2039_v7, %v1165_v45  ;;  %v1166_v56 = vmul.f32 %v2029_v5, %v693_v53  ;;  %v1046_v57 = vpop.f32.mrb[7].mxu1  ;;  %v1246_v60 = vmul.f32 %v1723_v52, %v2034_v14 }
 0x106   : > { %1377 = vst [vmem:[%s2063_s15 + $0x18] sm:$0xff] %v1345_v48  ;;  %v1277_v58 = vadd.f32 %v1245_v44, %v1206_v49  ;;  %v1207_v59 = vadd.f32 %v2039_v7, %v1168_v51  ;;  %v1244_v63 = vmul.f32 %v2034_v14, %v1046_v57 }
 0x107   : > { %1375 = vst [vmem:[%s2063_s15 + $0x8] sm:$0xff] %v1343_v54  ;;  %v1275_v61 = vadd.f32 %v1243_v50, %v1204_v55  ;;  %v1205_v62 = vadd.f32 %v2039_v7, %v1166_v56 }
 0x108   : > { %v1316_v0 = vadd.f32 %v2050_v22, %v1277_v58  ;;  %v1278_v1 = vadd.f32 %v1246_v60, %v1207_v59 }
 0x109   : > { %v1314_v2 = vadd.f32 %v2050_v22, %v1275_v61  ;;  %v1276_v3 = vadd.f32 %v1244_v63, %v1205_v62  ;;  %v1678_v13 = vpop.f32.mrb[8].mxu0 }
 0x10a   : > { %v1348_v4 = vmax.f32 %v1316_v0, 0.0  ;;  %v1317_v6 = vadd.f32 %v2050_v22, %v1278_v1  ;;  %v1171_v8 = vmul.f32 %v1678_v13, %v2029_v5  ;;  %v1726_v9 = vpop.f32.mrb[8].mxu1  ;;  %v706_v10 = vpop.f32.mrb[9].mxu0 }
 0x10b   : > { %v1346_v11 = vmax.f32 %v1314_v2, 0.0  ;;  %v1315_v12 = vadd.f32 %v2050_v22, %v1276_v3  ;;  %v1249_v15 = vmul.f32 %v1726_v9, %v2034_v14  ;;  %v1169_v16 = vmul.f32 %v2029_v5, %v706_v10  ;;  %v1059_v17 = vpop.f32.mrb[9].mxu1  ;;  %v1679_v18 = vpop.f32.mrb[10].mxu0 }
 0x10c   : > { %1380 = vst [vmem:[%s2063_s15 + $0x30] sm:$0xff] %v1348_v4  ;;  %v1349_v19 = vmax.f32 %v1317_v6, 0.0  ;;  %v1210_v20 = vadd.f32 %v2039_v7, %v1171_v8  ;;  %v1247_v21 = vmul.f32 %v2034_v14, %v1059_v17  ;;  %v1172_v23 = vmul.f32 %v1679_v18, %v2029_v5  ;;  %v1727_v24 = vpop.f32.mrb[10].mxu1  ;;  %v709_v25 = vpop.f32.mrb[11].mxu0 }
 0x10d   : > { %1378 = vst [vmem:[%s2063_s15 + $0x20] sm:$0xff] %v1346_v11  ;;  %v1347_v26 = vmax.f32 %v1315_v12, 0.0  ;;  %v1208_v27 = vadd.f32 %v2039_v7, %v1169_v16  ;;  %v1170_v28 = vmul.f32 %v2029_v5, %v709_v25  ;;  %v1062_v29 = vpop.f32.mrb[11].mxu1  ;;  %v1250_v32 = vmul.f32 %v1727_v24, %v2034_v14 }
 0x10e   : > { %1381 = vst [vmem:[%s2063_s15 + $0x38] sm:$0xff] %v1349_v19  ;;  %v1281_v30 = vadd.f32 %v1249_v15, %v1210_v20  ;;  %v1211_v31 = vadd.f32 %v2039_v7, %v1172_v23  ;;  %v1248_v35 = vmul.f32 %v2034_v14, %v1062_v29 }
 0x10f   : > { %1379 = vst [vmem:[%s2063_s15 + $0x28] sm:$0xff] %v1347_v26  ;;  %v1279_v33 = vadd.f32 %v1247_v21, %v1208_v27  ;;  %v1209_v34 = vadd.f32 %v2039_v7, %v1170_v28 }
 0x110   : > { %v1320_v36 = vadd.f32 %v2050_v22, %v1281_v30  ;;  %v1282_v37 = vadd.f32 %v1250_v32, %v1211_v31 }
 0x111   : > { %v1318_v38 = vadd.f32 %v2050_v22, %v1279_v33  ;;  %v1280_v39 = vadd.f32 %v1248_v35, %v1209_v34  ;;  %v1682_v40 = vpop.f32.mrb[12].mxu0 }
 0x112   : > { %v1352_v41 = vmax.f32 %v1320_v36, 0.0  ;;  %v1321_v42 = vadd.f32 %v2050_v22, %v1282_v37  ;;  %v1175_v43 = vmul.f32 %v1682_v40, %v2029_v5  ;;  %v1730_v44 = vpop.f32.mrb[12].mxu1  ;;  %v722_v45 = vpop.f32.mrb[13].mxu0 }
 0x113   : > { %v1350_v46 = vmax.f32 %v1318_v38, 0.0  ;;  %v1319_v47 = vadd.f32 %v2050_v22, %v1280_v39  ;;  %v1253_v48 = vmul.f32 %v1730_v44, %v2034_v14  ;;  %v1173_v49 = vmul.f32 %v2029_v5, %v722_v45  ;;  %v1075_v50 = vpop.f32.mrb[13].mxu1  ;;  %v1683_v51 = vpop.f32.mrb[14].mxu0 }
 0x114   : > { %1384 = vst [vmem:[%s2063_s15 + $0x50] sm:$0xff] %v1352_v41  ;;  %v1353_v52 = vmax.f32 %v1321_v42, 0.0  ;;  %v1214_v53 = vadd.f32 %v2039_v7, %v1175_v43  ;;  %v1251_v54 = vmul.f32 %v2034_v14, %v1075_v50  ;;  %v1176_v55 = vmul.f32 %v1683_v51, %v2029_v5  ;;  %v1731_v56 = vpop.f32.mrb[14].mxu1  ;;  %v725_v57 = vpop.f32.mrb[15].mxu0 }
 0x115   : > { %1382 = vst [vmem:[%s2063_s15 + $0x40] sm:$0xff] %v1350_v46  ;;  %v1351_v58 = vmax.f32 %v1319_v47, 0.0  ;;  %v1212_v59 = vadd.f32 %v2039_v7, %v1173_v49  ;;  %v1174_v60 = vmul.f32 %v2029_v5, %v725_v57  ;;  %v1078_v61 = vpop.f32.mrb[15].mxu1  ;;  %v1254_v0 = vmul.f32 %v1731_v56, %v2034_v14 }
 0x116   : > { %1385 = vst [vmem:[%s2063_s15 + $0x58] sm:$0xff] %v1353_v52  ;;  %v1285_v62 = vadd.f32 %v1253_v48, %v1214_v53  ;;  %v1215_v63 = vadd.f32 %v2039_v7, %v1176_v55  ;;  %v1252_v3 = vmul.f32 %v2034_v14, %v1078_v61 }
 0x117   : > { %1383 = vst [vmem:[%s2063_s15 + $0x48] sm:$0xff] %v1351_v58  ;;  %v1283_v1 = vadd.f32 %v1251_v54, %v1212_v59  ;;  %v1213_v2 = vadd.f32 %v2039_v7, %v1174_v60 }
 0x118   : > { %v1324_v13 = vadd.f32 %v2050_v22, %v1285_v62  ;;  %v1286_v4 = vadd.f32 %v1254_v0, %v1215_v63 }
 0x119   : > { %v1322_v6 = vadd.f32 %v2050_v22, %v1283_v1  ;;  %v1284_v8 = vadd.f32 %v1252_v3, %v1213_v2  ;;  %v1686_v9 = vpop.f32.mrb[16].mxu0 }
 0x11a   : > { %v1356_v10 = vmax.f32 %v1324_v13, 0.0  ;;  %v1325_v11 = vadd.f32 %v2050_v22, %v1286_v4  ;;  %v1179_v12 = vmul.f32 %v1686_v9, %v2029_v5  ;;  %v1734_v15 = vpop.f32.mrb[16].mxu1  ;;  %v738_v16 = vpop.f32.mrb[17].mxu0 }
 0x11b   : > { %v1354_v17 = vmax.f32 %v1322_v6, 0.0  ;;  %v1323_v18 = vadd.f32 %v2050_v22, %v1284_v8  ;;  %v1257_v19 = vmul.f32 %v1734_v15, %v2034_v14  ;;  %v1177_v20 = vmul.f32 %v2029_v5, %v738_v16  ;;  %v1091_v21 = vpop.f32.mrb[17].mxu1  ;;  %v1687_v23 = vpop.f32.mrb[18].mxu0 }
 0x11c   : > { %1388 = vst [vmem:[%s2063_s15 + $0x70] sm:$0xff] %v1356_v10  ;;  %v1357_v24 = vmax.f32 %v1325_v11, 0.0  ;;  %v1218_v25 = vadd.f32 %v2039_v7, %v1179_v12  ;;  %v1255_v26 = vmul.f32 %v2034_v14, %v1091_v21  ;;  %v1180_v27 = vmul.f32 %v1687_v23, %v2029_v5  ;;  %v1735_v28 = vpop.f32.mrb[18].mxu1  ;;  %v741_v29 = vpop.f32.mrb[19].mxu0 }
 0x11d   : > { %1386 = vst [vmem:[%s2063_s15 + $0x60] sm:$0xff] %v1354_v17  ;;  %v1355_v30 = vmax.f32 %v1323_v18, 0.0  ;;  %v1216_v31 = vadd.f32 %v2039_v7, %v1177_v20  ;;  %v1178_v32 = vmul.f32 %v2029_v5, %v741_v29  ;;  %v1094_v33 = vpop.f32.mrb[19].mxu1  ;;  %v1258_v36 = vmul.f32 %v1735_v28, %v2034_v14 }
 0x11e   : > { %1389 = vst [vmem:[%s2063_s15 + $0x78] sm:$0xff] %v1357_v24  ;;  %v1289_v34 = vadd.f32 %v1257_v19, %v1218_v25  ;;  %v1219_v35 = vadd.f32 %v2039_v7, %v1180_v27  ;;  %v1256_v39 = vmul.f32 %v2034_v14, %v1094_v33 }
 0x11f   : > { %1387 = vst [vmem:[%s2063_s15 + $0x68] sm:$0xff] %v1355_v30  ;;  %v1287_v37 = vadd.f32 %v1255_v26, %v1216_v31  ;;  %v1217_v38 = vadd.f32 %v2039_v7, %v1178_v32 }
 0x120   : > { %v1328_v40 = vadd.f32 %v2050_v22, %v1289_v34  ;;  %v1290_v41 = vadd.f32 %v1258_v36, %v1219_v35 }
 0x121   : > { %v1326_v42 = vadd.f32 %v2050_v22, %v1287_v37  ;;  %v1288_v43 = vadd.f32 %v1256_v39, %v1217_v38  ;;  %v1690_v44 = vpop.f32.mrb[20].mxu0 }
 0x122   : > { %v1360_v45 = vmax.f32 %v1328_v40, 0.0  ;;  %v1329_v46 = vadd.f32 %v2050_v22, %v1290_v41  ;;  %v1183_v47 = vmul.f32 %v1690_v44, %v2029_v5  ;;  %v1738_v48 = vpop.f32.mrb[20].mxu1  ;;  %v754_v49 = vpop.f32.mrb[21].mxu0 }
 0x123   : > { %v1358_v50 = vmax.f32 %v1326_v42, 0.0  ;;  %v1327_v51 = vadd.f32 %v2050_v22, %v1288_v43  ;;  %v1261_v52 = vmul.f32 %v1738_v48, %v2034_v14  ;;  %v1181_v53 = vmul.f32 %v2029_v5, %v754_v49  ;;  %v1107_v54 = vpop.f32.mrb[21].mxu1  ;;  %v1691_v55 = vpop.f32.mrb[22].mxu0 }
 0x124   : > { %1392 = vst [vmem:[%s2063_s15 + $0x90] sm:$0xff] %v1360_v45  ;;  %v1361_v56 = vmax.f32 %v1329_v46, 0.0  ;;  %v1222_v57 = vadd.f32 %v2039_v7, %v1183_v47  ;;  %v1259_v58 = vmul.f32 %v2034_v14, %v1107_v54  ;;  %v1184_v59 = vmul.f32 %v1691_v55, %v2029_v5  ;;  %v1739_v60 = vpop.f32.mrb[22].mxu1  ;;  %v757_v61 = vpop.f32.mrb[23].mxu0 }
 0x125   : > { %1390 = vst [vmem:[%s2063_s15 + $0x80] sm:$0xff] %v1358_v50  ;;  %v1359_v62 = vmax.f32 %v1327_v51, 0.0  ;;  %v1220_v63 = vadd.f32 %v2039_v7, %v1181_v53  ;;  %v1182_v0 = vmul.f32 %v2029_v5, %v757_v61  ;;  %v1110_v1 = vpop.f32.mrb[23].mxu1  ;;  %v1262_v13 = vmul.f32 %v1739_v60, %v2034_v14 }
 0x126   : > { %1393 = vst [vmem:[%s2063_s15 + $0x98] sm:$0xff] %v1361_v56  ;;  %v1293_v2 = vadd.f32 %v1261_v52, %v1222_v57  ;;  %v1223_v3 = vadd.f32 %v2039_v7, %v1184_v59  ;;  %v1260_v8 = vmul.f32 %v2034_v14, %v1110_v1 }
 0x127   : > { %1391 = vst [vmem:[%s2063_s15 + $0x88] sm:$0xff] %v1359_v62  ;;  %v1291_v4 = vadd.f32 %v1259_v58, %v1220_v63  ;;  %v1221_v6 = vadd.f32 %v2039_v7, %v1182_v0 }
 0x128   : > { %v1332_v9 = vadd.f32 %v2050_v22, %v1293_v2  ;;  %v1294_v10 = vadd.f32 %v1262_v13, %v1223_v3 }
 0x129   : > { %v1330_v11 = vadd.f32 %v2050_v22, %v1291_v4  ;;  %v1292_v12 = vadd.f32 %v1260_v8, %v1221_v6  ;;  %v1694_v15 = vpop.f32.mrb[24].mxu0 }
 0x12a   : > { %v1364_v16 = vmax.f32 %v1332_v9, 0.0  ;;  %v1333_v17 = vadd.f32 %v2050_v22, %v1294_v10  ;;  %v1187_v18 = vmul.f32 %v1694_v15, %v2029_v5  ;;  %v1742_v19 = vpop.f32.mrb[24].mxu1  ;;  %v770_v20 = vpop.f32.mrb[25].mxu0 }
 0x12b   : > { %v1362_v21 = vmax.f32 %v1330_v11, 0.0  ;;  %v1331_v23 = vadd.f32 %v2050_v22, %v1292_v12  ;;  %v1265_v24 = vmul.f32 %v1742_v19, %v2034_v14  ;;  %v1185_v25 = vmul.f32 %v2029_v5, %v770_v20  ;;  %v1123_v26 = vpop.f32.mrb[25].mxu1  ;;  %v1695_v27 = vpop.f32.mrb[26].mxu0 }
 0x12c   : > { %1396 = vst [vmem:[%s2063_s15 + $0xb0] sm:$0xff] %v1364_v16  ;;  %v1365_v28 = vmax.f32 %v1333_v17, 0.0  ;;  %v1226_v29 = vadd.f32 %v2039_v7, %v1187_v18  ;;  %v1263_v30 = vmul.f32 %v2034_v14, %v1123_v26  ;;  %v1188_v31 = vmul.f32 %v1695_v27, %v2029_v5  ;;  %v1743_v32 = vpop.f32.mrb[26].mxu1  ;;  %v773_v33 = vpop.f32.mrb[27].mxu0 }
 0x12d   : > { %1394 = vst [vmem:[%s2063_s15 + $0xa0] sm:$0xff] %v1362_v21  ;;  %v1363_v34 = vmax.f32 %v1331_v23, 0.0  ;;  %v1224_v35 = vadd.f32 %v2039_v7, %v1185_v25  ;;  %v1186_v36 = vmul.f32 %v2029_v5, %v773_v33  ;;  %v1126_v37 = vpop.f32.mrb[27].mxu1  ;;  %v1266_v40 = vmul.f32 %v1743_v32, %v2034_v14 }
 0x12e   : > { %1397 = vst [vmem:[%s2063_s15 + $0xb8] sm:$0xff] %v1365_v28  ;;  %v1297_v38 = vadd.f32 %v1265_v24, %v1226_v29  ;;  %v1227_v39 = vadd.f32 %v2039_v7, %v1188_v31  ;;  %v1264_v43 = vmul.f32 %v2034_v14, %v1126_v37 }
 0x12f   : > { %1395 = vst [vmem:[%s2063_s15 + $0xa8] sm:$0xff] %v1363_v34  ;;  %v1295_v41 = vadd.f32 %v1263_v30, %v1224_v35  ;;  %v1225_v42 = vadd.f32 %v2039_v7, %v1186_v36 }
 0x130   : > { %v1336_v44 = vadd.f32 %v2050_v22, %v1297_v38  ;;  %v1298_v45 = vadd.f32 %v1266_v40, %v1227_v39 }
 0x131   : > { %v1334_v46 = vadd.f32 %v2050_v22, %v1295_v41  ;;  %v1296_v47 = vadd.f32 %v1264_v43, %v1225_v42  ;;  %v1698_v48 = vpop.f32.mrb[28].mxu0 }
 0x132   : > { %v1368_v49 = vmax.f32 %v1336_v44, 0.0  ;;  %v1337_v50 = vadd.f32 %v2050_v22, %v1298_v45  ;;  %v1191_v51 = vmul.f32 %v1698_v48, %v2029_v5  ;;  %v1746_v52 = vpop.f32.mrb[28].mxu1  ;;  %v786_v53 = vpop.f32.mrb[29].mxu0 }
 0x133   : > { %v1366_v54 = vmax.f32 %v1334_v46, 0.0  ;;  %v1335_v55 = vadd.f32 %v2050_v22, %v1296_v47  ;;  %v1269_v56 = vmul.f32 %v1746_v52, %v2034_v14  ;;  %v1189_v57 = vmul.f32 %v2029_v5, %v786_v53  ;;  %v1139_v58 = vpop.f32.mrb[29].mxu1  ;;  %v1699_v59 = vpop.f32.mrb[30].mxu0 }
 0x134   : > { %1400 = vst [vmem:[%s2063_s15 + $0xd0] sm:$0xff] %v1368_v49  ;;  %v1369_v60 = vmax.f32 %v1337_v50, 0.0  ;;  %v1230_v61 = vadd.f32 %v2039_v7, %v1191_v51  ;;  %v1267_v62 = vmul.f32 %v2034_v14, %v1139_v58  ;;  %v1192_v63 = vmul.f32 %v1699_v59, %v2029_v5  ;;  %v1747_v0 = vpop.f32.mrb[30].mxu1  ;;  %v789_v1 = vpop.f32.mrb[31].mxu0 }
 0x135   : > { %1398 = vst [vmem:[%s2063_s15 + $0xc0] sm:$0xff] %v1366_v54  ;;  %v1367_v2 = vmax.f32 %v1335_v55, 0.0  ;;  %v1228_v3 = vadd.f32 %v2039_v7, %v1189_v57  ;;  %v1190_v13 = vmul.f32 %v2029_v5, %v789_v1  ;;  %v1142_v4 = vpop.f32.mrb[31].mxu1  ;;  %v1270_v9 = vmul.f32 %v1747_v0, %v2034_v14 }
 0x136   : > { %1401 = vst [vmem:[%s2063_s15 + $0xd8] sm:$0xff] %v1369_v60  ;;  %v1301_v6 = vadd.f32 %v1269_v56, %v1230_v61  ;;  %v1231_v8 = vadd.f32 %v2039_v7, %v1192_v63  ;;  %v1268_v12 = vmul.f32 %v2034_v14, %v1142_v4 }
 0x137   : > { %1399 = vst [vmem:[%s2063_s15 + $0xc8] sm:$0xff] %v1367_v2  ;;  %v1299_v10 = vadd.f32 %v1267_v62, %v1228_v3  ;;  %v1229_v11 = vadd.f32 %v2039_v7, %v1190_v13 }
 0x138   : > { %v1340_v15 = vadd.f32 %v2050_v22, %v1301_v6  ;;  %v1302_v5 = vadd.f32 %v1270_v9, %v1231_v8 }
 0x139   : > { %v1338_v16 = vadd.f32 %v2050_v22, %v1299_v10  ;;  %v1300_v17 = vadd.f32 %v1268_v12, %v1229_v11 }
 0x13a   : > { %v1372_v18 = vmax.f32 %v1340_v15, 0.0  ;;  %v1341_v19 = vadd.f32 %v2050_v22, %v1302_v5 }
 0x13b   : > { %v1370_v20 = vmax.f32 %v1338_v16, 0.0  ;;  %v1339_v21 = vadd.f32 %v2050_v22, %v1300_v17 }
 0x13c   : > { %1404 = vst [vmem:[%s2063_s15 + $0xf0] sm:$0xff] %v1372_v18  ;;  %v1373_v23 = vmax.f32 %v1341_v19, 0.0 }
 0x13d   : > { %1402 = vst [vmem:[%s2063_s15 + $0xe0] sm:$0xff] %v1370_v20  ;;  %v1371_v24 = vmax.f32 %v1339_v21, 0.0 }
 0x13e   : > { %1405 = vst [vmem:[%s2063_s15 + $0xf8] sm:$0xff] %v1373_v23 }
 0x13f   : > { %1403 = vst [vmem:[%s2063_s15 + $0xe8] sm:$0xff] %v1371_v24 }
 0x140 PF: > { %s20_s13 = sadd.s32 1, %s1794_s13  }
 0x141   : > { %p17_p4 = scmp.ge.s32.totalorder %s20_s13, 4  }
 0x143   :  { %19 = sbr.rel (!%p17_p4) target bundleno = 1 (0x1), region = 93 }

// kernel: bottleneck_forward.5
= control target key start
LH: loop header
LB: loop body
LE: loop exit
PB: predicated region body
PF: predicated region fallthrough
CT: control target
= control target key end

     0   :  { %s4199_s21 = smov 0   ;;  %s5352_s0 = inlined_call_operand.vmem [shape: bf16[2,16,16,128], index: 0, kind: input, shape index: {}]   ;;  %s5353_s1 = inlined_call_operand.vmem [shape: f32[1,128], index: 1, kind: input, shape index: {}]   ;;  %s5354_s2 = inlined_call_operand.vmem [shape: f32[1,128], index: 2, kind: input, shape index: {}]   ;;  %s5355_s3 = inlined_call_operand.vmem [shape: bf16[3,384,128], index: 3, kind: input, shape index: {}]   ;;  %s5356_s4 = inlined_call_operand.vmem [shape: bf16[2,16,16,128], index: 4, kind: output, shape index: {0}]   ;;  %s5357_s5 = inlined_call_operand.vmem [shape: f32[2,8,128], index: 5, kind: output, shape index: {1}]   ;;  %s5358_s6 = inlined_call_operand.vmem [shape: f32[2,8,128], index: 6, kind: output, shape index: {2}]  }
   0x1 LB: > { %s2923_s22 = sadd.s32 4294967295, %s4161_s21   ;;  %p2927_p0 = scmp.ge.s32.totalorder %s4161_s21, 1  ;;  %s4161_s21 = sphi %s4199_s21, %s17_s21  }
   0x2   : > { %p217_p1 = scmp.lt.s32.totalorder %s4161_s21, 3 }
   0x4   : > { %p218_p2 = pnand %p2927_p0, %p217_p1 }
   0x6   : > { %221 = sbr.rel (%p218_p2) target bundleno = 587 (0x24b), region = 36 }
   0xd   : > { %v4083_v0 = vld [vmem:[%s5355_s3 + $0x100] sm:$0xff]   ;;  %v4086_v3 = vld [vmem:[%s5355_s3 + $0x108] sm:$0xff]   ;;  %v4089_v6 = vld [vmem:[%s5355_s3 + $0x110] sm:$0xff]   ;;  %p255_p3 = scmp.lt.s32.totalorder %s2923_s22, 1  ;;  %vm608_vm0 = vcmask 1040384   ;;  %vm879_vm2 = vcmask 1046528  }
   0xe   : > { %v4213_v1 = vld [vmem:[%s5355_s3 + $0x140] sm:$0xff]   ;;  %3346 = vmatprep.subr.bf16.mxu0 %v4083_v0  ;;  %v4226_v4 = vld [vmem:[%s5355_s3 + $0x148] sm:$0xff]   ;;  %v4238_v7 = vld [vmem:[%s5355_s3 + $0x150] sm:$0xff]   ;;  %vm609_vm1 = vsmask.f32 256 }
   0xf   : > { %v4085_v2 = vld [vmem:[%s5355_s3 + $0xc0] sm:$0xff]   ;;  %3898 = vmatprep.subr.bf16.mxu1 %v4213_v1  ;;  %v4088_v5 = vld [vmem:[%s5355_s3 + $0xc8] sm:$0xff]   ;;  %v4091_v8 = vld [vmem:[%s5355_s3 + $0xd0] sm:$0xff]   ;;  %s5369_s22 = smov (!%p255_p3, %s2923_s22), 1  ;;  %vm643_vm3 = vsmask.f32 7424 }
  0x10   : > { %3347 = vmatpush3.bf16.msra.mxu0 %v4085_v2  ;;  %3906 = vmatpush3.bf16.msra.mxu1 %v4213_v1  ;;  %v4092_v9 = vld [vmem:[%s5355_s3 + $0x118] sm:$0xff]   ;;  %v4095_v12 = vld [vmem:[%s5355_s3 + $0x120] sm:$0xff]   ;;  %v4098_v15 = vld [vmem:[%s5355_s3 + $0x128] sm:$0xff]   ;;  %s3138_s11 = sshll.u32 %s5369_s22, 7 }
  0x11   : > { %3348 = vmatprep.subr.bf16.mxu0 %v4086_v3  ;;  %3899 = vmatprep.subr.bf16.mxu1 %v4226_v4  ;;  %v4251_v10 = vld [vmem:[%s5355_s3 + $0x158] sm:$0xff]   ;;  %v4266_v13 = vld [vmem:[%s5355_s3 + $0x160] sm:$0xff]   ;;  %v4283_v16 = vld [vmem:[%s5355_s3 + $0x168] sm:$0xff]   ;;  %s4304_s20 = scalar_lea.vmem %s5352_s0, %s3138_s11  ;;  %s5277_s30 = scalar_lea.vmem %s5356_s4, %s3138_s11 }
  0x12   : > { %v4094_v11 = vld [vmem:[%s5355_s3 + $0xd8] sm:$0xff]   ;;  %v4097_v14 = vld [vmem:[%s5355_s3 + $0xe0] sm:$0xff]   ;;  %v4100_v17 = vld [vmem:[%s5355_s3 + $0xe8] sm:$0xff]   ;;  %s2932_s11 = sshll.u32 %s5369_s22, 3 }
  0x13   : > { %v4101_v18 = vld [vmem:[%s5355_s3 + $0x130] sm:$0xff]   ;;  %v4104_v21 = vld [vmem:[%s5355_s3 + $0x138] sm:$0xff]   ;;  %v3173_v22 = vld [vmem:[%s4304_s20] sm:$0xff]   ;;  %s268_s8 = scalar_lea.vmem %s5357_s5, %s2932_s11  ;;  %s272_s12 = scalar_lea.vmem %s5358_s6, %s2932_s11 }
  0x14   : > { %3349 = vmatpush3.bf16.msra.mxu0 %v4088_v5  ;;  %3907 = vmatpush3.bf16.msra.mxu1 %v4226_v4  ;;  %v4297_v19 = vld [vmem:[%s5355_s3 + $0x170] sm:$0xff]   ;;  %v4317_v23 = vld [vmem:[%s5353_s1] ss:$0 sm:$0xff]  ;;  %v4323_v24 = vld [vmem:[%s5355_s3 + $0x178] sm:$0xff]   ;;  %v3174_v25 = vunpack.c.l.bf16 %v3173_v22  ;;  %v3175_v26 = vunpack.c.h.bf16 %v3173_v22 }
  0x15   : > { %3350 = vmatprep.subr.bf16.mxu0 %v4089_v6  ;;  %3900 = vmatprep.subr.bf16.mxu1 %v4238_v7  ;;  %v4103_v20 = vld [vmem:[%s5355_s3 + $0xf0] sm:$0xff]   ;;  %v3323_v27 = vld [vmem:[%s4304_s20 + $0x40] sm:$0xff]   ;;  %v3324_v28 = vld [vmem:[%s4304_s20 + $0x48] sm:$0xff]  }
  0x16   : > { %v4330_v29 = vld [vmem:[%s5354_s2] ss:$0 sm:$0xff]  ;;  %v3206_v30 = vunpack.c.l.bf16 %v3323_v27  ;;  %v3207_v31 = vunpack.c.h.bf16 %v3323_v27  ;;  %v3210_v32 = vunpack.c.l.bf16 %v3324_v28  ;;  %v3211_v33 = vunpack.c.h.bf16 %v3324_v28  ;;  %v4106_v36 = vld [vmem:[%s5355_s3 + $0xf8] sm:$0xff]   ;;  %v3316_v47 = vld [vmem:[%s4304_s20 + $0x8] sm:$0xff]  }
  0x17   : > { %v345_v34 = vmul.f32 %v3174_v25, %v4317_v23  ;;  %v346_v35 = vmul.f32 %v3175_v26, %v4317_v23  ;;  %v4107_v43 = vld [vmem:[%s5355_s3 + $0x40] sm:$0xff]   ;;  %v3325_v48 = vld [vmem:[%s4304_s20 + $0x50] sm:$0xff]   ;;  %v3178_v52 = vunpack.c.l.bf16 %v3316_v47  ;;  %v4355_v53 = vld [vmem:[%s4304_s20 + $0x58] sm:$0xff]   ;;  %v3179_v57 = vunpack.c.h.bf16 %v3316_v47 }
  0x18   : > { %3351 = vmatpush3.bf16.msra.mxu0 %v4091_v8  ;;  %3908 = vmatpush3.bf16.msra.mxu1 %v4238_v7  ;;  %v361_v37 = vmul.f32 %v3206_v30, %v4317_v23  ;;  %v362_v38 = vmul.f32 %v3207_v31, %v4317_v23  ;;  %v363_v39 = vmul.f32 %v3210_v32, %v4317_v23  ;;  %v3214_v61 = vunpack.c.l.bf16 %v3325_v48  ;;  %vm4367_vm4 = vmand %vm608_vm0, %vm609_vm1 }
  0x19   : > { %3352 = vmatprep.subr.bf16.mxu0 %v4092_v9  ;;  %3901 = vmatprep.subr.bf16.mxu1 %v4251_v10  ;;  %v384_v40 = vadd.f32 %v4330_v29, %v345_v34  ;;  %v385_v41 = vadd.f32 %v4330_v29, %v346_v35  ;;  %v364_v42 = vmul.f32 %v3211_v33, %v4317_v23  ;;  %v3215_v0 = vunpack.c.h.bf16 %v3325_v48  ;;  %v4108_v48 = vld [vmem:[%s5355_s3] sm:$0xff]  }
  0x1a   : > { %v400_v44 = vadd.f32 %v4330_v29, %v361_v37  ;;  %v401_v45 = vadd.f32 %v4330_v29, %v362_v38  ;;  %v402_v46 = vadd.f32 %v4330_v29, %v363_v39  ;;  %v347_v60 = vmul.f32 %v3178_v52, %v4317_v23 }
  0x1b   : > { %v416_v49 = vmax.f32 %v384_v40, 0.0  ;;  %v417_v50 = vmax.f32 %v385_v41, 0.0  ;;  %v403_v51 = vadd.f32 %v4330_v29, %v364_v42  ;;  %v348_v63 = vmul.f32 %v3179_v57, %v4317_v23 }
  0x1c   : > { %3353 = vmatpush3.bf16.msra.mxu0 %v4094_v11  ;;  %3909 = vmatpush3.bf16.msra.mxu1 %v4251_v10  ;;  %v432_v54 = vmax.f32 %v400_v44, 0.0  ;;  %v433_v55 = vmax.f32 %v401_v45, 0.0  ;;  %v434_v56 = vmax.f32 %v402_v46, 0.0  ;;  %v3218_v2 = vunpack.c.l.bf16 %v4355_v53 }
  0x1d   : > { %3354 = vmatprep.subr.bf16.mxu0 %v4095_v12  ;;  %3902 = vmatprep.subr.bf16.mxu1 %v4266_v13  ;;  %v448_v58 = vpack.c.bf16 %v417_v50, %v416_v49  ;;  %v435_v59 = vmax.f32 %v403_v51, 0.0  ;;  %v386_v8 = vadd.f32 %v4330_v29, %v347_v60  ;;  %v387_v12 = vadd.f32 %v4330_v29, %v348_v63  ;;  %v4109_v49 = vld [vmem:[%s5355_s3 + $0x48] sm:$0xff]  }
  0x1e   : > { %v456_v62 = vpack.c.bf16 %v433_v55, %v432_v54  ;;  %v366_v26 = vmul.f32 %v3215_v0, %v4317_v23  ;;  %v3219_v32 = vunpack.c.h.bf16 %v4355_v53  ;;  %v3317_v55 = vld [vmem:[%s4304_s20 + $0x10] sm:$0xff]   ;;  %v4110_v0 = vld [vmem:[%s5355_s3 + $0x8] sm:$0xff]  }
  0x1f   : > { %v465_v3 = vshrl.u32 %v448_v58, 16  ;;  %v468_v5 = vshll.u32 %v448_v58, 16  ;;  %v457_v6 = vpack.c.bf16 %v435_v59, %v434_v56  ;;  %v419_v25 = vmax.f32 %v387_v12, 0.0  ;;  %v4111_v12 = vld [vmem:[%s5355_s3 + $0x50] sm:$0xff]  }
  0x20   : > { %3355 = vmatpush3.bf16.msra.mxu0 %v4097_v14  ;;  %3910 = vmatpush3.bf16.msra.mxu1 %v4266_v13  ;;  %v521_v9 = vshrl.u32 %v456_v62, 16  ;;  %v524_v11 = vshll.u32 %v456_v62, 16  ;;  %v365_v14 = vmul.f32 %v3214_v61, %v4317_v23  ;;  %v405_v54 = vadd.f32 %v4330_v29, %v366_v26 }
  0x21   : > { %3356 = vmatprep.subr.bf16.mxu0 %v4098_v15  ;;  %3903 = vmatprep.subr.bf16.mxu1 %v4283_v16  ;;  %v467_v15 = vrot.slane %v465_v3, 7  ;;  %v367_v59 = vmul.f32 %v3218_v2, %v4317_v23  ;;  %v368_v63 = vmul.f32 %v3219_v32, %v4317_v23  ;;  %v4452_v32 = vld [vmem:[%s4304_s20 + $0x68] sm:$0xff]  }
  0x22   : > { %v523_v22 = vrot.slane %v521_v9, 7  ;;  %v404_v27 = vadd.f32 %v4330_v29, %v365_v14  ;;  %v437_v62 = vmax.f32 %v405_v54, 0.0  ;;  %v3327_v14 = vld [vmem:[%s4304_s20 + $0x60] sm:$0xff]  }
  0x23   : > { %v470_v28 = vor.u32 %v468_v5, %v467_v15  ;;  %v4375_v30 = vsel %vm4367_vm4, %v467_v15, 0  ;;  %v406_v5 = vadd.f32 %v4330_v29, %v367_v59  ;;  %v5359_v15 = vmov 0  }
  0x24   : > { %3357 = vmatpush3.bf16.msra.mxu0 %v4100_v17  ;;  %3911 = vmatpush3.bf16.msra.mxu1 %v4283_v16  ;;  %v528_v17 = vshrl.u32 %v457_v6, 16  ;;  %v660_v33 = vshll.u32 %v4375_v30, 16  ;;  %v526_v34 = vor.u32 %v524_v11, %v523_v22  ;;  %v4381_v35 = vsel %vm4367_vm4, %v523_v22, 0 }
  0x25   : > { %3358 = vmatprep.subr.bf16.mxu0 %v4101_v18  ;;  %3904 = vmatprep.subr.bf16.mxu1 %v4297_v19  ;;  %v531_v18 = vshll.u32 %v457_v6, 16  ;;  %v4385_v37 = vsel %vm4367_vm4, 0, %v470_v28  ;;  %v907_v38 = vrot.slane %v4381_v35, 1  ;;  %v436_v58 = vmax.f32 %v404_v27, 0.0 }
  0x26   : > { %v530_v31 = vrot.slane %v528_v17, 7  ;;  %v653_v41 = vshrl.u32 %v4385_v37, 16  ;;  %v655_v42 = vshll.u32 %v4385_v37, 16  ;;  %v4396_v44 = vsel %vm4367_vm4, 0, %v526_v34 }
  0x27   : > { %v906_v45 = vrot.slane %v4396_v44, 1  ;;  %v3182_v6 = vunpack.c.l.bf16 %v3317_v55  ;;  %v458_v11 = vpack.c.bf16 %v437_v62, %v436_v58  ;;  %v4440_v17 = vrot.slane %v5359_v15, 1 }
  0x28   : > { %3359 = vmatpush3.bf16.msra.mxu0 %v4103_v20  ;;  %3912 = vmatpush3.bf16.msra.mxu1 %v4297_v19  ;;  %v418_v20 = vmax.f32 %v386_v8, 0.0  ;;  %v533_v39 = vor.u32 %v531_v18, %v530_v31  ;;  %v4390_v40 = vsel %vm4367_vm4, %v530_v31, 0  ;;  %v657_v51 = vrot.slane %v655_v42, 1  ;;  %v4112_v42 = vld [vmem:[%s5355_s3 + $0x10] sm:$0xff]  }
  0x29   : > { %3360 = vmatprep.subr.bf16.mxu0 %v4104_v21  ;;  %3905 = vmatprep.subr.bf16.mxu1 %v4323_v24  ;;  %v910_v47 = vrot.slane %v4390_v40, 1  ;;  %v4414_v56 = vsel %vm879_vm2, %v906_v45, %v907_v38  ;;  %v438_v22 = vmax.f32 %v406_v5, 0.0  ;;  %v535_v31 = vshrl.u32 %v458_v11, 16 }
  0x2a   : > { %v4401_v46 = vsel %vm4367_vm4, 0, %v533_v39  ;;  %v658_v60 = vor.u32 %v657_v51, %v653_v41  ;;  %3786 = vmatprep.mubr.bf16.mxu1 %v4414_v56  ;;  %v3222_v45 = vunpack.c.l.bf16 %v3327_v14 }
  0x2b   : > { %v909_v52 = vrot.slane %v4401_v46, 1  ;;  %v537_v41 = vrot.slane %v535_v31, 7 }
  0x2c   : > { %3361 = vmatpush3.bf16.msra.mxu0 %v4106_v36  ;;  %3913 = vmatpush3.bf16.msra.mxu1 %v4323_v24  ;;  %v449_v36 = vpack.c.bf16 %v419_v25, %v418_v20  ;;  %v407_v20 = vadd.f32 %v4330_v29, %v368_v63  ;;  %v3183_v25 = vunpack.c.h.bf16 %v3317_v55  ;;  %v369_v54 = vmul.f32 %v3222_v45, %v4317_v23  ;;  %v3318_v55 = vld [vmem:[%s4304_s20 + $0x18] sm:$0xff]  }
  0x2d   : > { %3754 = vmatprep.subr.bf16.mxu0 %v4213_v1  ;;  %3482 = vmatprep.subr.bf16.mxu1 %v4107_v43  ;;  %v662_v43 = vrot.slane %v660_v33, 1  ;;  %v4419_v61 = vsel %vm879_vm2, %v909_v52, %v910_v47  ;;  %v538_v33 = vshll.u32 %v458_v11, 16  ;;  %v3187_v45 = vunpack.c.h.bf16 %v3318_v55 }
  0x2e   : > { %v472_v50 = vshrl.u32 %v449_v36, 16  ;;  %v475_v53 = vshll.u32 %v449_v36, 16  ;;  %v439_v34 = vmax.f32 %v407_v20, 0.0  ;;  %v349_v36 = vmul.f32 %v3182_v6, %v4317_v23 }
  0x2f   : > { %3787 = vmatmul.mubr.bf16.vlgmr.msra.gmra.mrb[0].mxu1 %v4419_v61  ;;  %v4432_v8 = vsel %vm643_vm3, %v658_v60, %v662_v43  ;;  %v350_v38 = vmul.f32 %v3183_v25, %v4317_v23  ;;  %v4113_v43 = vld [vmem:[%s5355_s3 + $0x58] sm:$0xff]   ;;  %v540_v52 = vor.u32 %v538_v33, %v537_v41  ;;  %v408_v11 = vadd.f32 %v4330_v29, %v369_v54  ;;  %v4116_v25 = vld [vmem:[%s5355_s3 + $0x20] sm:$0xff]  }
  0x30   : > { %v474_v57 = vrot.slane %v472_v50, 7  ;;  %3483 = vmatpush3.bf16.msra.mxu1 %v4108_v48  ;;  %1235 = vmatprep.mubr.bf16.mxu0 %v4432_v8  ;;  %v459_v47 = vpack.c.bf16 %v439_v34, %v438_v22  ;;  %v388_v48 = vadd.f32 %v4330_v29, %v349_v36  ;;  %v3226_v50 = vunpack.c.l.bf16 %v4452_v32 }
  0x31   : > { %3484 = vmatprep.subr.bf16.mxu1 %v4109_v49  ;;  %1236 = vmatmul.mubr.bf16.vlgmr.msra.gmra.mrb[0].mxu0 %v4385_v37  ;;  %v389_v49 = vadd.f32 %v4330_v29, %v350_v38  ;;  %v4480_v63 = vsel %vm4367_vm4, 0, %v540_v52  ;;  %v440_v33 = vmax.f32 %v408_v11, 0.0  ;;  %v4118_v52 = vld [vmem:[%s5355_s3 + $0x28] sm:$0xff]   ;;  %v352_v54 = vmul.f32 %v3187_v45, %v4317_v23 }
  0x32   : > { %v477_v3 = vor.u32 %v475_v53, %v474_v57  ;;  %v4428_v2 = vsel %vm4367_vm4, %v474_v57, 0  ;;  %3755 = vmatpush3.bf16.msra.mxu0 %v4213_v1  ;;  %v3223_v1 = vunpack.c.h.bf16 %v3327_v14  ;;  %v4469_v53 = vsel %vm4367_vm4, %v537_v41, 0 }
  0x33   : > { %v672_v9 = vshll.u32 %v4428_v2, 16  ;;  %3756 = vmatprep.subr.bf16.mxu0 %v4226_v4  ;;  %v913_v57 = vrot.slane %v4469_v53, 1  ;;  %v542_v58 = vshrl.u32 %v459_v47, 16  ;;  %v545_v59 = vshll.u32 %v459_v47, 16 }
  0x34   : > { %v4445_v18 = vsel %vm4367_vm4, 0, %v477_v3  ;;  %3485 = vmatpush3.bf16.msra.mxu1 %v4110_v0  ;;  %v420_v60 = vmax.f32 %v388_v48, 0.0  ;;  %v4114_v0 = vld [vmem:[%s5355_s3 + $0x18] sm:$0xff]   ;;  %v421_v3 = vmax.f32 %v389_v49, 0.0  ;;  %v370_v5 = vmul.f32 %v3223_v1, %v4317_v23 }
  0x35   : > { %v665_v26 = vshrl.u32 %v4445_v18, 16  ;;  %v667_v27 = vshll.u32 %v4445_v18, 16  ;;  %v674_v28 = vrot.slane %v672_v9, 1  ;;  %3486 = vmatprep.subr.bf16.mxu1 %v4111_v12  ;;  %v912_v6 = vrot.slane %v4480_v63, 1 }
  0x36   : > { %3757 = vmatpush3.bf16.msra.mxu0 %v4226_v4  ;;  %v4115_v4 = vld [vmem:[%s5355_s3 + $0x60] sm:$0xff]   ;;  %v544_v9 = vrot.slane %v542_v58, 7  ;;  %v3227_v12 = vunpack.c.h.bf16 %v4452_v32  ;;  %v450_v14 = vpack.c.bf16 %v421_v3, %v420_v60  ;;  %v409_v20 = vadd.f32 %v4330_v29, %v370_v5 }
  0x37   : > { %v669_v39 = vrot.slane %v667_v27, 1  ;;  %3758 = vmatprep.subr.bf16.mxu0 %v4238_v7  ;;  %v371_v22 = vmul.f32 %v3226_v50, %v4317_v23  ;;  %v4501_v27 = vld [vmem:[%s4304_s20 + $0x70] sm:$0xff]   ;;  %v391_v11 = vadd.f32 %v4330_v29, %v352_v54 }
  0x38   : > { %3487 = vmatpush3.bf16.msra.mxu1 %v4112_v42  ;;  %v547_v31 = vor.u32 %v545_v59, %v544_v9  ;;  %v4508_v32 = vsel %vm4367_vm4, %v544_v9, 0  ;;  %v479_v36 = vshrl.u32 %v450_v14, 16  ;;  %v482_v38 = vshll.u32 %v450_v14, 16 }
  0x39   : > { %v670_v51 = vor.u32 %v669_v39, %v665_v26  ;;  %3488 = vmatprep.subr.bf16.mxu1 %v4113_v43  ;;  %v3186_v26 = vunpack.c.l.bf16 %v3318_v55  ;;  %v916_v34 = vrot.slane %v4508_v32, 1  ;;  %v441_v39 = vmax.f32 %v409_v20, 0.0 }
  0x3a   : > { %3759 = vmatpush3.bf16.msra.mxu0 %v4238_v7  ;;  %v4515_v41 = vsel %vm4367_vm4, 0, %v547_v31  ;;  %v372_v42 = vmul.f32 %v3227_v12, %v4317_v23  ;;  %v410_v43 = vadd.f32 %v4330_v29, %v371_v22  ;;  %v4117_v7 = vld [vmem:[%s5355_s3 + $0x68] sm:$0xff]   ;;  %v481_v47 = vrot.slane %v479_v36, 7 }
  0x3b   : > { %v4476_v62 = vsel %vm643_vm3, %v670_v51, %v674_v28  ;;  %v4504_v28 = vsel %vm879_vm2, %v912_v6, %v913_v57  ;;  %3760 = vmatprep.subr.bf16.mxu0 %v4251_v10  ;;  %v915_v1 = vrot.slane %v4515_v41, 1  ;;  %v460_v48 = vpack.c.bf16 %v441_v39, %v440_v33 }
  0x3c   : > { %1243 = vmatprep.mubr.bf16.mxu0 %v4476_v62  ;;  %3790 = vmatprep.mubr.bf16.mxu1 %v4504_v28  ;;  %v351_v49 = vmul.f32 %v3186_v26, %v4317_v23  ;;  %v411_v50 = vadd.f32 %v4330_v29, %v372_v42  ;;  %v442_v51 = vmax.f32 %v410_v43, 0.0  ;;  %v3230_v57 = vunpack.c.l.bf16 %v4501_v27  ;;  %v3330_v26 = vld [vmem:[%s4304_s20 + $0x78] sm:$0xff]  }
  0x3d   : > { %1244 = vmatmul.mubr.bf16.gmra.mrb[4].mxu0 %v4445_v18  ;;  %3489 = vmatpush3.bf16.msra.mxu1 %v4114_v0  ;;  %v4533_v55 = vsel %vm879_vm2, %v915_v1, %v916_v34  ;;  %v484_v58 = vor.u32 %v482_v38, %v481_v47  ;;  %v4537_v59 = vsel %vm4367_vm4, %v481_v47, 0  ;;  %v549_v60 = vshrl.u32 %v460_v48, 16 }
  0x3e   : > { %3490 = vmatprep.subr.bf16.mxu1 %v4115_v4  ;;  %3761 = vmatpush3.bf16.msra.mxu0 %v4251_v10  ;;  %v684_v0 = vshll.u32 %v4537_v59, 16  ;;  %v552_v3 = vshll.u32 %v460_v48, 16  ;;  %v443_v5 = vmax.f32 %v411_v50, 0.0  ;;  %v390_v10 = vadd.f32 %v4330_v29, %v351_v49  ;;  %v4119_v4 = vld [vmem:[%s5355_s3 + $0x70] sm:$0xff]  }
  0x3f   : > { %3762 = vmatprep.subr.bf16.mxu0 %v4266_v13  ;;  %3791 = vmatmul.mubr.bf16.gmra.mrb[4].mxu1 %v4533_v55  ;;  %v4548_v6 = vsel %vm4367_vm4, 0, %v484_v58  ;;  %v551_v9 = vrot.slane %v549_v60, 7  ;;  %v3231_v12 = vunpack.c.h.bf16 %v4501_v27  ;;  %v423_v36 = vmax.f32 %v391_v11, 0.0  ;;  %v4120_v27 = vld [vmem:[%s5355_s3 + $0x30] sm:$0xff]  }
  0x40   : > { %v677_v14 = vshrl.u32 %v4548_v6, 16  ;;  %v679_v20 = vshll.u32 %v4548_v6, 16  ;;  %v686_v22 = vrot.slane %v684_v0, 1  ;;  %v422_v34 = vmax.f32 %v390_v10, 0.0  ;;  %v3319_v0 = vld [vmem:[%s4304_s20 + $0x20] sm:$0xff]  }
  0x41   : > { %3491 = vmatpush3.bf16.msra.mxu1 %v4116_v25  ;;  %v461_v25 = vpack.c.bf16 %v443_v5, %v442_v51  ;;  %v554_v31 = vor.u32 %v552_v3, %v551_v9  ;;  %v4558_v33 = vsel %vm4367_vm4, %v551_v9, 0  ;;  %v373_v1 = vmul.f32 %v3230_v57, %v4317_v23  ;;  %v4122_v57 = vld [vmem:[%s5355_s3 + $0x38] sm:$0xff]  }
  0x42   : > { %3492 = vmatprep.subr.bf16.mxu1 %v4117_v7  ;;  %3763 = vmatpush3.bf16.msra.mxu0 %v4266_v13  ;;  %v681_v38 = vrot.slane %v679_v20, 1  ;;  %v919_v39 = vrot.slane %v4558_v33, 1  ;;  %v4121_v13 = vld [vmem:[%s5355_s3 + $0x78] sm:$0xff]   ;;  %v451_v45 = vpack.c.bf16 %v423_v36, %v422_v34  ;;  %v374_v47 = vmul.f32 %v3231_v12, %v4317_v23 }
  0x43   : > { %3764 = vmatprep.subr.bf16.mxu0 %v4283_v16  ;;  %v556_v42 = vshrl.u32 %v461_v25, 16  ;;  %v559_v43 = vshll.u32 %v461_v25, 16  ;;  %v4570_v7 = vsel %vm4367_vm4, 0, %v554_v31  ;;  %v3234_v51 = vunpack.c.l.bf16 %v3330_v26 }
  0x44   : > { %v682_v48 = vor.u32 %v681_v38, %v677_v14  ;;  %v918_v49 = vrot.slane %v4570_v7, 1  ;;  %v489_v54 = vshll.u32 %v451_v45, 16  ;;  %v412_v58 = vadd.f32 %v4330_v29, %v373_v1 }
  0x45   : > { %3493 = vmatpush3.bf16.msra.mxu1 %v4118_v52  ;;  %v558_v50 = vrot.slane %v556_v42, 7  ;;  %v486_v52 = vshrl.u32 %v451_v45, 16  ;;  %v413_v60 = vadd.f32 %v4330_v29, %v374_v47  ;;  %v375_v25 = vmul.f32 %v3234_v51, %v4317_v23 }
  0x46   : > { %3494 = vmatprep.subr.bf16.mxu1 %v4119_v4  ;;  %3765 = vmatpush3.bf16.msra.mxu0 %v4283_v16  ;;  %v4584_v3 = vsel %vm643_vm3, %v682_v48, %v686_v22  ;;  %v4587_v5 = vsel %vm879_vm2, %v918_v49, %v919_v39  ;;  %v4596_v4 = vld [vmem:[%s5355_s3 + $0x80] sm:$0xff]   ;;  %v444_v12 = vmax.f32 %v412_v58, 0.0  ;;  %v3235_v22 = vunpack.c.h.bf16 %v3330_v26  ;;  %v3320_v48 = vld [vmem:[%s4304_s20 + $0x28] sm:$0xff]  }
  0x47   : > { %3766 = vmatprep.subr.bf16.mxu0 %v4297_v19  ;;  %v561_v16 = vor.u32 %v559_v43, %v558_v50  ;;  %v4591_v10 = vsel %vm4367_vm4, %v558_v50, 0  ;;  %1251 = vmatprep.mubr.bf16.mxu0 %v4584_v3  ;;  %v488_v11 = vrot.slane %v486_v52, 7  ;;  %v445_v14 = vmax.f32 %v413_v60, 0.0 }
  0x48   : > { %3794 = vmatprep.mubr.bf16.mxu1 %v4587_v5  ;;  %v922_v9 = vrot.slane %v4591_v10, 1  ;;  %1252 = vmatmul.mubr.bf16.gmra.mrb[8].mxu0 %v4548_v6  ;;  %v3190_v31 = vunpack.c.l.bf16 %v3319_v0  ;;  %v376_v42 = vmul.f32 %v3235_v22, %v4317_v23  ;;  %v414_v26 = vadd.f32 %v4330_v29, %v375_v25 }
  0x49   : > { %3495 = vmatpush3.bf16.msra.mxu1 %v4120_v27  ;;  %v4604_v20 = vsel %vm4367_vm4, 0, %v561_v16  ;;  %v491_v36 = vor.u32 %v489_v54, %v488_v11  ;;  %v4610_v27 = vsel %vm4367_vm4, %v488_v11, 0  ;;  %v462_v38 = vpack.c.bf16 %v445_v14, %v444_v12 }
  0x4a   : > { %3496 = vmatprep.subr.bf16.mxu1 %v4121_v13  ;;  %v921_v34 = vrot.slane %v4604_v20, 1  ;;  %3767 = vmatpush3.bf16.msra.mxu0 %v4297_v19  ;;  %v696_v39 = vshll.u32 %v4610_v27, 16  ;;  %v3191_v43 = vunpack.c.h.bf16 %v3319_v0  ;;  %v4130_v13 = vld [vmem:[%s5355_s3 + $0x1c0] sm:$0xff]   ;;  %v415_v52 = vadd.f32 %v4330_v29, %v376_v42 }
  0x4b   : > { %3768 = vmatprep.subr.bf16.mxu0 %v4323_v24  ;;  %v4626_v19 = vsel %vm4367_vm4, 0, %v491_v36  ;;  %v563_v1 = vshrl.u32 %v462_v38, 16  ;;  %v566_v47 = vshll.u32 %v462_v38, 16  ;;  %v446_v58 = vmax.f32 %v414_v26, 0.0  ;;  %v3321_v38 = vld [vmem:[%s4304_s20 + $0x30] sm:$0xff]  }
  0x4c   : > { %v4622_v45 = vsel %vm879_vm2, %v921_v34, %v922_v9  ;;  %v689_v49 = vshrl.u32 %v4626_v19, 16  ;;  %v691_v50 = vshll.u32 %v4626_v19, 16  ;;  %v698_v51 = vrot.slane %v696_v39, 1 }
  0x4d   : > { %3497 = vmatpush3.bf16.msra.mxu1 %v4122_v57  ;;  %v565_v54 = vrot.slane %v563_v1, 7  ;;  %v353_v60 = vmul.f32 %v3190_v31, %v4317_v23  ;;  %v354_v57 = vmul.f32 %v3191_v43, %v4317_v23  ;;  %v447_v16 = vmax.f32 %v415_v52, 0.0 }
  0x4e   : > { %3802 = vmatprep.subr.bf16.mxu1 %v4596_v4  ;;  %3795 = vmatmul.mubr.bf16.gmra.mrb[8].mxu1 %v4622_v45  ;;  %v693_v0 = vrot.slane %v691_v50, 1  ;;  %v3194_v9 = vunpack.c.l.bf16 %v3320_v48  ;;  %v3195_v11 = vunpack.c.h.bf16 %v3320_v48 }
  0x4f   : > { %3769 = vmatpush3.bf16.msra.mxu0 %v4323_v24  ;;  %v568_v12 = vor.u32 %v566_v47, %v565_v54  ;;  %v4638_v14 = vsel %vm4367_vm4, %v565_v54, 0  ;;  %v392_v22 = vadd.f32 %v4330_v29, %v353_v60  ;;  %v393_v25 = vadd.f32 %v4330_v29, %v354_v57 }
  0x50   : > { %3618 = vmatprep.subr.bf16.mxu0 %v4130_v13  ;;  %v694_v31 = vor.u32 %v693_v0, %v689_v49  ;;  %v925_v34 = vrot.slane %v4638_v14, 1  ;;  %v463_v36 = vpack.c.bf16 %v447_v16, %v446_v58  ;;  %v355_v24 = vmul.f32 %v3194_v9, %v4317_v23  ;;  %v3322_v13 = vld [vmem:[%s4304_s20 + $0x38] sm:$0xff]  }
  0x51   : > { %v4647_v39 = vsel %vm4367_vm4, 0, %v568_v12  ;;  %v424_v42 = vmax.f32 %v392_v22, 0.0  ;;  %v425_v26 = vmax.f32 %v393_v25, 0.0  ;;  %v356_v43 = vmul.f32 %v3195_v11, %v4317_v23 }
  0x52   : > { %v4652_v1 = vsel %vm643_vm3, %v694_v31, %v698_v51  ;;  %v924_v47 = vrot.slane %v4647_v39, 1  ;;  %v570_v48 = vshrl.u32 %v463_v36, 16  ;;  %v573_v49 = vshll.u32 %v463_v36, 16 }
  0x53   : > { %1259 = vmatprep.mubr.bf16.mxu0 %v4652_v1  ;;  %v452_v50 = vpack.c.bf16 %v425_v26, %v424_v42  ;;  %v394_v52 = vadd.f32 %v4330_v29, %v355_v24  ;;  %v395_v54 = vadd.f32 %v4330_v29, %v356_v43  ;;  %v3198_v58 = vunpack.c.l.bf16 %v3321_v38 }
  0x54   : > { %v4659_v60 = vsel %vm879_vm2, %v924_v47, %v925_v34  ;;  %1260 = vmatmul.mubr.bf16.gmra.mrb[12].mxu0 %v4626_v19  ;;  %v572_v57 = vrot.slane %v570_v48, 7  ;;  %v3199_v51 = vunpack.c.h.bf16 %v3321_v38  ;;  %v3202_v0 = vunpack.c.l.bf16 %v3322_v13 }
  0x55   : > { %3798 = vmatprep.mubr.bf16.mxu1 %v4659_v60  ;;  %v493_v16 = vshrl.u32 %v452_v50, 16  ;;  %v496_v9 = vshll.u32 %v452_v50, 16  ;;  %v426_v11 = vmax.f32 %v394_v52, 0.0  ;;  %v427_v12 = vmax.f32 %v395_v54, 0.0 }
  0x56   : > { %v575_v22 = vor.u32 %v573_v49, %v572_v57  ;;  %v4665_v25 = vsel %vm4367_vm4, %v572_v57, 0  ;;  %v357_v31 = vmul.f32 %v3198_v58, %v4317_v23  ;;  %v358_v34 = vmul.f32 %v3199_v51, %v4317_v23 }
  0x57   : > { %v1007_v36 = vrot.slane %v4665_v25, 1  ;;  %v495_v24 = vrot.slane %v493_v16, 7  ;;  %v453_v38 = vpack.c.bf16 %v427_v12, %v426_v11  ;;  %v3203_v42 = vunpack.c.h.bf16 %v3322_v13 }
  0x58   : > { %v4672_v26 = vsel %vm4367_vm4, 0, %v575_v22  ;;  %v396_v43 = vadd.f32 %v4330_v29, %v357_v31  ;;  %v397_v47 = vadd.f32 %v4330_v29, %v358_v34  ;;  %v359_v48 = vmul.f32 %v3202_v0, %v4317_v23 }
  0x59   : > { %v1006_v49 = vrot.slane %v4672_v26, 1  ;;  %v498_v50 = vor.u32 %v496_v9, %v495_v24  ;;  %v4680_v52 = vsel %vm4367_vm4, %v495_v24, 0  ;;  %v500_v54 = vshrl.u32 %v453_v38, 16 }
  0x5a   : > { %v708_v13 = vshll.u32 %v4680_v52, 16  ;;  %v503_v58 = vshll.u32 %v453_v38, 16  ;;  %v428_v57 = vmax.f32 %v396_v43, 0.0  ;;  %v429_v51 = vmax.f32 %v397_v47, 0.0 }
  0x5b   : > { %v4684_v16 = vsel %vm879_vm2, %v1006_v49, %v1007_v36  ;;  %v4688_v11 = vsel %vm4367_vm4, 0, %v498_v50  ;;  %v502_v0 = vrot.slane %v500_v54, 7  ;;  %v360_v9 = vmul.f32 %v3203_v42, %v4317_v23 }
  0x5c   : > { %3799 = vmatmul.mubr.bf16.gmra.mrb[12].mxu1 %v4684_v16  ;;  %v701_v12 = vshrl.u32 %v4688_v11, 16  ;;  %v703_v22 = vshll.u32 %v4688_v11, 16  ;;  %v454_v31 = vpack.c.bf16 %v429_v51, %v428_v57  ;;  %v398_v24 = vadd.f32 %v4330_v29, %v359_v48 }
  0x5d   : > { %1701 = vmatprep.mubr.bf16.mxu1 %v4440_v17  ;;  %v505_v34 = vor.u32 %v503_v58, %v502_v0  ;;  %v4697_v36 = vsel %vm4367_vm4, %v502_v0, 0  ;;  %v399_v38 = vadd.f32 %v4330_v29, %v360_v9  ;;  %v710_v23 = vrot.slane %v708_v13, 1 }
  0x5e   : > { %v705_v43 = vrot.slane %v703_v22, 1  ;;  %v720_v42 = vshll.u32 %v4697_v36, 16  ;;  %v507_v47 = vshrl.u32 %v454_v31, 16  ;;  %v510_v50 = vshll.u32 %v454_v31, 16  ;;  %v4124_v22 = vld [vmem:[%s5355_s3 + $0x88] sm:$0xff]  }
  0x5f   : > { %v4704_v49 = vsel %vm4367_vm4, 0, %v505_v34  ;;  %v430_v54 = vmax.f32 %v398_v24, 0.0  ;;  %v431_v58 = vmax.f32 %v399_v38, 0.0  ;;  %v5363_v38 = vmov 0  }
  0x60   : > { %v706_v57 = vor.u32 %v705_v43, %v701_v12  ;;  %v713_v51 = vshrl.u32 %v4704_v49, 16  ;;  %v715_v0 = vshll.u32 %v4704_v49, 16  ;;  %v509_v48 = vrot.slane %v507_v47, 7 }
  0x61   : > { %v455_v15 = vpack.c.bf16 %v431_v58, %v430_v54  ;;  %v722_v9 = vrot.slane %v720_v42, 1  ;;  %v4125_v58 = vld [vmem:[%s5355_s3 + $0x90] sm:$0xff]  }
  0x62   : > { %v4709_v29 = vsel %vm643_vm3, %v706_v57, %v710_v23  ;;  %v717_v13 = vrot.slane %v715_v0, 1  ;;  %v512_v31 = vor.u32 %v510_v50, %v509_v48  ;;  %v4717_v12 = vsel %vm4367_vm4, %v509_v48, 0 }
  0x63   : > { %1267 = vmatprep.mubr.bf16.mxu0 %v4709_v29  ;;  %v514_v34 = vshrl.u32 %v455_v15, 16  ;;  %v517_v24 = vshll.u32 %v455_v15, 16  ;;  %v732_v23 = vshll.u32 %v4717_v12, 16 }
  0x64   : > { %1268 = vmatmul.mubr.bf16.gmra.mrb[16].mxu0 %v4688_v11  ;;  %1702 = vmatmul.mubr.bf16.vlgmr.msra.gmra.mrb[16].mxu1 %v5363_v38  ;;  %v718_v43 = vor.u32 %v717_v13, %v713_v51  ;;  %v4726_v42 = vsel %vm4367_vm4, 0, %v512_v31 }
  0x65   : > { %3803 = vmatpush3.bf16.msra.mxu1 %v4596_v4  ;;  %1709 = vmatprep.mubr.bf16.mxu1 %v4432_v8  ;;  %v516_v47 = vrot.slane %v514_v34, 7  ;;  %v725_v15 = vshrl.u32 %v4726_v42, 16  ;;  %v727_v54 = vshll.u32 %v4726_v42, 16  ;;  %v734_v51 = vrot.slane %v732_v23, 1  ;;  %v4126_v34 = vld [vmem:[%s5355_s3 + $0x98] sm:$0xff]  }
  0x66   : > { %v4729_v50 = vsel %vm643_vm3, %v718_v43, %v722_v9  ;;  %3804 = vmatprep.subr.bf16.mxu1 %v4124_v22  ;;  %v751_v23 = vshll.u32 %v4396_v44, 16 }
  0x67   : > { %1275 = vmatprep.mubr.bf16.mxu0 %v4729_v50  ;;  %v519_v8 = vor.u32 %v517_v24, %v516_v47  ;;  %v4739_v4 = vsel %vm4367_vm4, %v516_v47, 0  ;;  %v729_v57 = vrot.slane %v727_v54, 1  ;;  %v4127_v47 = vld [vmem:[%s5355_s3 + $0xa0] sm:$0xff]   ;;  %v749_v54 = vshrl.u32 %v4396_v44, 16 }
  0x68   : > { %v744_v31 = vshll.u32 %v4739_v4, 16 }
  0x69   : > { %3805 = vmatpush3.bf16.msra.mxu1 %v4124_v22  ;;  %v4743_v0 = vsel %vm4367_vm4, 0, %v519_v8  ;;  %v730_v48 = vor.u32 %v729_v57, %v725_v15  ;;  %v753_v8 = vrot.slane %v751_v23, 1  ;;  %v756_v57 = vshll.u32 %v4381_v35, 16  ;;  %v4129_v35 = vld [vmem:[%s5355_s3 + $0xb0] sm:$0xff]  }
  0x6a   : > { %v737_v13 = vshrl.u32 %v4743_v0, 16  ;;  %v739_v9 = vshll.u32 %v4743_v0, 16  ;;  %3806 = vmatprep.subr.bf16.mxu1 %v4125_v58  ;;  %v746_v43 = vrot.slane %v744_v31, 1  ;;  %v761_v31 = vshrl.u32 %v4401_v46, 16 }
  0x6b   : > { %v4754_v21 = vsel %vm643_vm3, %v730_v48, %v734_v51  ;;  %v4128_v51 = vld [vmem:[%s5355_s3 + $0xa8] sm:$0xff]   ;;  %v758_v48 = vrot.slane %v756_v57, 1 }
  0x6c   : > { %1276 = vmatmul.mubr.bf16.gmra.mrb[20].mxu0 %v4704_v49  ;;  %1710 = vmatmul.mubr.bf16.gmra.mrb[20].mxu1 %v4385_v37  ;;  %v741_v22 = vrot.slane %v739_v9, 1 }
  0x6d   : > { %1283 = vmatprep.mubr.bf16.mxu0 %v4754_v21  ;;  %1717 = vmatprep.mubr.bf16.mxu1 %v4476_v62 }
  0x6e   : > { %v742_v24 = vor.u32 %v741_v22, %v737_v13  ;;  %3807 = vmatpush3.bf16.msra.mxu1 %v4125_v58  ;;  %v754_v58 = vor.u32 %v753_v8, %v749_v54  ;;  %v763_v13 = vshll.u32 %v4401_v46, 16  ;;  %v768_v22 = vshll.u32 %v4390_v40, 16  ;;  %v4794_v40 = vld [vmem:[%s5355_s3 + $0x200] sm:$0xff]  }
  0x6f   : > { %3808 = vmatprep.subr.bf16.mxu1 %v4126_v34  ;;  %v773_v8 = vshrl.u32 %v4480_v63, 16 }
  0x70   : > { %v4763_v15 = vsel %vm643_vm3, %v742_v24, %v746_v43  ;;  %v4779_v9 = vsel %vm643_vm3, %v754_v58, %v758_v48  ;;  %v4138_v24 = vld [vmem:[%s5355_s3 + $0xb8] sm:$0xff]   ;;  %v770_v23 = vrot.slane %v768_v22, 1 }
  0x72   : > { %3809 = vmatpush3.bf16.msra.mxu1 %v4126_v34  ;;  %v765_v34 = vrot.slane %v763_v13, 1  ;;  %v787_v13 = vshll.u32 %v4515_v41, 16 }
  0x73   : > { %3810 = vmatprep.subr.bf16.mxu1 %v4127_v47 }
  0x74   : > { %1284 = vmatmul.mubr.bf16.gmra.mrb[24].mxu0 %v4726_v42  ;;  %1718 = vmatmul.mubr.bf16.gmra.mrb[24].mxu1 %v4445_v18  ;;  %v766_v43 = vor.u32 %v765_v34, %v761_v31  ;;  %v789_v31 = vrot.slane %v787_v13, 1  ;;  %v792_v34 = vshll.u32 %v4508_v32, 16  ;;  %v804_v32 = vshll.u32 %v4558_v33, 16 }
  0x75   : > { %1291 = vmatprep.mubr.bf16.mxu0 %v4763_v15  ;;  %1725 = vmatprep.mubr.bf16.mxu1 %v4584_v3  ;;  %v809_v13 = vshrl.u32 %v4604_v20, 16  ;;  %v816_v33 = vshll.u32 %v4591_v10, 16  ;;  %v828_v10 = vshll.u32 %v4638_v14, 16  ;;  %v999_v14 = vshll.u32 %v4665_v25, 16 }
  0x76   : > { %3811 = vmatpush3.bf16.msra.mxu1 %v4127_v47  ;;  %v775_v47 = vshll.u32 %v4480_v63, 16  ;;  %v4797_v54 = vsel %vm643_vm3, %v766_v43, %v770_v23  ;;  %v799_v43 = vshll.u32 %v4570_v7, 16  ;;  %v882_v25 = vrot.slane %v4385_v37, 1 }
  0x77   : > { %3812 = vmatprep.subr.bf16.mxu1 %v4128_v51  ;;  %v889_v37 = vrot.slane %v4537_v59, 1  ;;  %v4133_v59 = vld [vmem:[%s5355_s3 + $0x188] sm:$0xff]  }
  0x78   : > { %v777_v57 = vrot.slane %v775_v47, 1  ;;  %v797_v47 = vshrl.u32 %v4570_v7, 16 }
  0x7a   : > { %3813 = vmatpush3.bf16.msra.mxu1 %v4128_v51  ;;  %v780_v51 = vshll.u32 %v4469_v53, 16  ;;  %v778_v58 = vor.u32 %v777_v57, %v773_v8  ;;  %v785_v53 = vshrl.u32 %v4515_v41, 16  ;;  %v801_v8 = vrot.slane %v799_v43, 1 }
  0x7b   : > { %3814 = vmatprep.subr.bf16.mxu1 %v4129_v35  ;;  %v821_v43 = vshrl.u32 %v4647_v39, 16 }
  0x7c   : > { %1292 = vmatmul.mubr.bf16.gmra.mrb[28].mxu0 %v4743_v0  ;;  %1726 = vmatmul.mubr.bf16.gmra.mrb[28].mxu1 %v4548_v6  ;;  %v782_v48 = vrot.slane %v780_v51, 1  ;;  %v790_v22 = vor.u32 %v789_v31, %v785_v53  ;;  %v802_v57 = vor.u32 %v801_v8, %v797_v47  ;;  %v806_v51 = vrot.slane %v804_v32, 1 }
  0x7d   : > { %1299 = vmatprep.mubr.bf16.mxu0 %v4779_v9  ;;  %1733 = vmatprep.mubr.bf16.mxu1 %v4652_v1  ;;  %v830_v32 = vrot.slane %v828_v10, 1  ;;  %v888_v10 = vrot.slane %v4548_v6, 1 }
  0x7e   : > { %3815 = vmatpush3.bf16.msra.mxu1 %v4129_v35  ;;  %v4808_v35 = vsel %vm643_vm3, %v778_v58, %v782_v48  ;;  %v811_v58 = vshll.u32 %v4604_v20, 16  ;;  %v4828_v48 = vsel %vm643_vm3, %v802_v57, %v806_v51  ;;  %v994_v57 = vshll.u32 %v4672_v26, 16 }
  0x7f   : > { %3816 = vmatprep.subr.bf16.mxu1 %v4138_v24 }
  0x80   : > { %v813_v53 = vrot.slane %v811_v58, 1  ;;  %v992_v58 = vshrl.u32 %v4672_v26, 16 }
  0x82   : > { %3817 = vmatpush3.bf16.msra.mxu1 %v4138_v24  ;;  %v794_v24 = vrot.slane %v792_v34, 1  ;;  %v814_v31 = vor.u32 %v813_v53, %v809_v13  ;;  %v818_v34 = vrot.slane %v816_v33, 1  ;;  %v996_v13 = vrot.slane %v994_v57, 1 }
  0x83   : > { %3850 = vmatprep.subr.bf16.mxu1 %v4794_v40  ;;  %v1001_v33 = vrot.slane %v999_v14, 1  ;;  %v891_v57 = vrot.slane %v4626_v19, 1  ;;  %v894_v14 = vrot.slane %v4688_v11, 1 }
  0x84   : > { %1300 = vmatmul.mubr.bf16.gmra.mrb[32].mxu0 %v4396_v44  ;;  %1734 = vmatmul.mubr.bf16.gmra.mrb[32].mxu1 %v4626_v19  ;;  %v4818_v23 = vsel %vm643_vm3, %v790_v22, %v794_v24  ;;  %v823_v22 = vshll.u32 %v4647_v39, 16  ;;  %v4838_v24 = vsel %vm643_vm3, %v814_v31, %v818_v34  ;;  %v997_v53 = vor.u32 %v996_v13, %v992_v58  ;;  %v4134_v13 = vld [vmem:[%s5355_s3 + $0x1d0] sm:$0xff]  }
  0x85   : > { %1307 = vmatprep.mubr.bf16.mxu0 %v4797_v54  ;;  %1741 = vmatprep.mubr.bf16.mxu1 %v4709_v29  ;;  %v883_v34 = vrot.slane %v4375_v30, 1  ;;  %v892_v58 = vrot.slane %v4610_v27, 1  ;;  %v4136_v27 = vld [vmem:[%s5355_s3 + $0x1d8] sm:$0xff]  }
  0x86   : > { %v825_v47 = vrot.slane %v823_v22, 1  ;;  %v4857_v31 = vsel %vm643_vm3, %v997_v53, %v1001_v33  ;;  %v895_v53 = vrot.slane %v4680_v52, 1  ;;  %v4137_v52 = vld [vmem:[%s5355_s3 + $0x198] sm:$0xff]  }
  0x87   : > { %v4866_v22 = vsel %vm879_vm2, %v882_v25, %v883_v34  ;;  %v4903_v33 = vsel %vm879_vm2, %v891_v57, %v892_v58  ;;  %v4135_v25 = vld [vmem:[%s5355_s3 + $0x190] sm:$0xff]   ;;  %v903_v58 = vrot.slane %v4743_v0, 1 }
  0x88   : > { %v826_v8 = vor.u32 %v825_v47, %v821_v43  ;;  %v886_v43 = vrot.slane %v4428_v2, 1  ;;  %v885_v47 = vrot.slane %v4445_v18, 1  ;;  %v4132_v2 = vld [vmem:[%s5355_s3 + $0x1c8] sm:$0xff]   ;;  %v4912_v34 = vsel %vm879_vm2, %v894_v14, %v895_v53  ;;  %v4143_v14 = vld [vmem:[%s5355_s3 + $0x1f0] sm:$0xff]  }
  0x8a   : > { %v4848_v51 = vsel %vm643_vm3, %v826_v8, %v830_v32  ;;  %v4877_v30 = vsel %vm879_vm2, %v885_v47, %v886_v43  ;;  %v4131_v8 = vld [vmem:[%s5355_s3 + $0x180] sm:$0xff]   ;;  %v4886_v32 = vsel %vm879_vm2, %v888_v10, %v889_v37  ;;  %v897_v43 = vrot.slane %v4704_v49, 1 }
  0x8b   : > { %v898_v47 = vrot.slane %v4697_v36, 1  ;;  %v4139_v10 = vld [vmem:[%s5355_s3 + $0x1e0] sm:$0xff]   ;;  %v900_v37 = vrot.slane %v4726_v42, 1  ;;  %v4141_v36 = vld [vmem:[%s5355_s3 + $0x1e8] sm:$0xff]  }
  0x8c   : > { %1308 = vmatmul.mubr.bf16.gmra.mrb[36].mxu0 %v4401_v46  ;;  %1742 = vmatmul.mubr.bf16.gmra.mrb[36].mxu1 %v4688_v11 }
  0x8d   : > { %1315 = vmatprep.mubr.bf16.mxu0 %v4808_v35  ;;  %1749 = vmatprep.mubr.bf16.mxu1 %v4729_v50 }
  0x94   : > { %1316 = vmatmul.mubr.bf16.gmra.mrb[40].mxu0 %v4480_v63  ;;  %1750 = vmatmul.mubr.bf16.gmra.mrb[40].mxu1 %v4704_v49 }
  0x95   : > { %1323 = vmatprep.mubr.bf16.mxu0 %v4818_v23  ;;  %1757 = vmatprep.mubr.bf16.mxu1 %v4754_v21 }
  0x9c   : > { %1324 = vmatmul.mubr.bf16.gmra.mrb[44].mxu0 %v4515_v41  ;;  %1758 = vmatmul.mubr.bf16.gmra.mrb[44].mxu1 %v4726_v42 }
  0x9d   : > { %1331 = vmatprep.mubr.bf16.mxu0 %v4828_v48  ;;  %1765 = vmatprep.mubr.bf16.mxu1 %v4763_v15 }
  0xa4   : > { %1332 = vmatmul.mubr.bf16.gmra.mrb[48].mxu0 %v4570_v7  ;;  %1766 = vmatmul.mubr.bf16.gmra.mrb[48].mxu1 %v4743_v0 }
  0xa5   : > { %1339 = vmatprep.mubr.bf16.mxu0 %v4838_v24  ;;  %1773 = vmatprep.mubr.bf16.mxu1 %v4779_v9 }
  0xac   : > { %1340 = vmatmul.mubr.bf16.gmra.mrb[52].mxu0 %v4604_v20  ;;  %1774 = vmatmul.mubr.bf16.gmra.mrb[52].mxu1 %v4396_v44 }
  0xad   : > { %1347 = vmatprep.mubr.bf16.mxu0 %v4848_v51  ;;  %1781 = vmatprep.mubr.bf16.mxu1 %v4797_v54 }
  0xb4   : > { %1348 = vmatmul.mubr.bf16.gmra.mrb[56].mxu0 %v4647_v39  ;;  %1782 = vmatmul.mubr.bf16.gmra.mrb[56].mxu1 %v4401_v46 }
  0xb5   : > { %1355 = vmatprep.mubr.bf16.mxu0 %v4857_v31  ;;  %1789 = vmatprep.mubr.bf16.mxu1 %v4808_v35 }
  0xbc   : > { %1356 = vmatmul.mubr.bf16.gmra.mrb[60].mxu0 %v4672_v26  ;;  %1790 = vmatmul.mubr.bf16.gmra.mrb[60].mxu1 %v4480_v63 }
  0xbd   : > { %3770 = vmatprep.mubr.bf16.mxu0 %v4866_v22  ;;  %1797 = vmatprep.mubr.bf16.mxu1 %v4818_v23 }
  0xc4   : > { %3771 = vmatmul.mubr.bf16.vlgmr.msra.gmra.mrb[64].mxu0 %v4877_v30  ;;  %1798 = vmatmul.mubr.bf16.gmra.mrb[64].mxu1 %v4515_v41 }
  0xc5   : > { %3619 = vmatpush3.bf16.msra.mxu0 %v4131_v8  ;;  %3774 = vmatprep.mubr.bf16.mxu0 %v4886_v32  ;;  %v901_v8 = vrot.slane %v4717_v12, 1  ;;  %v4142_v12 = vld [vmem:[%s5355_s3 + $0x1a8] sm:$0xff]  }
  0xc6   : > { %3620 = vmatprep.subr.bf16.mxu0 %v4132_v2  ;;  %1805 = vmatprep.mubr.bf16.mxu1 %v4828_v48  ;;  %v4929_v2 = vsel %vm879_vm2, %v897_v43, %v898_v47  ;;  %v4150_v43 = vld [vmem:[%s5355_s3 + $0x218] sm:$0xff]  }
  0xc7   : > { %v4938_v57 = vsel %vm879_vm2, %v900_v37, %v901_v8 }
  0xc9   : > { %3621 = vmatpush3.bf16.msra.mxu0 %v4133_v59  ;;  %v4140_v59 = vld [vmem:[%s5355_s3 + $0x1a0] sm:$0xff]  }
  0xca   : > { %3622 = vmatprep.subr.bf16.mxu0 %v4134_v13  ;;  %v904_v13 = vrot.slane %v4739_v4, 1  ;;  %v4145_v4 = vld [vmem:[%s5355_s3 + $0x1f8] sm:$0xff]  }
  0xcc   : > { %3775 = vmatmul.mubr.bf16.gmra.mrb[68].mxu0 %v4903_v33  ;;  %1806 = vmatmul.mubr.bf16.gmra.mrb[68].mxu1 %v4570_v7  ;;  %v4953_v53 = vsel %vm879_vm2, %v903_v58, %v904_v13 }
  0xcd   : > { %3623 = vmatpush3.bf16.msra.mxu0 %v4135_v25  ;;  %3778 = vmatprep.mubr.bf16.mxu0 %v4912_v34  ;;  %v4144_v25 = vld [vmem:[%s5355_s3 + $0x1b0] sm:$0xff]  }
  0xce   : > { %3624 = vmatprep.subr.bf16.mxu0 %v4136_v27  ;;  %1813 = vmatprep.mubr.bf16.mxu1 %v4838_v24  ;;  %v4146_v27 = vld [vmem:[%s5355_s3 + $0x1b8] sm:$0xff]  }
  0xd1   : > { %3625 = vmatpush3.bf16.msra.mxu0 %v4137_v52  ;;  %v4148_v52 = vld [vmem:[%s5355_s3 + $0x208] sm:$0xff]  }
  0xd2   : > { %3626 = vmatprep.subr.bf16.mxu0 %v4139_v10 }
  0xd4   : > { %3779 = vmatmul.mubr.bf16.gmra.mrb[72].mxu0 %v4929_v2  ;;  %1814 = vmatmul.mubr.bf16.gmra.mrb[72].mxu1 %v4604_v20 }
  0xd5   : > { %3627 = vmatpush3.bf16.msra.mxu0 %v4140_v59  ;;  %3782 = vmatprep.mubr.bf16.mxu0 %v4938_v57 }
  0xd6   : > { %3628 = vmatprep.subr.bf16.mxu0 %v4141_v36  ;;  %1821 = vmatprep.mubr.bf16.mxu1 %v4848_v51 }
  0xd9   : > { %3629 = vmatpush3.bf16.msra.mxu0 %v4142_v12 }
  0xda   : > { %3630 = vmatprep.subr.bf16.mxu0 %v4143_v14 }
  0xdc   : > { %3783 = vmatmul.mubr.bf16.gmra.mrb[76].mxu0 %v4953_v53  ;;  %1822 = vmatmul.mubr.bf16.gmra.mrb[76].mxu1 %v4647_v39 }
  0xdd   : > { %3631 = vmatpush3.bf16.msra.mxu0 %v4144_v25  ;;  %3818 = vmatprep.mubr.bf16.mxu1 %v4440_v17 }
  0xde   : > { %3632 = vmatprep.subr.bf16.mxu0 %v4145_v4  ;;  %2216 = vmatprep.mubr.bf16.mxu0 %v4476_v62  ;;  %v4149_v62 = vld [vmem:[%s5355_s3 + $0x210] sm:$0xff]  }
  0xe1   : > { %3633 = vmatpush3.bf16.msra.mxu0 %v4146_v27 }
  0xe4   : > { %3819 = vmatmul.mubr.bf16.vlgmr.msra.gmra.mrb[80].mxu1 %v4866_v22  ;;  %2217 = vmatmul.mubr.bf16.vlgmr.msra.gmra.mrb[80].mxu0 %v4445_v18  ;;  %v4151_v18 = vld [vmem:[%s5355_s3 + $0x220] sm:$0xff]  }
  0xe5   : > { %3851 = vmatpush3.bf16.msra.mxu1 %v4794_v40  ;;  %3822 = vmatprep.mubr.bf16.mxu1 %v4877_v30 }
  0xe6   : > { %2224 = vmatprep.mubr.bf16.mxu0 %v4584_v3  ;;  %3852 = vmatprep.subr.bf16.mxu1 %v4148_v52  ;;  %v4152_v3 = vld [vmem:[%s5355_s3 + $0x228] sm:$0xff]  }
  0xe9   : > { %3853 = vmatpush3.bf16.msra.mxu1 %v4148_v52 }
  0xea   : > { %3854 = vmatprep.subr.bf16.mxu1 %v4149_v62 }
  0xec   : > { %3823 = vmatmul.mubr.bf16.gmra.mrb[84].mxu1 %v4886_v32  ;;  %2225 = vmatmul.mubr.bf16.gmra.mrb[84].mxu0 %v4548_v6  ;;  %v4153_v6 = vld [vmem:[%s5355_s3 + $0x230] sm:$0xff]  }
  0xed   : > { %3826 = vmatprep.mubr.bf16.mxu1 %v4903_v33  ;;  %2232 = vmatprep.mubr.bf16.mxu0 %v4652_v1  ;;  %v4154_v1 = vld [vmem:[%s5355_s3 + $0x238] sm:$0xff]  }
  0xee   : > { %3855 = vmatpush3.bf16.msra.mxu1 %v4149_v62 }
  0xef   : > { %3856 = vmatprep.subr.bf16.mxu1 %v4150_v43 }
  0xf2   : > { %3857 = vmatpush3.bf16.msra.mxu1 %v4150_v43 }
  0xf3   : > { %3858 = vmatprep.subr.bf16.mxu1 %v4151_v18 }
  0xf4   : > { %3827 = vmatmul.mubr.bf16.gmra.mrb[88].mxu1 %v4912_v34  ;;  %2233 = vmatmul.mubr.bf16.gmra.mrb[88].mxu0 %v4626_v19 }
  0xf5   : > { %3830 = vmatprep.mubr.bf16.mxu1 %v4929_v2  ;;  %2240 = vmatprep.mubr.bf16.mxu0 %v4709_v29 }
  0xf6   : > { %3859 = vmatpush3.bf16.msra.mxu1 %v4151_v18 }
  0xf7   : > { %3860 = vmatprep.subr.bf16.mxu1 %v4152_v3 }
  0xfa   : > { %3861 = vmatpush3.bf16.msra.mxu1 %v4152_v3 }
  0xfb   : > { %3862 = vmatprep.subr.bf16.mxu1 %v4153_v6 }
  0xfc   : > { %3831 = vmatmul.mubr.bf16.gmra.mrb[92].mxu1 %v4938_v57  ;;  %2241 = vmatmul.mubr.bf16.gmra.mrb[92].mxu0 %v4688_v11 }
  0xfd   : > { %3834 = vmatprep.mubr.bf16.mxu1 %v4953_v53  ;;  %2248 = vmatprep.mubr.bf16.mxu0 %v4729_v50 }
  0xfe   : > { %3863 = vmatpush3.bf16.msra.mxu1 %v4153_v6 }
  0xff   : > { %3864 = vmatprep.subr.bf16.mxu1 %v4154_v1 }
 0x102   : > { %3865 = vmatpush3.bf16.msra.mxu1 %v4154_v1 }
 0x104   : > { %v3362_v19 = vpop.f32.mrb[0].mxu0  ;;  %3835 = vmatmul.mubr.bf16.gmra.mrb[0].mxu1 %v4414_v56  ;;  %2249 = vmatmul.mubr.bf16.gmra.mrb[96].mxu0 %v4704_v49 }
 0x105   : > { %v3363_v29 = vpop.f32.mrb[1].mxu0  ;;  %3838 = vmatprep.mubr.bf16.mxu1 %v4419_v61  ;;  %2256 = vmatprep.mubr.bf16.mxu0 %v4754_v21 }
 0x106   : > { %v5008_v40 = vadd.f32 %v3363_v29, %v3362_v19  ;;  %v3365_v22 = vpop.f32.mrb[2].mxu0 }
 0x107   : > { %v3366_v11 = vpop.f32.mrb[3].mxu0 }
 0x108   : > { %v5012_v47 = vadd.f32 %v3366_v11, %v3365_v22 }
 0x10c   : > { %3839 = vmatmul.mubr.bf16.gmra.mrb[4].mxu1 %v4504_v28  ;;  %2257 = vmatmul.mubr.bf16.gmra.mrb[100].mxu0 %v4726_v42 }
 0x10d   : > { %3842 = vmatprep.mubr.bf16.mxu1 %v4533_v55  ;;  %2264 = vmatprep.mubr.bf16.mxu0 %v4763_v15 }
 0x110   : > { %v3368_v50 = vpop.f32.mrb[4].mxu0 }
 0x111   : > { %v3369_v10 = vpop.f32.mrb[5].mxu0 }
 0x112   : > { %v5016_v37 = vadd.f32 %v3369_v10, %v3368_v50  ;;  %v3371_v8 = vpop.f32.mrb[6].mxu0 }
 0x113   : > { %v3372_v49 = vpop.f32.mrb[7].mxu0 }
 0x114   : > { %v5020_v59 = vadd.f32 %v3372_v49, %v3371_v8  ;;  %3843 = vmatmul.mubr.bf16.gmra.mrb[8].mxu1 %v4587_v5  ;;  %2265 = vmatmul.mubr.bf16.gmra.mrb[104].mxu0 %v4743_v0 }
 0x115   : > { %3846 = vmatprep.mubr.bf16.mxu1 %v4622_v45  ;;  %2272 = vmatprep.mubr.bf16.mxu0 %v4779_v9 }
 0x11b   : > { %v3374_v21 = vpop.f32.mrb[8].mxu0 }
 0x11c   : > { %3847 = vmatmul.mubr.bf16.gmra.mrb[12].mxu1 %v4659_v60  ;;  %2273 = vmatmul.mubr.bf16.gmra.mrb[108].mxu0 %v4396_v44  ;;  %v3375_v42 = vpop.f32.mrb[9].mxu0 }
 0x11d   : > { %2280 = vmatprep.mubr.bf16.mxu0 %v4797_v54  ;;  %3866 = vmatprep.mubr.bf16.mxu1 %v4877_v30  ;;  %v5030_v15 = vadd.f32 %v3375_v42, %v3374_v21  ;;  %v3377_v36 = vpop.f32.mrb[10].mxu0 }
 0x11e   : > { %v3378_v12 = vpop.f32.mrb[11].mxu0 }
 0x11f   : > { %v5032_v58 = vadd.f32 %v3378_v12, %v3377_v36 }
 0x124   : > { %2281 = vmatmul.mubr.bf16.gmra.mrb[112].mxu0 %v4401_v46  ;;  %3867 = vmatmul.mubr.bf16.vlgmr.msra.gmra.mrb[80].mxu1 %v4886_v32 }
 0x125   : > { %2288 = vmatprep.mubr.bf16.mxu0 %v4808_v35  ;;  %3870 = vmatprep.mubr.bf16.mxu1 %v4903_v33 }
 0x127   : > { %v3380_v44 = vpop.f32.mrb[12].mxu0 }
 0x128   : > { %v3381_v0 = vpop.f32.mrb[13].mxu0 }
 0x129   : > { %v5038_v9 = vadd.f32 %v3381_v0, %v3380_v44  ;;  %v3383_v54 = vpop.f32.mrb[14].mxu0 }
 0x12a   : > { %v3384_v30 = vpop.f32.mrb[15].mxu0 }
 0x12b   : > { %v5040_v13 = vadd.f32 %v3384_v30, %v3383_v54 }
 0x12c   : > { %2289 = vmatmul.mubr.bf16.gmra.mrb[116].mxu0 %v4480_v63  ;;  %3871 = vmatmul.mubr.bf16.gmra.mrb[84].mxu1 %v4912_v34 }
 0x12d   : > { %2296 = vmatprep.mubr.bf16.mxu0 %v4818_v23  ;;  %3874 = vmatprep.mubr.bf16.mxu1 %v4929_v2 }
 0x134   : > { %2297 = vmatmul.mubr.bf16.gmra.mrb[120].mxu0 %v4515_v41  ;;  %3875 = vmatmul.mubr.bf16.gmra.mrb[88].mxu1 %v4938_v57 }
 0x135   : > { %2304 = vmatprep.mubr.bf16.mxu0 %v4828_v48  ;;  %3878 = vmatprep.mubr.bf16.mxu1 %v4953_v53 }
 0x137   : > { %v3386_v46 = vpop.f32.mrb[16].mxu0  ;;  %v3498_v35 = vpop.f32.mrb[16].mxu1 }
 0x138   : > { %v3387_v32 = vpop.f32.mrb[17].mxu0  ;;  %v3499_v33 = vpop.f32.mrb[17].mxu1 }
 0x139   : > { %v5050_v14 = vadd.f32 %v3387_v32, %v3386_v46  ;;  %v5052_v63 = vadd.f32 %v3499_v33, %v3498_v35  ;;  %v3389_v34 = vpop.f32.mrb[18].mxu0  ;;  %v3501_v23 = vpop.f32.mrb[18].mxu1 }
 0x13a   : > { %v3390_v25 = vpop.f32.mrb[19].mxu0  ;;  %v3502_v2 = vpop.f32.mrb[19].mxu1 }
 0x13b   : > { %v5054_v4 = vadd.f32 %v3390_v25, %v3389_v34  ;;  %v5056_v41 = vadd.f32 %v3502_v2, %v3501_v23 }
 0x13c   : > { %2305 = vmatmul.mubr.bf16.gmra.mrb[124].mxu0 %v4570_v7  ;;  %3879 = vmatmul.mubr.bf16.gmra.mrb[92].mxu1 %v4414_v56 }
 0x13d   : > { %2312 = vmatprep.mubr.bf16.mxu0 %v4838_v24  ;;  %3882 = vmatprep.mubr.bf16.mxu1 %v4419_v61 }
 0x13f   : > { %v3392_v48 = vpop.f32.mrb[20].mxu0  ;;  %v3504_v57 = vpop.f32.mrb[20].mxu1 }
 0x140   : > { %v3393_v53 = vpop.f32.mrb[21].mxu0  ;;  %v3505_v27 = vpop.f32.mrb[21].mxu1 }
 0x141   : > { %v5062_v52 = vadd.f32 %v3393_v53, %v3392_v48  ;;  %v5064_v62 = vadd.f32 %v3505_v27, %v3504_v57  ;;  %v3395_v43 = vpop.f32.mrb[22].mxu0  ;;  %v3507_v18 = vpop.f32.mrb[22].mxu1 }
 0x142   : > { %v3396_v3 = vpop.f32.mrb[23].mxu0  ;;  %v3508_v6 = vpop.f32.mrb[23].mxu1 }
 0x143   : > { %v5066_v1 = vadd.f32 %v3396_v3, %v3395_v43  ;;  %v5068_v7 = vadd.f32 %v3508_v6, %v3507_v18 }
 0x144   : > { %2313 = vmatmul.mubr.bf16.gmra.mrb[128].mxu0 %v4604_v20  ;;  %3883 = vmatmul.mubr.bf16.gmra.mrb[0].mxu1 %v4504_v28 }
 0x145   : > { %2320 = vmatprep.mubr.bf16.mxu0 %v4848_v51  ;;  %3886 = vmatprep.mubr.bf16.mxu1 %v4533_v55 }
 0x147   : > { %v3398_v56 = vpop.f32.mrb[24].mxu0  ;;  %v3510_v61 = vpop.f32.mrb[24].mxu1 }
 0x148   : > { %v3399_v24 = vpop.f32.mrb[25].mxu0  ;;  %v3511_v19 = vpop.f32.mrb[25].mxu1 }
 0x149   : > { %v5074_v29 = vadd.f32 %v3399_v24, %v3398_v56  ;;  %v5076_v22 = vadd.f32 %v3511_v19, %v3510_v61  ;;  %v3401_v11 = vpop.f32.mrb[26].mxu0  ;;  %v3513_v50 = vpop.f32.mrb[26].mxu1 }
 0x14a   : > { %v3402_v10 = vpop.f32.mrb[27].mxu0  ;;  %v3514_v8 = vpop.f32.mrb[27].mxu1 }
 0x14b   : > { %v5078_v49 = vadd.f32 %v3402_v10, %v3401_v11  ;;  %v5080_v20 = vadd.f32 %v3514_v8, %v3513_v50 }
 0x14c   : > { %2321 = vmatmul.mubr.bf16.gmra.mrb[132].mxu0 %v4647_v39  ;;  %3887 = vmatmul.mubr.bf16.gmra.mrb[4].mxu1 %v4587_v5 }
 0x14d   : > { %2328 = vmatprep.mubr.bf16.mxu0 %v4857_v31  ;;  %3890 = vmatprep.mubr.bf16.mxu1 %v4622_v45 }
 0x14f   : > { %v3404_v28 = vpop.f32.mrb[28].mxu0  ;;  %v3516_v55 = vpop.f32.mrb[28].mxu1 }
 0x150   : > { %v3405_v51 = vpop.f32.mrb[29].mxu0  ;;  %v3517_v21 = vpop.f32.mrb[29].mxu1 }
 0x151   : > { %v5086_v42 = vadd.f32 %v3405_v51, %v3404_v28  ;;  %v5088_v36 = vadd.f32 %v3517_v21, %v3516_v55  ;;  %v3407_v12 = vpop.f32.mrb[30].mxu0  ;;  %v3519_v44 = vpop.f32.mrb[30].mxu1 }
 0x152   : > { %v3408_v0 = vpop.f32.mrb[31].mxu0  ;;  %v3520_v54 = vpop.f32.mrb[31].mxu1 }
 0x153   : > { %v5090_v30 = vadd.f32 %v3408_v0, %v3407_v12  ;;  %v5092_v39 = vadd.f32 %v3520_v54, %v3519_v44 }
 0x154   : > { %2329 = vmatmul.mubr.bf16.gmra.mrb[136].mxu0 %v4672_v26  ;;  %3891 = vmatmul.mubr.bf16.gmra.mrb[8].mxu1 %v4659_v60 }
 0x155   : > { %2336 = vmatprep.mubr.bf16.mxu0 %v4440_v17  ;;  %3894 = vmatprep.mubr.bf16.mxu1 %v4684_v16 }
 0x157   : > { %v3410_v5 = vpop.f32.mrb[32].mxu0  ;;  %v3522_v45 = vpop.f32.mrb[32].mxu1 }
 0x158   : > { %v3411_v31 = vpop.f32.mrb[33].mxu0  ;;  %v3523_v46 = vpop.f32.mrb[33].mxu1 }
 0x159   : > { %v3412_v35 = vadd.f32 %v3411_v31, %v3410_v5  ;;  %v5098_v32 = vadd.f32 %v3523_v46, %v3522_v45  ;;  %v3413_v33 = vpop.f32.mrb[34].mxu0  ;;  %v3525_v34 = vpop.f32.mrb[34].mxu1 }
 0x15a   : > { %v3414_v23 = vpop.f32.mrb[35].mxu0  ;;  %v3526_v25 = vpop.f32.mrb[35].mxu1 }
 0x15b   : > { %v3415_v2 = vadd.f32 %v3414_v23, %v3413_v33  ;;  %v5100_v48 = vadd.f32 %v3526_v25, %v3525_v34 }
 0x15c   : > { %2337 = vmatmul.mubr.bf16.gmra.mrb[140].mxu0 %v5363_v38  ;;  %3895 = vmatmul.mubr.bf16.gmra.mrb[12].mxu1 %v4440_v17 }
 0x15f   : > { %v3416_v60 = vpop.f32.mrb[36].mxu0  ;;  %v3528_v26 = vpop.f32.mrb[36].mxu1 }
 0x160   : > { %v3417_v16 = vpop.f32.mrb[37].mxu0  ;;  %v3529_v57 = vpop.f32.mrb[37].mxu1 }
 0x161   : > { %v3418_v53 = vadd.f32 %v3417_v16, %v3416_v60  ;;  %v5104_v27 = vadd.f32 %v3529_v57, %v3528_v26  ;;  %v3419_v43 = vpop.f32.mrb[38].mxu0  ;;  %v3531_v18 = vpop.f32.mrb[38].mxu1 }
 0x162   : > { %v3420_v3 = vpop.f32.mrb[39].mxu0  ;;  %v3532_v6 = vpop.f32.mrb[39].mxu1 }
 0x163   : > { %v3421_v56 = vadd.f32 %v3420_v3, %v3419_v43  ;;  %v5106_v61 = vadd.f32 %v3532_v6, %v3531_v18 }
 0x167   : > { %v3422_v24 = vpop.f32.mrb[40].mxu0  ;;  %v3534_v19 = vpop.f32.mrb[40].mxu1 }
 0x168   : > { %v3423_v11 = vpop.f32.mrb[41].mxu0  ;;  %v3535_v38 = vpop.f32.mrb[41].mxu1 }
 0x169   : > { %v3424_v50 = vadd.f32 %v3423_v11, %v3422_v24  ;;  %v5108_v17 = vadd.f32 %v3535_v38, %v3534_v19  ;;  %v3425_v10 = vpop.f32.mrb[42].mxu0  ;;  %v3537_v8 = vpop.f32.mrb[42].mxu1 }
 0x16a   : > { %v3426_v28 = vpop.f32.mrb[43].mxu0  ;;  %v3538_v55 = vpop.f32.mrb[43].mxu1 }
 0x16b   : > { %v3427_v51 = vadd.f32 %v3426_v28, %v3425_v10  ;;  %v5110_v21 = vadd.f32 %v3538_v55, %v3537_v8 }
 0x16f   : > { %v3428_v12 = vpop.f32.mrb[44].mxu0  ;;  %v3540_v44 = vpop.f32.mrb[44].mxu1 }
 0x170   : > { %v3429_v0 = vpop.f32.mrb[45].mxu0  ;;  %v3541_v54 = vpop.f32.mrb[45].mxu1 }
 0x171   : > { %v3430_v5 = vadd.f32 %v3429_v0, %v3428_v12  ;;  %v5112_v45 = vadd.f32 %v3541_v54, %v3540_v44  ;;  %v3431_v31 = vpop.f32.mrb[46].mxu0  ;;  %v3543_v46 = vpop.f32.mrb[46].mxu1 }
 0x172   : > { %v3432_v33 = vpop.f32.mrb[47].mxu0  ;;  %v3544_v34 = vpop.f32.mrb[47].mxu1 }
 0x173   : > { %v3433_v23 = vadd.f32 %v3432_v33, %v3431_v31  ;;  %v5114_v25 = vadd.f32 %v3544_v34, %v3543_v46 }
 0x177   : > { %v3434_v60 = vpop.f32.mrb[48].mxu0  ;;  %v3546_v26 = vpop.f32.mrb[48].mxu1 }
 0x178   : > { %v3435_v16 = vpop.f32.mrb[49].mxu0  ;;  %v3547_v57 = vpop.f32.mrb[49].mxu1 }
 0x179   : > { %v5116_v43 = vadd.f32 %v3435_v16, %v3434_v60  ;;  %v3548_v18 = vadd.f32 %v3547_v57, %v3546_v26  ;;  %v3437_v3 = vpop.f32.mrb[50].mxu0  ;;  %v3549_v6 = vpop.f32.mrb[50].mxu1 }
 0x17a   : > { %v3438_v24 = vpop.f32.mrb[51].mxu0  ;;  %v3550_v19 = vpop.f32.mrb[51].mxu1 }
 0x17b   : > { %v5118_v11 = vadd.f32 %v3548_v18, %v3412_v35  ;;  %v5120_v38 = vadd.f32 %v3438_v24, %v3437_v3  ;;  %v3551_v10 = vadd.f32 %v3550_v19, %v3549_v6 }
 0x17d   : > { %v5122_v8 = vadd.f32 %v3551_v10, %v3415_v2 }
 0x17f   : > { %v3440_v28 = vpop.f32.mrb[52].mxu0  ;;  %v3552_v55 = vpop.f32.mrb[52].mxu1 }
 0x180   : > { %v3441_v12 = vpop.f32.mrb[53].mxu0  ;;  %v3553_v44 = vpop.f32.mrb[53].mxu1 }
 0x181   : > { %v5124_v0 = vadd.f32 %v3441_v12, %v3440_v28  ;;  %v3554_v54 = vadd.f32 %v3553_v44, %v3552_v55  ;;  %v3443_v31 = vpop.f32.mrb[54].mxu0  ;;  %v3555_v46 = vpop.f32.mrb[54].mxu1 }
 0x182   : > { %v3444_v33 = vpop.f32.mrb[55].mxu0  ;;  %v3556_v34 = vpop.f32.mrb[55].mxu1 }
 0x183   : > { %v5126_v60 = vadd.f32 %v3554_v54, %v3418_v53  ;;  %v5128_v35 = vadd.f32 %v3444_v33, %v3443_v31  ;;  %v3557_v26 = vadd.f32 %v3556_v34, %v3555_v46 }
 0x185   : > { %v5130_v16 = vadd.f32 %v3557_v26, %v3421_v56 }
 0x187   : > { %5364 = vst [vmem:[#allocation2_spill] sm:$0xff] %v5130_v16  ;;  %v3446_v2 = vpop.f32.mrb[56].mxu0  ;;  %v3558_v57 = vpop.f32.mrb[56].mxu1 }
 0x188   : > { %v3447_v18 = vpop.f32.mrb[57].mxu0  ;;  %v3559_v3 = vpop.f32.mrb[57].mxu1 }
 0x189   : > { %v5132_v6 = vadd.f32 %v3447_v18, %v3446_v2  ;;  %v3560_v24 = vadd.f32 %v3559_v3, %v3558_v57  ;;  %v3449_v19 = vpop.f32.mrb[58].mxu0  ;;  %v3561_v10 = vpop.f32.mrb[58].mxu1 }
 0x18a   : > { %v3450_v28 = vpop.f32.mrb[59].mxu0  ;;  %v3562_v55 = vpop.f32.mrb[59].mxu1 }
 0x18b   : > { %v5134_v12 = vadd.f32 %v3560_v24, %v3424_v50  ;;  %v5136_v53 = vadd.f32 %v3450_v28, %v3449_v19  ;;  %v3563_v44 = vadd.f32 %v3562_v55, %v3561_v10 }
 0x18d   : > { %v5138_v54 = vadd.f32 %v3563_v44, %v3427_v51 }
 0x18f   : > { %5365 = vst [vmem:[#allocation3_spill] sm:$0xff] %v5138_v54  ;;  %v3452_v56 = vpop.f32.mrb[60].mxu0  ;;  %v3564_v31 = vpop.f32.mrb[60].mxu1 }
 0x190   : > { %v3453_v46 = vpop.f32.mrb[61].mxu0  ;;  %v3565_v33 = vpop.f32.mrb[61].mxu1 }
 0x191   : > { %v5140_v34 = vadd.f32 %v3453_v46, %v3452_v56  ;;  %v3566_v26 = vadd.f32 %v3565_v33, %v3564_v31  ;;  %v3455_v2 = vpop.f32.mrb[62].mxu0  ;;  %v3567_v57 = vpop.f32.mrb[62].mxu1 }
 0x192   : > { %v3456_v18 = vpop.f32.mrb[63].mxu0  ;;  %v3568_v3 = vpop.f32.mrb[63].mxu1 }
 0x193   : > { %v5142_v16 = vadd.f32 %v3566_v26, %v3430_v5  ;;  %v5144_v50 = vadd.f32 %v3456_v18, %v3455_v2  ;;  %v3569_v24 = vadd.f32 %v3568_v3, %v3567_v57 }
 0x195   : > { %v5146_v19 = vadd.f32 %v3569_v24, %v3433_v23 }
 0x197   : > { %v3772_v51 = vpop.f32.mrb[64].mxu0  ;;  %v3570_v10 = vpop.f32.mrb[64].mxu1 }
 0x198   : > { %v1407_v28 = vadd.f32 %v3772_v51, %v5016_v37  ;;  %v1398_v55 = vpop.f32.mrb[65].mxu0  ;;  %v3571_v44 = vpop.f32.mrb[65].mxu1 }
 0x199   : > { %v1399_v56 = vadd.f32 %v5008_v40, %v1398_v55  ;;  %v3572_v31 = vadd.f32 %v3571_v44, %v3570_v10  ;;  %v3773_v46 = vpop.f32.mrb[66].mxu0  ;;  %v3573_v33 = vpop.f32.mrb[66].mxu1 }
 0x19a   : > { %v5151_v54 = vadd.f32 %v5064_v62, %v1407_v28  ;;  %v1410_v5 = vadd.f32 %v3773_v46, %v5020_v59  ;;  %v1401_v26 = vpop.f32.mrb[67].mxu0  ;;  %v3574_v2 = vpop.f32.mrb[67].mxu1 }
 0x19b   : > { %v5155_v23 = vadd.f32 %v5052_v63, %v1399_v56  ;;  %v5158_v57 = vadd.f32 %v3572_v31, %v5116_v43  ;;  %v1402_v37 = vadd.f32 %v5012_v47, %v1401_v26  ;;  %v3575_v18 = vadd.f32 %v3574_v2, %v3573_v33 }
 0x19c   : > { %v5162_v40 = vadd.f32 %v5068_v7, %v1410_v5 }
 0x19d   : > { %v5165_v3 = vadd.f32 %v5056_v41, %v1402_v37  ;;  %v5168_v62 = vadd.f32 %v3575_v18, %v5120_v38 }
 0x19f   : > { %v3776_v59 = vpop.f32.mrb[68].mxu0  ;;  %v3576_v24 = vpop.f32.mrb[68].mxu1 }
 0x1a0   : > { %v1423_v63 = vadd.f32 %v3776_v59, %v5038_v9  ;;  %v1414_v51 = vpop.f32.mrb[69].mxu0  ;;  %v3577_v10 = vpop.f32.mrb[69].mxu1 }
 0x1a1   : > { %v1415_v43 = vadd.f32 %v5030_v15, %v1414_v51  ;;  %v3578_v28 = vadd.f32 %v3577_v10, %v3576_v24  ;;  %v3777_v47 = vpop.f32.mrb[70].mxu0  ;;  %v3579_v55 = vpop.f32.mrb[70].mxu1 }
 0x1a2   : > { %v5173_v7 = vadd.f32 %v5088_v36, %v1423_v63  ;;  %v1426_v41 = vadd.f32 %v3777_v47, %v5040_v13  ;;  %v1417_v44 = vpop.f32.mrb[71].mxu0  ;;  %v3580_v56 = vpop.f32.mrb[71].mxu1 }
 0x1a3   : > { %v5177_v38 = vadd.f32 %v5076_v22, %v1415_v43  ;;  %v5180_v31 = vadd.f32 %v3578_v28, %v5124_v0  ;;  %v1418_v9 = vadd.f32 %v5032_v58, %v1417_v44  ;;  %v3581_v46 = vadd.f32 %v3580_v56, %v3579_v55 }
 0x1a4   : > { %v5184_v15 = vadd.f32 %v5092_v39, %v1426_v41 }
 0x1a5   : > { %v5187_v33 = vadd.f32 %v5080_v20, %v1418_v9  ;;  %v5190_v36 = vadd.f32 %v3581_v46, %v5128_v35 }
 0x1a7   : > { %v3780_v13 = vpop.f32.mrb[72].mxu0  ;;  %v3582_v5 = vpop.f32.mrb[72].mxu1 }
 0x1a8   : > { %v1439_v22 = vadd.f32 %v3780_v13, %v5062_v52  ;;  %v1430_v26 = vpop.f32.mrb[73].mxu0  ;;  %v3583_v2 = vpop.f32.mrb[73].mxu1 }
 0x1a9   : > { %v1431_v0 = vadd.f32 %v5050_v14, %v1430_v26  ;;  %v3584_v37 = vadd.f32 %v3583_v2, %v3582_v5  ;;  %v3781_v58 = vpop.f32.mrb[74].mxu0  ;;  %v3585_v18 = vpop.f32.mrb[74].mxu1 }
 0x1aa   : > { %v5195_v39 = vadd.f32 %v5104_v27, %v1439_v22  ;;  %v1442_v20 = vadd.f32 %v3781_v58, %v5066_v1  ;;  %v1433_v59 = vpop.f32.mrb[75].mxu0  ;;  %v3586_v24 = vpop.f32.mrb[75].mxu1 }
 0x1ab   : > { %v5199_v35 = vadd.f32 %v5098_v32, %v1431_v0  ;;  %v5202_v63 = vadd.f32 %v3584_v37, %v5132_v6  ;;  %v1434_v52 = vadd.f32 %v5054_v4, %v1433_v59  ;;  %v3587_v51 = vadd.f32 %v3586_v24, %v3585_v18 }
 0x1ac   : > { %v5206_v14 = vadd.f32 %v5106_v61, %v1442_v20 }
 0x1ad   : > { %v1739_v10 = vadd.f32 %v5100_v48, %v1434_v52  ;;  %v5210_v27 = vadd.f32 %v3587_v51, %v5136_v53 }
 0x1af   : > { %v3784_v1 = vpop.f32.mrb[76].mxu0  ;;  %v3588_v43 = vpop.f32.mrb[76].mxu1 }
 0x1b0   : > { %v1455_v28 = vadd.f32 %v3784_v1, %v5086_v42  ;;  %v1446_v32 = vpop.f32.mrb[77].mxu0  ;;  %v3589_v47 = vpop.f32.mrb[77].mxu1 }
 0x1b1   : > { %v1447_v6 = vadd.f32 %v5074_v29, %v1446_v32  ;;  %v3590_v55 = vadd.f32 %v3589_v47, %v3588_v43  ;;  %v3785_v41 = vpop.f32.mrb[78].mxu0  ;;  %v3591_v4 = vpop.f32.mrb[78].mxu1 }
 0x1b2   : > { %v5215_v44 = vadd.f32 %v5112_v45, %v1455_v28  ;;  %v1458_v61 = vadd.f32 %v3785_v41, %v5090_v30  ;;  %v1449_v48 = vpop.f32.mrb[79].mxu0  ;;  %v3592_v56 = vpop.f32.mrb[79].mxu1 }
 0x1b3   : > { %v1752_v53 = vadd.f32 %v5108_v17, %v1447_v6  ;;  %v5220_v9 = vadd.f32 %v3590_v55, %v5140_v34  ;;  %v1450_v42 = vadd.f32 %v5078_v49, %v1449_v48  ;;  %v3593_v46 = vadd.f32 %v3592_v56, %v3591_v4 }
 0x1b4   : > { %v5224_v29 = vadd.f32 %v5114_v25, %v1458_v61 }
 0x1b5   : > { %v1755_v13 = vadd.f32 %v5110_v21, %v1450_v42  ;;  %v5228_v45 = vadd.f32 %v3593_v46, %v5144_v50 }
 0x1b7   : > { %v3634_v5 = vpop.f32.mrb[80].mxu0 }
 0x1b8   : > { %v3635_v30 = vpop.f32.mrb[81].mxu0 }
 0x1b9   : > { %v3636_v22 = vadd.f32 %v3635_v30, %v3634_v5  ;;  %v3637_v26 = vpop.f32.mrb[82].mxu0 }
 0x1ba   : > { %v3638_v2 = vpop.f32.mrb[83].mxu0 }
 0x1bb   : > { %v3639_v17 = vadd.f32 %v3638_v2, %v3637_v26  ;;  %v5231_v34 = vadd.f32 %v3636_v22, %v5155_v23 }
 0x1bd   : > { %v5234_v49 = vadd.f32 %v3639_v17, %v5165_v3 }
 0x1bf   : > { %v3640_v0 = vpop.f32.mrb[84].mxu0 }
 0x1c0   : > { %v3641_v25 = vpop.f32.mrb[85].mxu0 }
 0x1c1   : > { %v3642_v37 = vadd.f32 %v3641_v25, %v3640_v0  ;;  %v3643_v58 = vpop.f32.mrb[86].mxu0 }
 0x1c2   : > { %v3644_v21 = vpop.f32.mrb[87].mxu0 }
 0x1c3   : > { %v3645_v18 = vadd.f32 %v3644_v21, %v3643_v58  ;;  %v3916_v50 = vadd.f32 %v3642_v37, %v5151_v54 }
 0x1c5   : > { %v3924_v20 = vadd.f32 %v3645_v18, %v5162_v40 }
 0x1c7   : > { %v3646_v59 = vpop.f32.mrb[88].mxu0 }
 0x1c8   : > { %v3647_v24 = vpop.f32.mrb[89].mxu0 }
 0x1c9   : > { %v3648_v52 = vadd.f32 %v3647_v24, %v3646_v59  ;;  %v3649_v51 = vpop.f32.mrb[90].mxu0 }
 0x1ca   : > { %v3650_v1 = vpop.f32.mrb[91].mxu0 }
 0x1cb   : > { %v3651_v23 = vadd.f32 %v3650_v1, %v3649_v51  ;;  %v5239_v43 = vadd.f32 %v3648_v52, %v5177_v38 }
 0x1cd   : > { %v5242_v3 = vadd.f32 %v3651_v23, %v5187_v33 }
 0x1cf   : > { %v3652_v28 = vpop.f32.mrb[92].mxu0 }
 0x1d0   : > { %v3653_v32 = vpop.f32.mrb[93].mxu0 }
 0x1d1   : > { %v3654_v47 = vadd.f32 %v3653_v32, %v3652_v28  ;;  %v3655_v6 = vpop.f32.mrb[94].mxu0 }
 0x1d2   : > { %v3656_v55 = vpop.f32.mrb[95].mxu0 }
 0x1d3   : > { %v3657_v54 = vadd.f32 %v3656_v55, %v3655_v6  ;;  %v5245_v40 = vadd.f32 %v3654_v47, %v5173_v7 }
 0x1d5   : > { %v5248_v41 = vadd.f32 %v3657_v54, %v5184_v15 }
 0x1d7   : > { %v3658_v4 = vpop.f32.mrb[96].mxu0 }
 0x1d8   : > { %v3659_v61 = vpop.f32.mrb[97].mxu0 }
 0x1d9   : > { %v3660_v48 = vadd.f32 %v3659_v61, %v3658_v4  ;;  %v3661_v38 = vpop.f32.mrb[98].mxu0 }
 0x1da   : > { %v3662_v56 = vpop.f32.mrb[99].mxu0 }
 0x1db   : > { %v3663_v42 = vadd.f32 %v3662_v56, %v3661_v38  ;;  %v5251_v33 = vadd.f32 %v3660_v48, %v5199_v35 }
 0x1dd   : > { %v5253_v46 = vadd.f32 %v3663_v42, %v1739_v10 }
 0x1df   : > { %v3664_v5 = vpop.f32.mrb[100].mxu0 }
 0x1e0   : > { %v3665_v30 = vpop.f32.mrb[101].mxu0 }
 0x1e1   : > { %v3666_v22 = vadd.f32 %v3665_v30, %v3664_v5  ;;  %v3667_v26 = vpop.f32.mrb[102].mxu0 }
 0x1e2   : > { %v3668_v7 = vpop.f32.mrb[103].mxu0 }
 0x1e3   : > { %v3669_v2 = vadd.f32 %v3668_v7, %v3667_v26  ;;  %v5256_v15 = vadd.f32 %v3666_v22, %v5195_v39 }
 0x1e5   : > { %v5259_v17 = vadd.f32 %v3669_v2, %v5206_v14 }
 0x1e7   : > { %v3670_v0 = vpop.f32.mrb[104].mxu0 }
 0x1e8   : > { %v3671_v25 = vpop.f32.mrb[105].mxu0 }
 0x1e9   : > { %v3672_v37 = vadd.f32 %v3671_v25, %v3670_v0  ;;  %v3673_v58 = vpop.f32.mrb[106].mxu0 }
 0x1ea   : > { %v3674_v35 = vpop.f32.mrb[107].mxu0 }
 0x1eb   : > { %v3675_v21 = vadd.f32 %v3674_v35, %v3673_v58  ;;  %v5261_v10 = vadd.f32 %v3672_v37, %v1752_v53 }
 0x1ed   : > { %v5263_v18 = vadd.f32 %v3675_v21, %v1755_v13 }
 0x1ef   : > { %v3676_v59 = vpop.f32.mrb[108].mxu0 }
 0x1f0   : > { %v3677_v24 = vpop.f32.mrb[109].mxu0 }
 0x1f1   : > { %v3678_v52 = vadd.f32 %v3677_v24, %v3676_v59  ;;  %v3679_v51 = vpop.f32.mrb[110].mxu0 }
 0x1f2   : > { %v3680_v1 = vpop.f32.mrb[111].mxu0 }
 0x1f3   : > { %v3681_v39 = vadd.f32 %v3680_v1, %v3679_v51  ;;  %v5266_v14 = vadd.f32 %v3678_v52, %v5215_v44 }
 0x1f5   : > { %v5269_v23 = vadd.f32 %v3681_v39, %v5224_v29 }
 0x1f7   : > { %v3682_v28 = vpop.f32.mrb[112].mxu0  ;;  %v3868_v32 = vpop.f32.mrb[80].mxu1 }
 0x1f8   : > { %v3917_v47 = vadd.f32 %v3916_v50, %v3868_v32  ;;  %v3683_v53 = vpop.f32.mrb[113].mxu0  ;;  %v2379_v6 = vpop.f32.mrb[81].mxu1 }
 0x1f9   : > { %v3684_v13 = vadd.f32 %v3683_v53, %v3682_v28  ;;  %v3921_v55 = vadd.f32 %v5231_v34, %v2379_v6  ;;  %v3685_v54 = vpop.f32.mrb[114].mxu0  ;;  %v3869_v4 = vpop.f32.mrb[82].mxu1 }
 0x1fa   : > { %v3925_v61 = vadd.f32 %v3924_v20, %v3869_v4  ;;  %v3686_v48 = vpop.f32.mrb[115].mxu0  ;;  %v2382_v38 = vpop.f32.mrb[83].mxu1  ;;  %v2737_v22 = vmul.f32 %v3917_v47, %v3917_v47 }
 0x1fb   : > { %v3687_v44 = vadd.f32 %v3686_v48, %v3685_v54  ;;  %v3929_v29 = vadd.f32 %v5234_v49, %v2382_v38  ;;  %v5281_v50 = vadd.f32 %v5118_v11, %v3684_v13  ;;  %v2735_v34 = vmul.f32 %v3921_v55, %v3921_v55  ;;  %v5366_v13 = vld [vmem:[#allocation2_spill] sm:$0xff] }
 0x1fc   : > { %v3244_v56 = vpack.c.bf16 %v3925_v61, %v3917_v47  ;;  %v2738_v25 = vmul.f32 %v3925_v61, %v3925_v61 }
 0x1fd   : > { %v3239_v42 = vpack.c.bf16 %v3929_v29, %v3921_v55  ;;  %v2698_v20 = vadd.f32 %v3929_v29, %v3921_v55  ;;  %v2736_v5 = vmul.f32 %v3929_v29, %v3929_v29  ;;  %v5284_v30 = vadd.f32 %v5122_v8, %v3687_v44 }
 0x1fe   : > { %3331 = vst [vmem:[%s5277_s30 + $0x8] sm:$0xff] %v3244_v56  }
 0x1ff   : > { %3240 = vst [vmem:[%s5277_s30] sm:$0xff] %v3239_v42   ;;  %v2699_v26 = vadd.f32 %v3917_v47, %v2698_v20  ;;  %v2767_v7 = vadd.f32 %v2736_v5, %v2735_v34  ;;  %v3688_v2 = vpop.f32.mrb[116].mxu0  ;;  %v3872_v0 = vpop.f32.mrb[84].mxu1 }
 0x200   : > { %v3933_v49 = vadd.f32 %v5245_v40, %v3872_v0  ;;  %v3689_v11 = vpop.f32.mrb[117].mxu0  ;;  %v2395_v37 = vpop.f32.mrb[85].mxu1 }
 0x201   : > { %v2768_v58 = vadd.f32 %v2767_v7, %v2737_v22  ;;  %v3690_v35 = vadd.f32 %v3689_v11, %v3688_v2  ;;  %v3937_v21 = vadd.f32 %v5239_v43, %v2395_v37  ;;  %v2700_v59 = vadd.f32 %v3925_v61, %v2699_v26  ;;  %v3691_v8 = vpop.f32.mrb[118].mxu0  ;;  %v3873_v24 = vpop.f32.mrb[86].mxu1 }
 0x202   : > { %v3941_v52 = vadd.f32 %v5248_v41, %v3873_v24  ;;  %v3692_v51 = vpop.f32.mrb[119].mxu0  ;;  %v2398_v1 = vpop.f32.mrb[87].mxu1  ;;  %v2741_v38 = vmul.f32 %v3933_v49, %v3933_v49 }
 0x203   : > { %v2701_v39 = vadd.f32 %v3937_v21, %v2700_v59  ;;  %v2739_v28 = vmul.f32 %v3937_v21, %v3937_v21  ;;  %v2769_v32 = vadd.f32 %v2768_v58, %v2738_v25  ;;  %v3693_v47 = vadd.f32 %v3692_v51, %v3691_v8  ;;  %v5367_v8 = vld [vmem:[#allocation3_spill] sm:$0xff] }
 0x204   : > { %v3254_v40 = vpack.c.bf16 %v3941_v52, %v3933_v49  ;;  %v3945_v53 = vadd.f32 %v5242_v3, %v2398_v1  ;;  %v5293_v6 = vadd.f32 %v5126_v60, %v3690_v35  ;;  %v2742_v22 = vmul.f32 %v3941_v52, %v3941_v52 }
 0x205   : > { %v2770_v43 = vadd.f32 %v2769_v32, %v2739_v28  ;;  %v5296_v55 = vadd.f32 %v5366_v13, %v3693_v47 }
 0x206   : > { %3333 = vst [vmem:[%s5277_s30 + $0x18] sm:$0xff] %v3254_v40   ;;  %v3249_v54 = vpack.c.bf16 %v3945_v53, %v3937_v21  ;;  %v2702_v41 = vadd.f32 %v3945_v53, %v2701_v39  ;;  %v2740_v4 = vmul.f32 %v3945_v53, %v3945_v53 }
 0x207   : > { %v3694_v61 = vpop.f32.mrb[120].mxu0  ;;  %v3876_v48 = vpop.f32.mrb[88].mxu1 }
 0x208   : > { %3332 = vst [vmem:[%s5277_s30 + $0x10] sm:$0xff] %v3249_v54   ;;  %v2703_v44 = vadd.f32 %v3933_v49, %v2702_v41  ;;  %v2771_v29 = vadd.f32 %v2770_v43, %v2740_v4  ;;  %v3949_v34 = vadd.f32 %v5256_v15, %v3876_v48  ;;  %v3695_v3 = vpop.f32.mrb[121].mxu0  ;;  %v2411_v56 = vpop.f32.mrb[89].mxu1 }
 0x209   : > { %v3696_v60 = vadd.f32 %v3695_v3, %v3694_v61  ;;  %v3953_v42 = vadd.f32 %v5251_v33, %v2411_v56  ;;  %v3697_v20 = vpop.f32.mrb[122].mxu0  ;;  %v3877_v5 = vpop.f32.mrb[90].mxu1 }
 0x20a   : > { %v2772_v26 = vadd.f32 %v2771_v29, %v2741_v38  ;;  %v2704_v7 = vadd.f32 %v3941_v52, %v2703_v44  ;;  %v3957_v2 = vadd.f32 %v5259_v17, %v3877_v5  ;;  %v3698_v0 = vpop.f32.mrb[123].mxu0  ;;  %v2414_v25 = vpop.f32.mrb[91].mxu1  ;;  %v2745_v39 = vmul.f32 %v3949_v34, %v3949_v34 }
 0x20b   : > { %v2743_v49 = vmul.f32 %v3953_v42, %v3953_v42  ;;  %v3699_v11 = vadd.f32 %v3698_v0, %v3697_v20  ;;  %v3961_v15 = vadd.f32 %v5253_v46, %v2414_v25  ;;  %v5305_v37 = vadd.f32 %v5134_v12, %v3696_v60 }
 0x20c   : > { %v2705_v58 = vadd.f32 %v3953_v42, %v2704_v7  ;;  %v2773_v33 = vadd.f32 %v2772_v26, %v2742_v22  ;;  %v3264_v35 = vpack.c.bf16 %v3957_v2, %v3949_v34  ;;  %v2746_v54 = vmul.f32 %v3957_v2, %v3957_v2 }
 0x20d   : > { %v3259_v21 = vpack.c.bf16 %v3961_v15, %v3953_v42  ;;  %v2744_v59 = vmul.f32 %v3961_v15, %v3961_v15  ;;  %v5308_v24 = vadd.f32 %v5367_v8, %v3699_v11 }
 0x20e   : > { %v2774_v52 = vadd.f32 %v2773_v33, %v2743_v49  ;;  %3335 = vst [vmem:[%s5277_s30 + $0x28] sm:$0xff] %v3264_v35   ;;  %v2706_v17 = vadd.f32 %v3961_v15, %v2705_v58 }
 0x20f   : > { %3334 = vst [vmem:[%s5277_s30 + $0x20] sm:$0xff] %v3259_v21   ;;  %v3700_v51 = vpop.f32.mrb[124].mxu0  ;;  %v3880_v1 = vpop.f32.mrb[92].mxu1 }
 0x210   : > { %v2707_v28 = vadd.f32 %v3949_v34, %v2706_v17  ;;  %v2775_v46 = vadd.f32 %v2774_v52, %v2744_v59  ;;  %v3965_v12 = vadd.f32 %v5266_v14, %v3880_v1  ;;  %v3701_v32 = vpop.f32.mrb[125].mxu0  ;;  %v2427_v47 = vpop.f32.mrb[93].mxu1 }
 0x211   : > { %v3702_v40 = vadd.f32 %v3701_v32, %v3700_v51  ;;  %v3969_v53 = vadd.f32 %v5261_v10, %v2427_v47  ;;  %v3703_v43 = vpop.f32.mrb[126].mxu0  ;;  %v3881_v13 = vpop.f32.mrb[94].mxu1 }
 0x212   : > { %v2776_v41 = vadd.f32 %v2775_v46, %v2745_v39  ;;  %v2708_v4 = vadd.f32 %v3957_v2, %v2707_v28  ;;  %v3973_v61 = vadd.f32 %v5269_v23, %v3881_v13  ;;  %v3704_v48 = vpop.f32.mrb[127].mxu0  ;;  %v2430_v38 = vpop.f32.mrb[95].mxu1  ;;  %v2749_v7 = vmul.f32 %v3965_v12, %v3965_v12 }
 0x213   : > { %v2747_v44 = vmul.f32 %v3969_v53, %v3969_v53  ;;  %v3705_v29 = vadd.f32 %v3704_v48, %v3703_v43  ;;  %v3977_v14 = vadd.f32 %v5263_v18, %v2430_v38  ;;  %v3991_v34 = vadd.f32 %v5142_v16, %v3702_v40 }
 0x214   : > { %v2709_v3 = vadd.f32 %v3969_v53, %v2708_v4  ;;  %v2777_v56 = vadd.f32 %v2776_v41, %v2746_v54  ;;  %v3274_v10 = vpack.c.bf16 %v3973_v61, %v3965_v12  ;;  %v2750_v33 = vmul.f32 %v3973_v61, %v3973_v61 }
 0x215   : > { %v3269_v60 = vpack.c.bf16 %v3977_v14, %v3969_v53  ;;  %v2748_v42 = vmul.f32 %v3977_v14, %v3977_v14  ;;  %v3997_v20 = vadd.f32 %v5146_v19, %v3705_v29 }
 0x216   : > { %v2778_v5 = vadd.f32 %v2777_v56, %v2747_v44  ;;  %3337 = vst [vmem:[%s5277_s30 + $0x38] sm:$0xff] %v3274_v10   ;;  %v2710_v22 = vadd.f32 %v3977_v14, %v2709_v3 }
 0x217   : > { %3336 = vst [vmem:[%s5277_s30 + $0x30] sm:$0xff] %v3269_v60   ;;  %v3706_v23 = vpop.f32.mrb[128].mxu0  ;;  %v3884_v26 = vpop.f32.mrb[0].mxu1 }
 0x218   : > { %v2711_v2 = vadd.f32 %v3965_v12, %v2710_v22  ;;  %v2779_v0 = vadd.f32 %v2778_v5, %v2748_v42  ;;  %v3980_v18 = vadd.f32 %v5293_v6, %v3884_v26  ;;  %v3707_v25 = vpop.f32.mrb[129].mxu0  ;;  %v2443_v16 = vpop.f32.mrb[1].mxu1 }
 0x219   : > { %v3708_v49 = vadd.f32 %v3707_v25, %v3706_v23  ;;  %v3983_v11 = vadd.f32 %v5281_v50, %v2443_v16  ;;  %v3709_v15 = vpop.f32.mrb[130].mxu0  ;;  %v3885_v58 = vpop.f32.mrb[2].mxu1 }
 0x21a   : > { %v2780_v19 = vadd.f32 %v2779_v0, %v2749_v7  ;;  %v2712_v35 = vadd.f32 %v3973_v61, %v2711_v2  ;;  %v3986_v21 = vadd.f32 %v5296_v55, %v3885_v58  ;;  %v3710_v59 = vpop.f32.mrb[131].mxu0  ;;  %v2446_v8 = vpop.f32.mrb[3].mxu1  ;;  %v2753_v53 = vmul.f32 %v3980_v18, %v3980_v18 }
 0x21b   : > { %v2751_v52 = vmul.f32 %v3983_v11, %v3983_v11  ;;  %v3711_v17 = vadd.f32 %v3710_v59, %v3709_v15  ;;  %v3989_v6 = vadd.f32 %v5284_v30, %v2446_v8  ;;  %v4006_v51 = vadd.f32 %v5158_v57, %v3708_v49 }
 0x21c   : > { %v2713_v1 = vadd.f32 %v3983_v11, %v2712_v35  ;;  %v2781_v39 = vadd.f32 %v2780_v19, %v2750_v33  ;;  %v3284_v50 = vpack.c.bf16 %v3986_v21, %v3980_v18  ;;  %v2754_v38 = vmul.f32 %v3986_v21, %v3986_v21 }
 0x21d   : > { %v3279_v28 = vpack.c.bf16 %v3989_v6, %v3983_v11  ;;  %v2752_v46 = vmul.f32 %v3989_v6, %v3989_v6  ;;  %v4012_v12 = vadd.f32 %v5168_v62, %v3711_v17 }
 0x21e   : > { %v2782_v32 = vadd.f32 %v2781_v39, %v2751_v52  ;;  %3339 = vst [vmem:[%s5277_s30 + $0x48] sm:$0xff] %v3284_v50   ;;  %v2714_v47 = vadd.f32 %v3989_v6, %v2713_v1 }
 0x21f   : > { %3338 = vst [vmem:[%s5277_s30 + $0x40] sm:$0xff] %v3279_v28   ;;  %v3712_v55 = vpop.f32.mrb[132].mxu0  ;;  %v3888_v40 = vpop.f32.mrb[4].mxu1 }
 0x220   : > { %v2715_v43 = vadd.f32 %v3980_v18, %v2714_v47  ;;  %v2783_v13 = vadd.f32 %v2782_v32, %v2752_v46  ;;  %v3992_v54 = vadd.f32 %v3991_v34, %v3888_v40  ;;  %v3713_v30 = vpop.f32.mrb[133].mxu0  ;;  %v2459_v41 = vpop.f32.mrb[5].mxu1 }
 0x221   : > { %v3714_v57 = vadd.f32 %v3713_v30, %v3712_v55  ;;  %v3995_v4 = vadd.f32 %v5305_v37, %v2459_v41  ;;  %v3715_v61 = vpop.f32.mrb[134].mxu0  ;;  %v3889_v48 = vpop.f32.mrb[6].mxu1 }
 0x222   : > { %v2784_v44 = vadd.f32 %v2783_v13, %v2753_v53  ;;  %v2716_v62 = vadd.f32 %v3986_v21, %v2715_v43  ;;  %v3998_v29 = vadd.f32 %v3997_v20, %v3889_v48  ;;  %v3716_v14 = vpop.f32.mrb[135].mxu0  ;;  %v2462_v3 = vpop.f32.mrb[7].mxu1  ;;  %v2757_v18 = vmul.f32 %v3992_v54, %v3992_v54 }
 0x223   : > { %v2755_v56 = vmul.f32 %v3995_v4, %v3995_v4  ;;  %v3717_v10 = vadd.f32 %v3716_v14, %v3715_v61  ;;  %v4001_v60 = vadd.f32 %v5308_v24, %v2462_v3  ;;  %v4003_v34 = vadd.f32 %v5180_v31, %v3714_v57 }
 0x224   : > { %v2717_v42 = vadd.f32 %v3995_v4, %v2716_v62  ;;  %v2785_v5 = vadd.f32 %v2784_v44, %v2754_v38  ;;  %v3294_v22 = vpack.c.bf16 %v3998_v29, %v3992_v54  ;;  %v2758_v19 = vmul.f32 %v3998_v29, %v3998_v29 }
 0x225   : > { %v3289_v37 = vpack.c.bf16 %v4001_v60, %v3995_v4  ;;  %v2756_v23 = vmul.f32 %v4001_v60, %v4001_v60  ;;  %v4009_v26 = vadd.f32 %v5190_v36, %v3717_v10 }
 0x226   : > { %v2786_v7 = vadd.f32 %v2785_v5, %v2755_v56  ;;  %3341 = vst [vmem:[%s5277_s30 + $0x58] sm:$0xff] %v3294_v22   ;;  %v2718_v2 = vadd.f32 %v4001_v60, %v2717_v42 }
 0x227   : > { %3340 = vst [vmem:[%s5277_s30 + $0x50] sm:$0xff] %v3289_v37   ;;  %v3718_v20 = vpop.f32.mrb[136].mxu0  ;;  %v3892_v0 = vpop.f32.mrb[8].mxu1 }
 0x228   : > { %v2719_v25 = vadd.f32 %v3992_v54, %v2718_v2  ;;  %v2787_v16 = vadd.f32 %v2786_v7, %v2756_v23  ;;  %v4004_v49 = vadd.f32 %v4003_v34, %v3892_v0  ;;  %v3719_v24 = vpop.f32.mrb[137].mxu0  ;;  %v2475_v11 = vpop.f32.mrb[9].mxu1 }
 0x229   : > { %v3720_v31 = vadd.f32 %v3719_v24, %v3718_v20  ;;  %v4007_v15 = vadd.f32 %v4006_v51, %v2475_v11  ;;  %v3721_v58 = vpop.f32.mrb[138].mxu0  ;;  %v3893_v33 = vpop.f32.mrb[10].mxu1 }
 0x22a   : > { %v2788_v35 = vadd.f32 %v2787_v16, %v2757_v18  ;;  %v2720_v36 = vadd.f32 %v3998_v29, %v2719_v25  ;;  %v4010_v21 = vadd.f32 %v4009_v26, %v3893_v33  ;;  %v3722_v59 = vpop.f32.mrb[139].mxu0  ;;  %v2478_v8 = vpop.f32.mrb[11].mxu1  ;;  %v2761_v43 = vmul.f32 %v4004_v49, %v4004_v49 }
 0x22b   : > { %v2759_v52 = vmul.f32 %v4007_v15, %v4007_v15  ;;  %v3723_v17 = vadd.f32 %v3722_v59, %v3721_v58  ;;  %v4013_v6 = vadd.f32 %v4012_v12, %v2478_v8  ;;  %v4018_v1 = vadd.f32 %v5202_v63, %v3720_v31 }
 0x22c   : > { %v2721_v39 = vadd.f32 %v4007_v15, %v2720_v36  ;;  %v2789_v50 = vadd.f32 %v2788_v35, %v2758_v19  ;;  %v3304_v28 = vpack.c.bf16 %v4010_v21, %v4004_v49  ;;  %v2762_v61 = vmul.f32 %v4010_v21, %v4010_v21 }
 0x22d   : > { %v3299_v46 = vpack.c.bf16 %v4013_v6, %v4007_v15  ;;  %v2760_v51 = vmul.f32 %v4013_v6, %v4013_v6  ;;  %v4024_v32 = vadd.f32 %v5210_v27, %v3723_v17 }
 0x22e   : > { %v2790_v47 = vadd.f32 %v2789_v50, %v2759_v52  ;;  %3343 = vst [vmem:[%s5277_s30 + $0x68] sm:$0xff] %v3304_v28   ;;  %v2722_v55 = vadd.f32 %v4013_v6, %v2721_v39 }
 0x22f   : > { %3342 = vst [vmem:[%s5277_s30 + $0x60] sm:$0xff] %v3299_v46   ;;  %v3724_v40 = vpop.f32.mrb[140].mxu0  ;;  %v3896_v53 = vpop.f32.mrb[12].mxu1 }
 0x230   : > { %v2723_v13 = vadd.f32 %v4004_v49, %v2722_v55  ;;  %v2791_v54 = vadd.f32 %v2790_v47, %v2760_v51  ;;  %v3725_v30 = vpop.f32.mrb[141].mxu0  ;;  %v2491_v12 = vpop.f32.mrb[13].mxu1 }
 0x231   : > { %v3726_v41 = vadd.f32 %v3725_v30, %v3724_v40  ;;  %v4019_v63 = vadd.f32 %v4018_v1, %v2491_v12  ;;  %v3727_v57 = vpop.f32.mrb[142].mxu0  ;;  %v3897_v4 = vpop.f32.mrb[14].mxu1 }
 0x232   : > { %v2792_v48 = vadd.f32 %v2791_v54, %v2761_v43  ;;  %v2724_v38 = vadd.f32 %v4010_v21, %v2723_v13  ;;  %v3728_v44 = vpop.f32.mrb[143].mxu0  ;;  %v2494_v27 = vpop.f32.mrb[15].mxu1 }
 0x233   : > { %v4015_v62 = vadd.f32 %v5220_v9, %v3726_v41  ;;  %v2763_v29 = vmul.f32 %v4019_v63, %v4019_v63  ;;  %v3729_v14 = vadd.f32 %v3728_v44, %v3727_v57  ;;  %v4025_v3 = vadd.f32 %v4024_v32, %v2494_v27 }
 0x234   : > { %v2725_v56 = vadd.f32 %v4019_v63, %v2724_v38  ;;  %v2793_v10 = vadd.f32 %v2792_v48, %v2762_v61 }
 0x235   : > { %v4016_v60 = vadd.f32 %v4015_v62, %v3896_v53  ;;  %v4021_v34 = vadd.f32 %v5228_v45, %v3729_v14  ;;  %v3309_v42 = vpack.c.bf16 %v4025_v3, %v4019_v63  ;;  %v2764_v5 = vmul.f32 %v4025_v3, %v4025_v3 }
 0x236   : > { %v2794_v22 = vadd.f32 %v2793_v10, %v2763_v29  ;;  %v2726_v37 = vadd.f32 %v4025_v3, %v2725_v56 }
 0x237   : > { %v2765_v23 = vmul.f32 %v4016_v60, %v4016_v60  ;;  %v4022_v26 = vadd.f32 %v4021_v34, %v3897_v4  ;;  %3344 = vst [vmem:[%s5277_s30 + $0x70] sm:$0xff] %v3309_v42  }
 0x238   : > { %v2727_v7 = vadd.f32 %v4016_v60, %v2726_v37  ;;  %v2795_v2 = vadd.f32 %v2794_v22, %v2764_v5 }
 0x239   : > { %v3314_v9 = vpack.c.bf16 %v4022_v26, %v4016_v60  ;;  %v2766_v20 = vmul.f32 %v4022_v26, %v4022_v26 }
 0x23a   : > { %v2728_v0 = vadd.f32 %v4022_v26, %v2727_v7  ;;  %v2796_v18 = vadd.f32 %v2795_v2, %v2765_v23 }
 0x23b   : > { %3345 = vst [vmem:[%s5277_s30 + $0x78] sm:$0xff] %v3314_v9  }
 0x23c   : > { %v2729_v25 = vrot.slane %v2728_v0, 4  ;;  %v2797_v16 = vadd.f32 %v2796_v18, %v2766_v20 }
 0x23e   : > { %v2730_v49 = vadd.f32 %v2729_v25, %v2728_v0  ;;  %v2798_v24 = vrot.slane %v2797_v16, 4 }
 0x240   : > { %v2731_v45 = vrot.slane %v2730_v49, 2  ;;  %v2799_v11 = vadd.f32 %v2798_v24, %v2797_v16 }
 0x242   : > { %v2732_v31 = vadd.f32 %v2731_v45, %v2730_v49  ;;  %v2800_v15 = vrot.slane %v2799_v11, 2 }
 0x244   : > { %v2733_v58 = vrot.slane %v2732_v31, 1  ;;  %v2801_v33 = vadd.f32 %v2800_v15, %v2799_v11 }
 0x246   : > { %v2734_v19 = vadd.f32 %v2733_v58, %v2732_v31  ;;  %v2802_v35 = vrot.slane %v2801_v33, 1 }
 0x248   : > { %v2803_v36 = vadd.f32 %v2802_v35, %v2801_v33  ;;  %2804 = vst [vmem:[%s268_s8] sm:$0xff] %v2734_v19 }
 0x24a   : > { %2805 = vst [vmem:[%s272_s12] sm:$0xff] %v2803_v36 }
 0x24b PF: > { %s17_s21 = sadd.s32 1, %s4161_s21  }
 0x24c   : > { %p14_p4 = scmp.ge.s32.totalorder %s17_s21, 4  }
 0x24e   :  { %16 = sbr.rel (!%p14_p4) target bundleno = 1 (0x1), region = 92 }

</bundles_post_ra>
